<compile_context>
chip_gen: v7x
topology: tpu7x:2x2x1
jax: 0.10.0
libtpu: 0.0.40
codegen_flags: <defaults>
</compile_context>

<pallas_src>
import functools
import math

import jax
import jax.numpy as jnp
import numpy as np
from jax import lax
from jax.experimental import pallas as pl
from jax.experimental.pallas import tpu as pltpu

# ----------------------------- configuration -------------------------------
RADIUS = 0.6
NSAMPLES = 8            # k
SPATIAL_STRIDE = 4
TEMPORAL_KERNEL = 3
TEMPORAL_STRIDE = 2
TEMPORAL_PADDING = (1, 0)    # P4DConv default padding mode: 'replicate'
EMB_RELU = False

DIM = 32                # transformer feature dim
DEPTH = 2
HEADS = 2
DIM_HEAD = 8
MLP_DIM = 64
NUM_CLASSES = 17 * 3

B = 2
NFRAMES = 4
NPOINTS = 32            # points per frame (5000 in the real dataset)
IN_FEAT = 3             # radar[..., 3:] channels

INNER = HEADS * DIM_HEAD


# ----------------------------- small math helpers ---------------------------
def _round_up(x, m):
    return (x + m - 1) // m * m


def _layer_norm(x, g, b, eps=1e-5):
    mu = jnp.mean(x, axis=-1, keepdims=True)
    xc = x - mu
    var = jnp.mean(xc * xc, axis=-1, keepdims=True)
    return xc * lax.rsqrt(var + eps) * g + b


def _erf(x):
    # Abramowitz & Stegun 7.1.26 (|err| < 1.5e-7): float32-accurate stand-in
    # for lax.erf so that nn.GELU() (exact) semantics are reproduced.
    a1, a2, a3, a4, a5 = 0.254829592, -0.284496736, 1.421413741, -1.453152027, 1.061405429
    p = 0.3275911
    s = jnp.where(x >= 0, 1.0, -1.0)
    ax = jnp.abs(x)
    t = 1.0 / (1.0 + p * ax)
    poly = ((((a5 * t + a4) * t + a3) * t + a2) * t + a1) * t
    return s * (1.0 - poly * jnp.exp(-ax * ax))


def _gelu_exact(x):
    return 0.5 * x * (1.0 + _erf(x * (1.0 / math.sqrt(2.0))))


# ----------------------------- Pallas kernels -------------------------------
def _embed_kernel(g_ref, xyzt_ref, we_ref, wp_ref, bp_ref, o_ref):
    # g_ref    : (TILE, S, 7)   S = temporal_window * k   (4 disp ++ 3 feat chans)
    # xyzt_ref : (TILE, 4)      anchor xyzt tokens
    # we_ref   : (7, DIM)       rows 0..3: conv_d weights, rows 4..6: conv_f weights
    # wp_ref   : (4, DIM), bp_ref: (1, DIM)   pos_embedding Conv1d(4->dim)
    # o_ref    : (TILE, DIM)    max-pooled tube feature + positional embedding
    tile, s, c = g_ref.shape
    d = we_ref.shape[1]
    # one big MXU push instead of S tiny ones; pooling goes to the XLU slot
    g2d = g_ref[...].reshape(tile * s, c)
    y = jnp.dot(g2d, we_ref[...], preferred_element_type=jnp.float32)     # (tile*s, d)
    feat = jnp.max(y.reshape(tile, s, d), axis=1)                         # (tile, d)
    pos = jnp.dot(xyzt_ref[...], wp_ref[...], preferred_element_type=jnp.float32)
    o_ref[...] = (feat + pos + bp_ref[...]).astype(o_ref.dtype)


def _transformer_head_kernel(x_ref,
                             g1_ref, b1_ref, wqkv_ref, wo_ref, bo_ref,
                             g2_ref, b2_ref, wf1_ref, bf1_ref, wf2_ref, bf2_ref,
                             hg_ref, hb_ref, hw1_ref, hb1_ref, hw2_ref, hb2_ref,
                             o_ref, *, depth, heads, dim_head):
    # x_ref: (B, T, D).  Per-layer weights are stacked on a leading DEPTH axis;
    # the activation stays resident in VMEM across all layers + the head.
    bb, t, d = x_ref.shape
    inner = heads * dim_head
    scale = dim_head ** -0.5
    bt = bb * t

    x = x_ref[...].astype(jnp.float32)                         # (B, T, D)

    for l in range(depth):                                     # static: DEPTH is small
        # --- PreNorm + multi-head self attention + residual ---
        xn = _layer_norm(x.reshape(bt, d), g1_ref[l], b1_ref[l])
        qkv = jnp.dot(xn, wqkv_ref[l], preferred_element_type=jnp.float32)  # (bt, 3*inner)
        qkv = qkv.reshape(bb, t, 3 * inner)

        head_out = []
        for h in range(heads):                                 # static; matmuls batched over B
            q = qkv[:, :, h * dim_head:(h + 1) * dim_head]
            k = qkv[:, :, inner + h * dim_head: inner + (h + 1) * dim_head]
            v = qkv[:, :, 2 * inner + h * dim_head: 2 * inner + (h + 1) * dim_head]
            dots = jnp.einsum('bqd,bkd->bqk', q, k,
                              preferred_element_type=jnp.float32) * scale   # (B, T, T)
            dots = dots - jnp.max(dots, axis=-1, keepdims=True)
            e = jnp.exp(dots)
            attn = e * pl.reciprocal(jnp.sum(e, axis=-1, keepdims=True), approx=True)
            head_out.append(jnp.einsum('bqk,bkd->bqd', attn, v,
                                       preferred_element_type=jnp.float32))  # (B, T, dh)
        heads_cat = jnp.concatenate(head_out, axis=-1)          # (B, T, inner)
        proj = jnp.dot(heads_cat.reshape(bt, inner), wo_ref[l],
                       preferred_element_type=jnp.float32) + bo_ref[l]        # (bt, D)
        x = x + proj.reshape(bb, t, d)

        # --- PreNorm + feed-forward (Linear, GELU, Linear) + residual ---
        xn2 = _layer_norm(x.reshape(bt, d), g2_ref[l], b2_ref[l])
        h1 = jnp.dot(xn2, wf1_ref[l], preferred_element_type=jnp.float32) + bf1_ref[l]
        h1 = _gelu_exact(h1)
        ff = jnp.dot(h1, wf2_ref[l], preferred_element_type=jnp.float32) + bf2_ref[l]
        x = x + ff.reshape(bb, t, d)

    # --- torch.max over tokens, then LayerNorm -> Linear -> ReLU -> Linear ---
    m = jnp.max(x, axis=1)                                      # (B, D)
    mn = _layer_norm(m, hg_ref[...], hb_ref[...])
    hh = jnp.maximum(jnp.dot(mn, hw1_ref[...], preferred_element_type=jnp.float32)
                     + hb1_ref[...], 0.0)
    y = jnp.dot(hh, hw2_ref[...], preferred_element_type=jnp.float32) + hb2_ref[...]
    o_ref[...] = y.astype(o_ref.dtype)


# ----------------------------- Pallas wrappers ------------------------------
def embed_tokens(groups_flat, xyzts_flat, w_embed, w_pos, b_pos, *, max_tile=512):
    """Fused tube-embedding (1x1 convs + spatio-temporal max) + pos-embed add."""
    rows, s, c = groups_flat.shape
    d = w_embed.shape[1]
    # tile is a perf knob: pad rows to a tile multiple instead of asserting.
    tile = min(max_tile, _round_up(rows, 8))
    rows_p = _round_up(rows, tile)
    if rows_p != rows:
        groups_flat = jnp.pad(groups_flat, ((0, rows_p - rows), (0, 0), (0, 0)))
        xyzts_flat = jnp.pad(xyzts_flat, ((0, rows_p - rows), (0, 0)))

    out = pl.pallas_call(
        _embed_kernel,
        out_shape=jax.ShapeDtypeStruct((rows_p, d), jnp.float32),
        grid=(rows_p // tile,),
        in_specs=[pl.BlockSpec((tile, s, c), lambda i: (i, 0, 0)),
                  pl.BlockSpec((tile, 4), lambda i: (i, 0)),
                  pl.BlockSpec((c, d), lambda i: (0, 0)),
                  pl.BlockSpec((4, d), lambda i: (0, 0)),
                  pl.BlockSpec((1, d), lambda i: (0, 0))],
        out_specs=pl.BlockSpec((tile, d), lambda i: (i, 0)),
        compiler_params=pltpu.CompilerParams(
            dimension_semantics=("parallel",)),
    )(groups_flat, xyzts_flat, w_embed, w_pos, b_pos)
    return out[:rows]


def transformer_and_head(x, lp, hp):
    """All transformer layers + token max-pool + mlp_head in one pallas_call."""
    b, t, d = x.shape
    c = hp['w2'].shape[1]
    kernel = functools.partial(_transformer_head_kernel,
                               depth=DEPTH, heads=HEADS, dim_head=DIM_HEAD)
    # No grid: everything (a few tens of KiB) is resident in VMEM for the call.
    return pl.pallas_call(
        kernel,
        out_shape=jax.ShapeDtypeStruct((b, c), jnp.float32),
    )(x,
      lp['ln1_g'], lp['ln1_b'], lp['w_qkv'], lp['w_out'], lp['b_out'],
      lp['ln2_g'], lp['ln2_b'], lp['w_ff1'], lp['b_ff1'], lp['w_ff2'], lp['b_ff2'],
      hp['ln_g'], hp['ln_b'], hp['w1'], hp['b1'], hp['w2'], hp['b2'])


# ------------------- P4DConv grouping glue (plain JAX) ----------------------
def furthest_point_sample(xyz, npoint):
    """pointnet2-style FPS. xyz: (B, N, 3) -> (B, npoint) int32, starts at idx 0."""
    n = xyz.shape[1]

    def one(pts):
        mag = jnp.sum(pts * pts, axis=-1)
        valid = mag > 1e-3                       # CUDA kernel skips near-origin pts

        def body(j, carry):
            idxs, dists, last = carry
            diff = pts - pts[last]
            d = jnp.sum(diff * diff, axis=-1)
            dists = jnp.where(valid, jnp.minimum(dists, d), dists)
            cand = jnp.where(valid, dists, -jnp.inf)
            nxt = jnp.argmax(cand).astype(jnp.int32)
            idxs = idxs.at[j].set(nxt)
            return idxs, dists, nxt

        idxs0 = jnp.zeros((npoint,), jnp.int32)
        dists0 = jnp.full((n,), 1e10, jnp.float32)
        idxs, _, _ = lax.fori_loop(1, npoint, body, (idxs0, dists0, jnp.int32(0)))
        return idxs

    return jax.vmap(one)(xyz)


def ball_query(radius, k, xyz, new_xyz):
    """pointnet2-style ball query. xyz (B,N,3), new_xyz (B,M,3) -> (B,M,k) int32."""
    n = xyz.shape[1]
    d2 = jnp.sum((new_xyz[:, :, None, :] - xyz[:, None, :, :]) ** 2, axis=-1)   # (B,M,N)
    mask = d2 < radius * radius
    ar_n = jnp.arange(n)[None, None, :]
    key = jnp.where(mask, ar_n, n + ar_n)
    order = jnp.argsort(key, axis=-1)[..., :k]                                   # first k hits
    cnt = jnp.sum(mask, axis=-1)                                                 # (B,M)
    first = jnp.where(cnt > 0, order[..., 0], 0)
    ar_k = jnp.arange(k)[None, None, :]
    idx = jnp.where(ar_k < cnt[..., None], order, first[..., None])
    return idx.astype(jnp.int32)


def _gather_points(points, idx):
    # points (B, N, C), idx (B, ...) -> (B, ..., C)
    return jax.vmap(lambda p, i: p[i])(points, idx)


def p4dconv_grouping(point_xyz, point_fea):
    """Build anchors and grouped (disp4 ++ feat3) samples.
    point_xyz (B, L, N, 3), point_fea (B, L, N, 3)
    returns new_xyz (B, Lout, M, 3), groups (B, Lout, M, W*k, 7)."""
    _, l, n, _ = point_xyz.shape
    rt = TEMPORAL_KERNEL // 2
    assert TEMPORAL_KERNEL % 2 == 1
    assert (l + sum(TEMPORAL_PADDING) - TEMPORAL_KERNEL) % TEMPORAL_STRIDE == 0

    # temporal replicate padding [1, 0]
    xyz_pad = jnp.concatenate([point_xyz[:, :1]] * TEMPORAL_PADDING[0] + [point_xyz]
                              + [point_xyz[:, -1:]] * TEMPORAL_PADDING[1], axis=1)
    fea_pad = jnp.concatenate([point_fea[:, :1]] * TEMPORAL_PADDING[0] + [point_fea]
                              + [point_fea[:, -1:]] * TEMPORAL_PADDING[1], axis=1)
    lp = xyz_pad.shape[1]
    m = n // SPATIAL_STRIDE

    anchors, groups_all = [], []
    for t in range(rt, lp - rt, TEMPORAL_STRIDE):
        frame = xyz_pad[:, t]
        a_idx = furthest_point_sample(frame, m)
        anchor = _gather_points(frame, a_idx)                      # (B, M, 3)
        per_win = []
        for i in range(t - rt, t + rt + 1):
            nb = xyz_pad[:, i]
            idx = ball_query(RADIUS, NSAMPLES, nb, anchor)         # (B, M, k)
            nb_g = _gather_points(nb, idx)                         # (B, M, k, 3)
            fe_g = _gather_points(fea_pad[:, i], idx)              # (B, M, k, 3)
            disp = nb_g - anchor[:, :, None, :]
            tdisp = jnp.full(disp.shape[:-1] + (1,), float(i - t), jnp.float32)
            per_win.append(jnp.concatenate([disp, tdisp, fe_g], axis=-1))
        groups_all.append(jnp.concatenate(per_win, axis=2))        # (B, M, W*k, 7)
        anchors.append(anchor)

    new_xyz = jnp.stack(anchors, axis=1)                           # (B, Lout, M, 3)
    groups = jnp.stack(groups_all, axis=1)                         # (B, Lout, M, W*k, 7)
    return new_xyz, groups


# ----------------------------- parameters -----------------------------------
def init_params(key):
    keys = iter(jax.random.split(key, 32))

    def nrm(shape, scale=0.05):
        return jax.random.normal(next(keys), shape, jnp.float32) * scale

    params = {}
    wd = nrm((4, DIM))              # conv_d (Conv2d 4->dim, 1x1, no bias), transposed
    wf = nrm((IN_FEAT, DIM))        # conv_f (Conv2d 3->dim, 1x1, no bias), transposed
    params['w_embed'] = jnp.concatenate([wd, wf], axis=0)          # (7, DIM)
    params['w_pos'] = nrm((4, DIM))                                # pos_embedding Conv1d
    params['b_pos'] = nrm((1, DIM))

    # per-layer transformer weights stacked on a leading DEPTH axis
    params['layers'] = dict(
        ln1_g=jnp.ones((DEPTH, 1, DIM), jnp.float32),
        ln1_b=jnp.zeros((DEPTH, 1, DIM), jnp.float32),
        w_qkv=nrm((DEPTH, DIM, 3 * INNER)),
        w_out=nrm((DEPTH, INNER, DIM)),
        b_out=nrm((DEPTH, 1, DIM)),
        ln2_g=jnp.ones((DEPTH, 1, DIM), jnp.float32),
        ln2_b=jnp.zeros((DEPTH, 1, DIM), jnp.float32),
        w_ff1=nrm((DEPTH, DIM, MLP_DIM)),
        b_ff1=jnp.zeros((DEPTH, 1, MLP_DIM), jnp.float32) + nrm((DEPTH, 1, MLP_DIM)),
        w_ff2=nrm((DEPTH, MLP_DIM, DIM)),
        b_ff2=nrm((DEPTH, 1, DIM)),
    )
    params['head'] = dict(
        ln_g=jnp.ones((1, DIM), jnp.float32), ln_b=jnp.zeros((1, DIM), jnp.float32),
        w1=nrm((DIM, MLP_DIM)), b1=nrm((1, MLP_DIM)),
        w2=nrm((MLP_DIM, NUM_CLASSES)), b2=nrm((1, NUM_CLASSES)),
    )
    # NOTE: joint_posembeds_vector / dim_reduce_head / point & var prediction
    # heads exist in __init__ but are never used in forward(), so omitted.
    return params


# ----------------------------- forward ---------------------------------------
def p4transformer_forward(radar, params):
    b = radar.shape[0]
    point_xyz = radar[..., :3]
    point_fea = radar[..., 3:]

    # --- P4DConv grouping (glue) ---
    new_xyz, groups = p4dconv_grouping(point_xyz, point_fea)
    _, lout, m, s, c7 = groups.shape
    t_tok = lout * m

    # --- xyzt tokens ---
    tcol = jnp.broadcast_to(jnp.arange(1, lout + 1, dtype=jnp.float32)[None, :, None, None],
                            (b, lout, m, 1))
    xyzts = jnp.concatenate([new_xyz, tcol], axis=-1).reshape(b * t_tok, 4)

    # --- fused tube embedding (1x1 convs + max pool) + pos embedding add ---
    emb = embed_tokens(groups.reshape(b * t_tok, s, c7), xyzts,
                       params['w_embed'], params['w_pos'], params['b_pos'])
    x = emb.reshape(b, t_tok, DIM)
    if EMB_RELU:
        x = jnp.maximum(x, 0.0)

    # --- fused transformer stack + token max-pool + mlp head ---
    out = transformer_and_head(x, params['layers'], params['head'])   # (B, num_classes)
    return out.reshape(b, NUM_CLASSES // 3, 3)


# ----------------------------- main ------------------------------------------
if __name__ == "__main__":
    key = jax.random.PRNGKey(0)
    radar = jax.random.normal(key, (B, NFRAMES, NPOINTS, 6), jnp.float32)
    radar = radar.at[..., :3].multiply(0.25)   # keep points inside the ball-query radius scale

    params = init_params(jax.random.PRNGKey(42))

    fwd = jax.jit(p4transformer_forward)
    out = fwd(radar, params)
    out = jax.block_until_ready(out)
    assert out.shape == (B, 17, 3), out.shape
    assert bool(jnp.all(jnp.isfinite(out)))
    print("KERNEL_OK")
</pallas_src>

<mosaic_0001>
module attributes {stable_mosaic.version = 11 : i64} {
  func.func @_embed_kernel(%arg0: i32, %arg1: memref<32x24x7xf32, #tpu.memory_space<vmem>>, %arg2: memref<32x4xf32, #tpu.memory_space<vmem>>, %arg3: memref<7x32xf32, #tpu.memory_space<vmem>>, %arg4: memref<4x32xf32, #tpu.memory_space<vmem>>, %arg5: memref<1x32xf32, #tpu.memory_space<vmem>>, %arg6: memref<32x32xf32, #tpu.memory_space<vmem>>) attributes {dimension_semantics = [#tpu.dimension_semantics<parallel>], iteration_bounds = array<i64: 1>, scalar_prefetch = 0 : i64, scratch_operands = 0 : i64, tpu.core_type = #tpu.core_type<tc>, window_params = [{transform_indices = @transform_0, window_bounds = array<i64: 32, 24, 7>}, {transform_indices = @transform_1, window_bounds = array<i64: 32, 4>}, {pipeline_mode = #tpu.pipeline_mode<synchronous>, transform_indices = @transform_2, window_bounds = array<i64: 7, 32>}, {pipeline_mode = #tpu.pipeline_mode<synchronous>, transform_indices = @transform_3, window_bounds = array<i64: 4, 32>}, {pipeline_mode = #tpu.pipeline_mode<synchronous>, transform_indices = @transform_4, window_bounds = array<i64: 1, 32>}, {transform_indices = @transform_5, window_bounds = array<i64: 32, 32>}]} {
    %c0 = arith.constant 0 : index
    %c0_0 = arith.constant 0 : index
    %c0_1 = arith.constant 0 : index
    %0 = vector.load %arg1[%c0, %c0_0, %c0_1] : memref<32x24x7xf32, #tpu.memory_space<vmem>>, vector<32x24x7xf32>
    %1 = vector.shape_cast %0 : vector<32x24x7xf32> to vector<768x7xf32>
    %c0_2 = arith.constant 0 : index
    %c0_3 = arith.constant 0 : index
    %2 = vector.load %arg3[%c0_2, %c0_3] : memref<7x32xf32, #tpu.memory_space<vmem>>, vector<7x32xf32>
    %cst = arith.constant dense<0.000000e+00> : vector<768x32xf32>
    %3 = tpu.matmul %1, %2, %cst {dimension_numbers = #tpu.dot_dimension_numbers<[1], [0], [0], [1], [0, 0, 1, 1], [], []>} : vector<768x7xf32>, vector<7x32xf32>, vector<768x32xf32> -> vector<768x32xf32>
    %4 = vector.shape_cast %3 : vector<768x32xf32> to vector<32x24x32xf32>
    %cst_4 = arith.constant dense<0xFF800000> : vector<32x32xf32>
    %5 = vector.multi_reduction <maximumf>, %4, %cst_4 [1] : vector<32x24x32xf32> to vector<32x32xf32>
    %c0_5 = arith.constant 0 : index
    %c0_6 = arith.constant 0 : index
    %6 = vector.load %arg2[%c0_5, %c0_6] : memref<32x4xf32, #tpu.memory_space<vmem>>, vector<32x4xf32>
    %c0_7 = arith.constant 0 : index
    %c0_8 = arith.constant 0 : index
    %7 = vector.load %arg4[%c0_7, %c0_8] : memref<4x32xf32, #tpu.memory_space<vmem>>, vector<4x32xf32>
    %cst_9 = arith.constant dense<0.000000e+00> : vector<32x32xf32>
    %8 = tpu.matmul %6, %7, %cst_9 {dimension_numbers = #tpu.dot_dimension_numbers<[1], [0], [0], [1], [0, 0, 1, 1], [], []>} : vector<32x4xf32>, vector<4x32xf32>, vector<32x32xf32> -> vector<32x32xf32>
    %9 = arith.addf %5, %8 : vector<32x32xf32>
    %c0_10 = arith.constant 0 : index
    %c0_11 = arith.constant 0 : index
    %10 = vector.load %arg5[%c0_10, %c0_11] : memref<1x32xf32, #tpu.memory_space<vmem>>, vector<1x32xf32>
    %11 = vector.broadcast %10 : vector<1x32xf32> to vector<32x32xf32>
    %12 = arith.addf %9, %11 : vector<32x32xf32>
    %c0_12 = arith.constant 0 : index
    %c0_13 = arith.constant 0 : index
    %13 = vector.load %arg6[%c0_12, %c0_13] : memref<32x32xf32, #tpu.memory_space<vmem>>, vector<32x32xf32>
    tpu.vector_store %arg6[%c0_12, %c0_13], %12 {strides = array<i32>} : memref<32x32xf32, #tpu.memory_space<vmem>>, vector<32x32xf32>,
    return
  }
  func.func @transform_0(%arg0: i32) -> (i32, i32, i32) {
    %c0_i32 = arith.constant 0 : i32
    %c0_i32_0 = arith.constant 0 : i32
    %c0_i32_1 = arith.constant 0 : i32
    return %arg0, %c0_i32, %c0_i32_0 : i32, i32, i32
  }
  func.func @transform_1(%arg0: i32) -> (i32, i32) {
    %c0_i32 = arith.constant 0 : i32
    %c0_i32_0 = arith.constant 0 : i32
    return %arg0, %c0_i32 : i32, i32
  }
  func.func @transform_2(%arg0: i32) -> (i32, i32) {
    %c0_i32 = arith.constant 0 : i32
    %c0_i32_0 = arith.constant 0 : i32
    %c0_i32_1 = arith.constant 0 : i32
    return %c0_i32, %c0_i32_0 : i32, i32
  }
  func.func @transform_3(%arg0: i32) -> (i32, i32) {
    %c0_i32 = arith.constant 0 : i32
    %c0_i32_0 = arith.constant 0 : i32
    %c0_i32_1 = arith.constant 0 : i32
    return %c0_i32, %c0_i32_0 : i32, i32
  }
  func.func @transform_4(%arg0: i32) -> (i32, i32) {
    %c0_i32 = arith.constant 0 : i32
    %c0_i32_0 = arith.constant 0 : i32
    %c0_i32_1 = arith.constant 0 : i32
    return %c0_i32, %c0_i32_0 : i32, i32
  }
  func.func @transform_5(%arg0: i32) -> (i32, i32) {
    %c0_i32 = arith.constant 0 : i32
    %c0_i32_0 = arith.constant 0 : i32
    return %arg0, %c0_i32 : i32, i32
  }
}

module attributes {stable_mosaic.version = 11 : i64} {
  func.func @_transformer_head_kernel(%arg0: memref<2x16x32xf32, #tpu.memory_space<vmem>>, %arg1: memref<2x1x32xf32, #tpu.memory_space<vmem>>, %arg2: memref<2x1x32xf32, #tpu.memory_space<vmem>>, %arg3: memref<2x32x48xf32, #tpu.memory_space<vmem>>, %arg4: memref<2x16x32xf32, #tpu.memory_space<vmem>>, %arg5: memref<2x1x32xf32, #tpu.memory_space<vmem>>, %arg6: memref<2x1x32xf32, #tpu.memory_space<vmem>>, %arg7: memref<2x1x32xf32, #tpu.memory_space<vmem>>, %arg8: memref<2x32x64xf32, #tpu.memory_space<vmem>>, %arg9: memref<2x1x64xf32, #tpu.memory_space<vmem>>, %arg10: memref<2x64x32xf32, #tpu.memory_space<vmem>>, %arg11: memref<2x1x32xf32, #tpu.memory_space<vmem>>, %arg12: memref<1x32xf32, #tpu.memory_space<vmem>>, %arg13: memref<1x32xf32, #tpu.memory_space<vmem>>, %arg14: memref<32x64xf32, #tpu.memory_space<vmem>>, %arg15: memref<1x64xf32, #tpu.memory_space<vmem>>, %arg16: memref<64x51xf32, #tpu.memory_space<vmem>>, %arg17: memref<1x51xf32, #tpu.memory_space<vmem>>, %arg18: memref<2x51xf32, #tpu.memory_space<vmem>>) attributes {dimension_semantics = [], scalar_prefetch = 0 : i64, scratch_operands = 0 : i64, tpu.core_type = #tpu.core_type<tc>} {
    %c0 = arith.constant 0 : index
    %c0_0 = arith.constant 0 : index
    %c0_1 = arith.constant 0 : index
    %0 = vector.load %arg0[%c0, %c0_0, %c0_1] : memref<2x16x32xf32, #tpu.memory_space<vmem>>, vector<2x16x32xf32>
    %1 = vector.shape_cast %0 : vector<2x16x32xf32> to vector<32x32xf32>
    %c0_2 = arith.constant 0 : index
    %c0_3 = arith.constant 0 : index
    %c0_4 = arith.constant 0 : index
    %2 = vector.load %arg1[%c0_2, %c0_3, %c0_4] : memref<2x1x32xf32, #tpu.memory_space<vmem>>, vector<1x1x32xf32>
    %3 = vector.shape_cast %2 : vector<1x1x32xf32> to vector<1x32xf32>
    %c0_5 = arith.constant 0 : index
    %c0_6 = arith.constant 0 : index
    %c0_7 = arith.constant 0 : index
    %4 = vector.load %arg2[%c0_5, %c0_6, %c0_7] : memref<2x1x32xf32, #tpu.memory_space<vmem>>, vector<1x1x32xf32>
    %5 = vector.shape_cast %4 : vector<1x1x32xf32> to vector<1x32xf32>
    %cst = arith.constant dense<0.000000e+00> : vector<32xf32>
    %6 = vector.multi_reduction <add>, %1, %cst [1] : vector<32x32xf32> to vector<32xf32>
    %7 = vector.shape_cast %6 : vector<32xf32> to vector<32x1xf32>
    %cst_8 = arith.constant 3.200000e+01 : f32
    %8 = vector.broadcast %cst_8 : f32 to vector<32x1xf32>
    %9 = arith.divf %7, %8 : vector<32x1xf32>
    %10 = vector.broadcast %9 : vector<32x1xf32> to vector<32x32xf32>
    %11 = arith.subf %1, %10 : vector<32x32xf32>
    %12 = arith.mulf %11, %11 : vector<32x32xf32>
    %cst_9 = arith.constant dense<0.000000e+00> : vector<32xf32>
    %13 = vector.multi_reduction <add>, %12, %cst_9 [1] : vector<32x32xf32> to vector<32xf32>
    %14 = vector.shape_cast %13 : vector<32xf32> to vector<32x1xf32>
    %cst_10 = arith.constant 3.200000e+01 : f32
    %15 = vector.broadcast %cst_10 : f32 to vector<32x1xf32>
    %16 = arith.divf %14, %15 : vector<32x1xf32>
    %cst_11 = arith.constant 9.99999974E-6 : f32
    %17 = vector.broadcast %cst_11 : f32 to vector<32x1xf32>
    %18 = arith.addf %16, %17 : vector<32x1xf32>
    %19 = math.rsqrt %18 : vector<32x1xf32>
    %20 = vector.broadcast %19 : vector<32x1xf32> to vector<32x32xf32>
    %21 = arith.mulf %11, %20 : vector<32x32xf32>
    %22 = vector.broadcast %3 : vector<1x32xf32> to vector<32x32xf32>
    %23 = arith.mulf %21, %22 : vector<32x32xf32>
    %24 = vector.broadcast %5 : vector<1x32xf32> to vector<32x32xf32>
    %25 = arith.addf %23, %24 : vector<32x32xf32>
    %c0_12 = arith.constant 0 : index
    %c0_13 = arith.constant 0 : index
    %c0_14 = arith.constant 0 : index
    %26 = vector.load %arg3[%c0_12, %c0_13, %c0_14] : memref<2x32x48xf32, #tpu.memory_space<vmem>>, vector<1x32x48xf32>
    %27 = vector.shape_cast %26 : vector<1x32x48xf32> to vector<32x48xf32>
    %cst_15 = arith.constant dense<0.000000e+00> : vector<32x48xf32>
    %28 = tpu.matmul %25, %27, %cst_15 {dimension_numbers = #tpu.dot_dimension_numbers<[1], [0], [0], [1], [0, 0, 1, 1], [], []>} : vector<32x32xf32>, vector<32x48xf32>, vector<32x48xf32> -> vector<32x48xf32>
    %29 = vector.shape_cast %28 : vector<32x48xf32> to vector<2x16x48xf32>
    %30 = vector.extract_strided_slice %29 {offsets = [0, 0, 0], sizes = [2, 16, 8], strides = [1, 1, 1]} : vector<2x16x48xf32> to vector<2x16x8xf32>
    %31 = vector.extract_strided_slice %29 {offsets = [0, 0, 16], sizes = [2, 16, 8], strides = [1, 1, 1]} : vector<2x16x48xf32> to vector<2x16x8xf32>
    %32 = vector.extract_strided_slice %29 {offsets = [0, 0, 32], sizes = [2, 16, 8], strides = [1, 1, 1]} : vector<2x16x48xf32> to vector<2x16x8xf32>
    "tpu.trace_start"() <{level = 10 : i32, message = "bqd,bkd->bqk"}> : () -> ()
    %cst_16 = arith.constant dense<0.000000e+00> : vector<2x16x16xf32>
    %33 = tpu.matmul %30, %31, %cst_16 {dimension_numbers = #tpu.dot_dimension_numbers<[2], [2], [1], [1], [0, 0, 0, 1, 1, 1], [0], [0]>} : vector<2x16x8xf32>, vector<2x16x8xf32>, vector<2x16x16xf32> -> vector<2x16x16xf32>
    "tpu.trace_stop"() : () -> ()
    %cst_17 = arith.constant 0.353553385 : f32
    %34 = vector.broadcast %cst_17 : f32 to vector<2x16x16xf32>
    %35 = arith.mulf %33, %34 : vector<2x16x16xf32>
    %cst_18 = arith.constant dense<0xFF800000> : vector<2x16xf32>
    %36 = vector.multi_reduction <maximumf>, %35, %cst_18 [2] : vector<2x16x16xf32> to vector<2x16xf32>
    %37 = vector.shape_cast %36 : vector<2x16xf32> to vector<2x16x1xf32>
    %38 = vector.broadcast %37 : vector<2x16x1xf32> to vector<2x16x16xf32>
    %39 = arith.subf %35, %38 : vector<2x16x16xf32>
    %40 = math.exp %39 : vector<2x16x16xf32>
    %cst_19 = arith.constant dense<0.000000e+00> : vector<2x16xf32>
    %41 = vector.multi_reduction <add>, %40, %cst_19 [2] : vector<2x16x16xf32> to vector<2x16xf32>
    %42 = vector.shape_cast %41 : vector<2x16xf32> to vector<2x16x1xf32>
    %43 = tpu.reciprocal %42 {approx = true} : vector<2x16x1xf32> -> vector<2x16x1xf32>
    %44 = vector.broadcast %43 : vector<2x16x1xf32> to vector<2x16x16xf32>
    %45 = arith.mulf %40, %44 : vector<2x16x16xf32>
    "tpu.trace_start"() <{level = 10 : i32, message = "bqk,bkd->bqd"}> : () -> ()
    %cst_20 = arith.constant dense<0.000000e+00> : vector<2x16x8xf32>
    %46 = tpu.matmul %45, %32, %cst_20 {dimension_numbers = #tpu.dot_dimension_numbers<[2], [1], [1], [2], [0, 0, 0, 1, 1, 2], [0], [0]>} : vector<2x16x16xf32>, vector<2x16x8xf32>, vector<2x16x8xf32> -> vector<2x16x8xf32>
    "tpu.trace_stop"() : () -> ()
    %47 = vector.extract_strided_slice %29 {offsets = [0, 0, 8], sizes = [2, 16, 8], strides = [1, 1, 1]} : vector<2x16x48xf32> to vector<2x16x8xf32>
    %48 = vector.extract_strided_slice %29 {offsets = [0, 0, 24], sizes = [2, 16, 8], strides = [1, 1, 1]} : vector<2x16x48xf32> to vector<2x16x8xf32>
    %49 = vector.extract_strided_slice %29 {offsets = [0, 0, 40], sizes = [2, 16, 8], strides = [1, 1, 1]} : vector<2x16x48xf32> to vector<2x16x8xf32>
    "tpu.trace_start"() <{level = 10 : i32, message = "bqd,bkd->bqk"}> : () -> ()
    %cst_21 = arith.constant dense<0.000000e+00> : vector<2x16x16xf32>
    %50 = tpu.matmul %47, %48, %cst_21 {dimension_numbers = #tpu.dot_dimension_numbers<[2], [2], [1], [1], [0, 0, 0, 1, 1, 1], [0], [0]>} : vector<2x16x8xf32>, vector<2x16x8xf32>, vector<2x16x16xf32> -> vector<2x16x16xf32>
    "tpu.trace_stop"() : () -> ()
    %cst_22 = arith.constant 0.353553385 : f32
    %51 = vector.broadcast %cst_22 : f32 to vector<2x16x16xf32>
    %52 = arith.mulf %50, %51 : vector<2x16x16xf32>
    %cst_23 = arith.constant dense<0xFF800000> : vector<2x16xf32>
    %53 = vector.multi_reduction <maximumf>, %52, %cst_23 [2] : vector<2x16x16xf32> to vector<2x16xf32>
    %54 = vector.shape_cast %53 : vector<2x16xf32> to vector<2x16x1xf32>
    %55 = vector.broadcast %54 : vector<2x16x1xf32> to vector<2x16x16xf32>
    %56 = arith.subf %52, %55 : vector<2x16x16xf32>
    %57 = math.exp %56 : vector<2x16x16xf32>
    %cst_24 = arith.constant dense<0.000000e+00> : vector<2x16xf32>
    %58 = vector.multi_reduction <add>, %57, %cst_24 [2] : vector<2x16x16xf32> to vector<2x16xf32>
    %59 = vector.shape_cast %58 : vector<2x16xf32> to vector<2x16x1xf32>
    %60 = tpu.reciprocal %59 {approx = true} : vector<2x16x1xf32> -> vector<2x16x1xf32>
    %61 = vector.broadcast %60 : vector<2x16x1xf32> to vector<2x16x16xf32>
    %62 = arith.mulf %57, %61 : vector<2x16x16xf32>
    "tpu.trace_start"() <{level = 10 : i32, message = "bqk,bkd->bqd"}> : () -> ()
    %cst_25 = arith.constant dense<0.000000e+00> : vector<2x16x8xf32>
    %63 = tpu.matmul %62, %49, %cst_25 {dimension_numbers = #tpu.dot_dimension_numbers<[2], [1], [1], [2], [0, 0, 0, 1, 1, 2], [0], [0]>} : vector<2x16x16xf32>, vector<2x16x8xf32>, vector<2x16x8xf32> -> vector<2x16x8xf32>
    "tpu.trace_stop"() : () -> ()
    %64 = tpu.concatenate %46, %63 in 2 : vector<2x16x8xf32>, vector<2x16x8xf32> -> vector<2x16x16xf32>
    %65 = vector.shape_cast %64 : vector<2x16x16xf32> to vector<32x16xf32>
    %c0_26 = arith.constant 0 : index
    %c0_27 = arith.constant 0 : index
    %c0_28 = arith.constant 0 : index
    %66 = vector.load %arg4[%c0_26, %c0_27, %c0_28] : memref<2x16x32xf32, #tpu.memory_space<vmem>>, vector<1x16x32xf32>
    %67 = vector.shape_cast %66 : vector<1x16x32xf32> to vector<16x32xf32>
    %cst_29 = arith.constant dense<0.000000e+00> : vector<32x32xf32>
    %68 = tpu.matmul %65, %67, %cst_29 {dimension_numbers = #tpu.dot_dimension_numbers<[1], [0], [0], [1], [0, 0, 1, 1], [], []>} : vector<32x16xf32>, vector<16x32xf32>, vector<32x32xf32> -> vector<32x32xf32>
    %c0_30 = arith.constant 0 : index
    %c0_31 = arith.constant 0 : index
    %c0_32 = arith.constant 0 : index
    %69 = vector.load %arg5[%c0_30, %c0_31, %c0_32] : memref<2x1x32xf32, #tpu.memory_space<vmem>>, vector<1x1x32xf32>
    %70 = vector.shape_cast %69 : vector<1x1x32xf32> to vector<1x32xf32>
    %71 = vector.broadcast %70 : vector<1x32xf32> to vector<32x32xf32>
    %72 = arith.addf %68, %71 : vector<32x32xf32>
    %73 = vector.shape_cast %72 : vector<32x32xf32> to vector<2x16x32xf32>
    %74 = arith.addf %0, %73 : vector<2x16x32xf32>
    %75 = vector.shape_cast %74 : vector<2x16x32xf32> to vector<32x32xf32>
    %c0_33 = arith.constant 0 : index
    %c0_34 = arith.constant 0 : index
    %c0_35 = arith.constant 0 : index
    %76 = vector.load %arg6[%c0_33, %c0_34, %c0_35] : memref<2x1x32xf32, #tpu.memory_space<vmem>>, vector<1x1x32xf32>
    %77 = vector.shape_cast %76 : vector<1x1x32xf32> to vector<1x32xf32>
    %c0_36 = arith.constant 0 : index
    %c0_37 = arith.constant 0 : index
    %c0_38 = arith.constant 0 : index
    %78 = vector.load %arg7[%c0_36, %c0_37, %c0_38] : memref<2x1x32xf32, #tpu.memory_space<vmem>>, vector<1x1x32xf32>
    %79 = vector.shape_cast %78 : vector<1x1x32xf32> to vector<1x32xf32>
    %cst_39 = arith.constant dense<0.000000e+00> : vector<32xf32>
    %80 = vector.multi_reduction <add>, %75, %cst_39 [1] : vector<32x32xf32> to vector<32xf32>
    %81 = vector.shape_cast %80 : vector<32xf32> to vector<32x1xf32>
    %cst_40 = arith.constant 3.200000e+01 : f32
    %82 = vector.broadcast %cst_40 : f32 to vector<32x1xf32>
    %83 = arith.divf %81, %82 : vector<32x1xf32>
    %84 = vector.broadcast %83 : vector<32x1xf32> to vector<32x32xf32>
    %85 = arith.subf %75, %84 : vector<32x32xf32>
    %86 = arith.mulf %85, %85 : vector<32x32xf32>
    %cst_41 = arith.constant dense<0.000000e+00> : vector<32xf32>
    %87 = vector.multi_reduction <add>, %86, %cst_41 [1] : vector<32x32xf32> to vector<32xf32>
    %88 = vector.shape_cast %87 : vector<32xf32> to vector<32x1xf32>
    %cst_42 = arith.constant 3.200000e+01 : f32
    %89 = vector.broadcast %cst_42 : f32 to vector<32x1xf32>
    %90 = arith.divf %88, %89 : vector<32x1xf32>
    %cst_43 = arith.constant 9.99999974E-6 : f32
    %91 = vector.broadcast %cst_43 : f32 to vector<32x1xf32>
    %92 = arith.addf %90, %91 : vector<32x1xf32>
    %93 = math.rsqrt %92 : vector<32x1xf32>
    %94 = vector.broadcast %93 : vector<32x1xf32> to vector<32x32xf32>
    %95 = arith.mulf %85, %94 : vector<32x32xf32>
    %96 = vector.broadcast %77 : vector<1x32xf32> to vector<32x32xf32>
    %97 = arith.mulf %95, %96 : vector<32x32xf32>
    %98 = vector.broadcast %79 : vector<1x32xf32> to vector<32x32xf32>
    %99 = arith.addf %97, %98 : vector<32x32xf32>
    %c0_44 = arith.constant 0 : index
    %c0_45 = arith.constant 0 : index
    %c0_46 = arith.constant 0 : index
    %100 = vector.load %arg8[%c0_44, %c0_45, %c0_46] : memref<2x32x64xf32, #tpu.memory_space<vmem>>, vector<1x32x64xf32>
    %101 = vector.shape_cast %100 : vector<1x32x64xf32> to vector<32x64xf32>
    %cst_47 = arith.constant dense<0.000000e+00> : vector<32x64xf32>
    %102 = tpu.matmul %99, %101, %cst_47 {dimension_numbers = #tpu.dot_dimension_numbers<[1], [0], [0], [1], [0, 0, 1, 1], [], []>} : vector<32x32xf32>, vector<32x64xf32>, vector<32x64xf32> -> vector<32x64xf32>
    %c0_48 = arith.constant 0 : index
    %c0_49 = arith.constant 0 : index
    %c0_50 = arith.constant 0 : index
    %103 = vector.load %arg9[%c0_48, %c0_49, %c0_50] : memref<2x1x64xf32, #tpu.memory_space<vmem>>, vector<1x1x64xf32>
    %104 = vector.shape_cast %103 : vector<1x1x64xf32> to vector<1x64xf32>
    %105 = vector.broadcast %104 : vector<1x64xf32> to vector<32x64xf32>
    %106 = arith.addf %102, %105 : vector<32x64xf32>
    %cst_51 = arith.constant 5.000000e-01 : f32
    %107 = vector.broadcast %cst_51 : f32 to vector<32x64xf32>
    %108 = arith.mulf %107, %106 : vector<32x64xf32>
    %cst_52 = arith.constant 0.707106769 : f32
    %109 = vector.broadcast %cst_52 : f32 to vector<32x64xf32>
    %110 = arith.mulf %106, %109 : vector<32x64xf32>
    %cst_53 = arith.constant 0.000000e+00 : f32
    %111 = vector.broadcast %cst_53 : f32 to vector<32x64xf32>
    %112 = arith.cmpf oge, %110, %111 : vector<32x64xf32>
    %cst_54 = arith.constant 1.000000e+00 : f32
    %cst_55 = arith.constant -1.000000e+00 : f32
    %113 = vector.broadcast %cst_54 : f32 to vector<32x64xf32>
    %114 = vector.broadcast %cst_55 : f32 to vector<32x64xf32>
    %115 = arith.select %112, %113, %114 : vector<32x64xi1>, vector<32x64xf32>
    %116 = math.absf %110 : vector<32x64xf32>
    %cst_56 = arith.constant 0.327591091 : f32
    %117 = vector.broadcast %cst_56 : f32 to vector<32x64xf32>
    %118 = arith.mulf %117, %116 : vector<32x64xf32>
    %cst_57 = arith.constant 1.000000e+00 : f32
    %119 = vector.broadcast %cst_57 : f32 to vector<32x64xf32>
    %120 = arith.addf %119, %118 : vector<32x64xf32>
    %cst_58 = arith.constant 1.000000e+00 : f32
    %121 = vector.broadcast %cst_58 : f32 to vector<32x64xf32>
    %122 = arith.divf %121, %120 : vector<32x64xf32>
    %cst_59 = arith.constant 1.06140542 : f32
    %123 = vector.broadcast %cst_59 : f32 to vector<32x64xf32>
    %124 = arith.mulf %123, %122 : vector<32x64xf32>
    %cst_60 = arith.constant -1.45315206 : f32
    %125 = vector.broadcast %cst_60 : f32 to vector<32x64xf32>
    %126 = arith.addf %124, %125 : vector<32x64xf32>
    %127 = arith.mulf %126, %122 : vector<32x64xf32>
    %cst_61 = arith.constant 1.42141378 : f32
    %128 = vector.broadcast %cst_61 : f32 to vector<32x64xf32>
    %129 = arith.addf %127, %128 : vector<32x64xf32>
    %130 = arith.mulf %129, %122 : vector<32x64xf32>
    %cst_62 = arith.constant -0.284496725 : f32
    %131 = vector.broadcast %cst_62 : f32 to vector<32x64xf32>
    %132 = arith.addf %130, %131 : vector<32x64xf32>
    %133 = arith.mulf %132, %122 : vector<32x64xf32>
    %cst_63 = arith.constant 0.254829586 : f32
    %134 = vector.broadcast %cst_63 : f32 to vector<32x64xf32>
    %135 = arith.addf %133, %134 : vector<32x64xf32>
    %136 = arith.mulf %135, %122 : vector<32x64xf32>
    %cst_64 = arith.constant 0.000000e+00 : f32
    %137 = vector.broadcast %cst_64 : f32 to vector<32x64xf32>
    %138 = arith.subf %137, %116 : vector<32x64xf32>
    %139 = arith.mulf %138, %116 : vector<32x64xf32>
    %140 = math.exp %139 : vector<32x64xf32>
    %141 = arith.mulf %136, %140 : vector<32x64xf32>
    %cst_65 = arith.constant 1.000000e+00 : f32
    %142 = vector.broadcast %cst_65 : f32 to vector<32x64xf32>
    %143 = arith.subf %142, %141 : vector<32x64xf32>
    %144 = arith.mulf %115, %143 : vector<32x64xf32>
    %cst_66 = arith.constant 1.000000e+00 : f32
    %145 = vector.broadcast %cst_66 : f32 to vector<32x64xf32>
    %146 = arith.addf %145, %144 : vector<32x64xf32>
    %147 = arith.mulf %108, %146 : vector<32x64xf32>
    %c0_67 = arith.constant 0 : index
    %c0_68 = arith.constant 0 : index
    %c0_69 = arith.constant 0 : index
    %148 = vector.load %arg10[%c0_67, %c0_68, %c0_69] : memref<2x64x32xf32, #tpu.memory_space<vmem>>, vector<1x64x32xf32>
    %149 = vector.shape_cast %148 : vector<1x64x32xf32> to vector<64x32xf32>
    %cst_70 = arith.constant dense<0.000000e+00> : vector<32x32xf32>
    %150 = tpu.matmul %147, %149, %cst_70 {dimension_numbers = #tpu.dot_dimension_numbers<[1], [0], [0], [1], [0, 0, 1, 1], [], []>} : vector<32x64xf32>, vector<64x32xf32>, vector<32x32xf32> -> vector<32x32xf32>
    %c0_71 = arith.constant 0 : index
    %c0_72 = arith.constant 0 : index
    %c0_73 = arith.constant 0 : index
    %151 = vector.load %arg11[%c0_71, %c0_72, %c0_73] : memref<2x1x32xf32, #tpu.memory_space<vmem>>, vector<1x1x32xf32>
    %152 = vector.shape_cast %151 : vector<1x1x32xf32> to vector<1x32xf32>
    %153 = vector.broadcast %152 : vector<1x32xf32> to vector<32x32xf32>
    %154 = arith.addf %150, %153 : vector<32x32xf32>
    %155 = vector.shape_cast %154 : vector<32x32xf32> to vector<2x16x32xf32>
    %156 = arith.addf %74, %155 : vector<2x16x32xf32>
    %157 = vector.shape_cast %156 : vector<2x16x32xf32> to vector<32x32xf32>
    %c1 = arith.constant 1 : index
    %c0_74 = arith.constant 0 : index
    %c0_75 = arith.constant 0 : index
    %158 = vector.load %arg1[%c1, %c0_74, %c0_75] : memref<2x1x32xf32, #tpu.memory_space<vmem>>, vector<1x1x32xf32>
    %159 = vector.shape_cast %158 : vector<1x1x32xf32> to vector<1x32xf32>
    %c1_76 = arith.constant 1 : index
    %c0_77 = arith.constant 0 : index
    %c0_78 = arith.constant 0 : index
    %160 = vector.load %arg2[%c1_76, %c0_77, %c0_78] : memref<2x1x32xf32, #tpu.memory_space<vmem>>, vector<1x1x32xf32>
    %161 = vector.shape_cast %160 : vector<1x1x32xf32> to vector<1x32xf32>
    %cst_79 = arith.constant dense<0.000000e+00> : vector<32xf32>
    %162 = vector.multi_reduction <add>, %157, %cst_79 [1] : vector<32x32xf32> to vector<32xf32>
    %163 = vector.shape_cast %162 : vector<32xf32> to vector<32x1xf32>
    %cst_80 = arith.constant 3.200000e+01 : f32
    %164 = vector.broadcast %cst_80 : f32 to vector<32x1xf32>
    %165 = arith.divf %163, %164 : vector<32x1xf32>
    %166 = vector.broadcast %165 : vector<32x1xf32> to vector<32x32xf32>
    %167 = arith.subf %157, %166 : vector<32x32xf32>
    %168 = arith.mulf %167, %167 : vector<32x32xf32>
    %cst_81 = arith.constant dense<0.000000e+00> : vector<32xf32>
    %169 = vector.multi_reduction <add>, %168, %cst_81 [1] : vector<32x32xf32> to vector<32xf32>
    %170 = vector.shape_cast %169 : vector<32xf32> to vector<32x1xf32>
    %cst_82 = arith.constant 3.200000e+01 : f32
    %171 = vector.broadcast %cst_82 : f32 to vector<32x1xf32>
    %172 = arith.divf %170, %171 : vector<32x1xf32>
    %cst_83 = arith.constant 9.99999974E-6 : f32
    %173 = vector.broadcast %cst_83 : f32 to vector<32x1xf32>
    %174 = arith.addf %172, %173 : vector<32x1xf32>
    %175 = math.rsqrt %174 : vector<32x1xf32>
    %176 = vector.broadcast %175 : vector<32x1xf32> to vector<32x32xf32>
    %177 = arith.mulf %167, %176 : vector<32x32xf32>
    %178 = vector.broadcast %159 : vector<1x32xf32> to vector<32x32xf32>
    %179 = arith.mulf %177, %178 : vector<32x32xf32>
    %180 = vector.broadcast %161 : vector<1x32xf32> to vector<32x32xf32>
    %181 = arith.addf %179, %180 : vector<32x32xf32>
    %c1_84 = arith.constant 1 : index
    %c0_85 = arith.constant 0 : index
    %c0_86 = arith.constant 0 : index
    %182 = vector.load %arg3[%c1_84, %c0_85, %c0_86] : memref<2x32x48xf32, #tpu.memory_space<vmem>>, vector<1x32x48xf32>
    %183 = vector.shape_cast %182 : vector<1x32x48xf32> to vector<32x48xf32>
    %cst_87 = arith.constant dense<0.000000e+00> : vector<32x48xf32>
    %184 = tpu.matmul %181, %183, %cst_87 {dimension_numbers = #tpu.dot_dimension_numbers<[1], [0], [0], [1], [0, 0, 1, 1], [], []>} : vector<32x32xf32>, vector<32x48xf32>, vector<32x48xf32> -> vector<32x48xf32>
    %185 = vector.shape_cast %184 : vector<32x48xf32> to vector<2x16x48xf32>
    %186 = vector.extract_strided_slice %185 {offsets = [0, 0, 0], sizes = [2, 16, 8], strides = [1, 1, 1]} : vector<2x16x48xf32> to vector<2x16x8xf32>
    %187 = vector.extract_strided_slice %185 {offsets = [0, 0, 16], sizes = [2, 16, 8], strides = [1, 1, 1]} : vector<2x16x48xf32> to vector<2x16x8xf32>
    %188 = vector.extract_strided_slice %185 {offsets = [0, 0, 32], sizes = [2, 16, 8], strides = [1, 1, 1]} : vector<2x16x48xf32> to vector<2x16x8xf32>
    "tpu.trace_start"() <{level = 10 : i32, message = "bqd,bkd->bqk"}> : () -> ()
    %cst_88 = arith.constant dense<0.000000e+00> : vector<2x16x16xf32>
    %189 = tpu.matmul %186, %187, %cst_88 {dimension_numbers = #tpu.dot_dimension_numbers<[2], [2], [1], [1], [0, 0, 0, 1, 1, 1], [0], [0]>} : vector<2x16x8xf32>, vector<2x16x8xf32>, vector<2x16x16xf32> -> vector<2x16x16xf32>
    "tpu.trace_stop"() : () -> ()
    %cst_89 = arith.constant 0.353553385 : f32
    %190 = vector.broadcast %cst_89 : f32 to vector<2x16x16xf32>
    %191 = arith.mulf %189, %190 : vector<2x16x16xf32>
    %cst_90 = arith.constant dense<0xFF800000> : vector<2x16xf32>
    %192 = vector.multi_reduction <maximumf>, %191, %cst_90 [2] : vector<2x16x16xf32> to vector<2x16xf32>
    %193 = vector.shape_cast %192 : vector<2x16xf32> to vector<2x16x1xf32>
    %194 = vector.broadcast %193 : vector<2x16x1xf32> to vector<2x16x16xf32>
    %195 = arith.subf %191, %194 : vector<2x16x16xf32>
    %196 = math.exp %195 : vector<2x16x16xf32>
    %cst_91 = arith.constant dense<0.000000e+00> : vector<2x16xf32>
    %197 = vector.multi_reduction <add>, %196, %cst_91 [2] : vector<2x16x16xf32> to vector<2x16xf32>
    %198 = vector.shape_cast %197 : vector<2x16xf32> to vector<2x16x1xf32>
    %199 = tpu.reciprocal %198 {approx = true} : vector<2x16x1xf32> -> vector<2x16x1xf32>
    %200 = vector.broadcast %199 : vector<2x16x1xf32> to vector<2x16x16xf32>
    %201 = arith.mulf %196, %200 : vector<2x16x16xf32>
    "tpu.trace_start"() <{level = 10 : i32, message = "bqk,bkd->bqd"}> : () -> ()
    %cst_92 = arith.constant dense<0.000000e+00> : vector<2x16x8xf32>
    %202 = tpu.matmul %201, %188, %cst_92 {dimension_numbers = #tpu.dot_dimension_numbers<[2], [1], [1], [2], [0, 0, 0, 1, 1, 2], [0], [0]>} : vector<2x16x16xf32>, vector<2x16x8xf32>, vector<2x16x8xf32> -> vector<2x16x8xf32>
    "tpu.trace_stop"() : () -> ()
    %203 = vector.extract_strided_slice %185 {offsets = [0, 0, 8], sizes = [2, 16, 8], strides = [1, 1, 1]} : vector<2x16x48xf32> to vector<2x16x8xf32>
    %204 = vector.extract_strided_slice %185 {offsets = [0, 0, 24], sizes = [2, 16, 8], strides = [1, 1, 1]} : vector<2x16x48xf32> to vector<2x16x8xf32>
    %205 = vector.extract_strided_slice %185 {offsets = [0, 0, 40], sizes = [2, 16, 8], strides = [1, 1, 1]} : vector<2x16x48xf32> to vector<2x16x8xf32>
    "tpu.trace_start"() <{level = 10 : i32, message = "bqd,bkd->bqk"}> : () -> ()
    %cst_93 = arith.constant dense<0.000000e+00> : vector<2x16x16xf32>
    %206 = tpu.matmul %203, %204, %cst_93 {dimension_numbers = #tpu.dot_dimension_numbers<[2], [2], [1], [1], [0, 0, 0, 1, 1, 1], [0], [0]>} : vector<2x16x8xf32>, vector<2x16x8xf32>, vector<2x16x16xf32> -> vector<2x16x16xf32>
    "tpu.trace_stop"() : () -> ()
    %cst_94 = arith.constant 0.353553385 : f32
    %207 = vector.broadcast %cst_94 : f32 to vector<2x16x16xf32>
    %208 = arith.mulf %206, %207 : vector<2x16x16xf32>
    %cst_95 = arith.constant dense<0xFF800000> : vector<2x16xf32>
    %209 = vector.multi_reduction <maximumf>, %208, %cst_95 [2] : vector<2x16x16xf32> to vector<2x16xf32>
    %210 = vector.shape_cast %209 : vector<2x16xf32> to vector<2x16x1xf32>
    %211 = vector.broadcast %210 : vector<2x16x1xf32> to vector<2x16x16xf32>
    %212 = arith.subf %208, %211 : vector<2x16x16xf32>
    %213 = math.exp %212 : vector<2x16x16xf32>
    %cst_96 = arith.constant dense<0.000000e+00> : vector<2x16xf32>
    %214 = vector.multi_reduction <add>, %213, %cst_96 [2] : vector<2x16x16xf32> to vector<2x16xf32>
    %215 = vector.shape_cast %214 : vector<2x16xf32> to vector<2x16x1xf32>
    %216 = tpu.reciprocal %215 {approx = true} : vector<2x16x1xf32> -> vector<2x16x1xf32>
    %217 = vector.broadcast %216 : vector<2x16x1xf32> to vector<2x16x16xf32>
    %218 = arith.mulf %213, %217 : vector<2x16x16xf32>
    "tpu.trace_start"() <{level = 10 : i32, message = "bqk,bkd->bqd"}> : () -> ()
    %cst_97 = arith.constant dense<0.000000e+00> : vector<2x16x8xf32>
    %219 = tpu.matmul %218, %205, %cst_97 {dimension_numbers = #tpu.dot_dimension_numbers<[2], [1], [1], [2], [0, 0, 0, 1, 1, 2], [0], [0]>} : vector<2x16x16xf32>, vector<2x16x8xf32>, vector<2x16x8xf32> -> vector<2x16x8xf32>
    "tpu.trace_stop"() : () -> ()
    %220 = tpu.concatenate %202, %219 in 2 : vector<2x16x8xf32>, vector<2x16x8xf32> -> vector<2x16x16xf32>
    %221 = vector.shape_cast %220 : vector<2x16x16xf32> to vector<32x16xf32>
    %c1_98 = arith.constant 1 : index
    %c0_99 = arith.constant 0 : index
    %c0_100 = arith.constant 0 : index
    %222 = vector.load %arg4[%c1_98, %c0_99, %c0_100] : memref<2x16x32xf32, #tpu.memory_space<vmem>>, vector<1x16x32xf32>
    %223 = vector.shape_cast %222 : vector<1x16x32xf32> to vector<16x32xf32>
    %cst_101 = arith.constant dense<0.000000e+00> : vector<32x32xf32>
    %224 = tpu.matmul %221, %223, %cst_101 {dimension_numbers = #tpu.dot_dimension_numbers<[1], [0], [0], [1], [0, 0, 1, 1], [], []>} : vector<32x16xf32>, vector<16x32xf32>, vector<32x32xf32> -> vector<32x32xf32>
    %c1_102 = arith.constant 1 : index
    %c0_103 = arith.constant 0 : index
    %c0_104 = arith.constant 0 : index
    %225 = vector.load %arg5[%c1_102, %c0_103, %c0_104] : memref<2x1x32xf32, #tpu.memory_space<vmem>>, vector<1x1x32xf32>
    %226 = vector.shape_cast %225 : vector<1x1x32xf32> to vector<1x32xf32>
    %227 = vector.broadcast %226 : vector<1x32xf32> to vector<32x32xf32>
    %228 = arith.addf %224, %227 : vector<32x32xf32>
    %229 = vector.shape_cast %228 : vector<32x32xf32> to vector<2x16x32xf32>
    %230 = arith.addf %156, %229 : vector<2x16x32xf32>
    %231 = vector.shape_cast %230 : vector<2x16x32xf32> to vector<32x32xf32>
    %c1_105 = arith.constant 1 : index
    %c0_106 = arith.constant 0 : index
    %c0_107 = arith.constant 0 : index
    %232 = vector.load %arg6[%c1_105, %c0_106, %c0_107] : memref<2x1x32xf32, #tpu.memory_space<vmem>>, vector<1x1x32xf32>
    %233 = vector.shape_cast %232 : vector<1x1x32xf32> to vector<1x32xf32>
    %c1_108 = arith.constant 1 : index
    %c0_109 = arith.constant 0 : index
    %c0_110 = arith.constant 0 : index
    %234 = vector.load %arg7[%c1_108, %c0_109, %c0_110] : memref<2x1x32xf32, #tpu.memory_space<vmem>>, vector<1x1x32xf32>
    %235 = vector.shape_cast %234 : vector<1x1x32xf32> to vector<1x32xf32>
    %cst_111 = arith.constant dense<0.000000e+00> : vector<32xf32>
    %236 = vector.multi_reduction <add>, %231, %cst_111 [1] : vector<32x32xf32> to vector<32xf32>
    %237 = vector.shape_cast %236 : vector<32xf32> to vector<32x1xf32>
    %cst_112 = arith.constant 3.200000e+01 : f32
    %238 = vector.broadcast %cst_112 : f32 to vector<32x1xf32>
    %239 = arith.divf %237, %238 : vector<32x1xf32>
    %240 = vector.broadcast %239 : vector<32x1xf32> to vector<32x32xf32>
    %241 = arith.subf %231, %240 : vector<32x32xf32>
    %242 = arith.mulf %241, %241 : vector<32x32xf32>
    %cst_113 = arith.constant dense<0.000000e+00> : vector<32xf32>
    %243 = vector.multi_reduction <add>, %242, %cst_113 [1] : vector<32x32xf32> to vector<32xf32>
    %244 = vector.shape_cast %243 : vector<32xf32> to vector<32x1xf32>
    %cst_114 = arith.constant 3.200000e+01 : f32
    %245 = vector.broadcast %cst_114 : f32 to vector<32x1xf32>
    %246 = arith.divf %244, %245 : vector<32x1xf32>
    %cst_115 = arith.constant 9.99999974E-6 : f32
    %247 = vector.broadcast %cst_115 : f32 to vector<32x1xf32>
    %248 = arith.addf %246, %247 : vector<32x1xf32>
    %249 = math.rsqrt %248 : vector<32x1xf32>
    %250 = vector.broadcast %249 : vector<32x1xf32> to vector<32x32xf32>
    %251 = arith.mulf %241, %250 : vector<32x32xf32>
    %252 = vector.broadcast %233 : vector<1x32xf32> to vector<32x32xf32>
    %253 = arith.mulf %251, %252 : vector<32x32xf32>
    %254 = vector.broadcast %235 : vector<1x32xf32> to vector<32x32xf32>
    %255 = arith.addf %253, %254 : vector<32x32xf32>
    %c1_116 = arith.constant 1 : index
    %c0_117 = arith.constant 0 : index
    %c0_118 = arith.constant 0 : index
    %256 = vector.load %arg8[%c1_116, %c0_117, %c0_118] : memref<2x32x64xf32, #tpu.memory_space<vmem>>, vector<1x32x64xf32>
    %257 = vector.shape_cast %256 : vector<1x32x64xf32> to vector<32x64xf32>
    %cst_119 = arith.constant dense<0.000000e+00> : vector<32x64xf32>
    %258 = tpu.matmul %255, %257, %cst_119 {dimension_numbers = #tpu.dot_dimension_numbers<[1], [0], [0], [1], [0, 0, 1, 1], [], []>} : vector<32x32xf32>, vector<32x64xf32>, vector<32x64xf32> -> vector<32x64xf32>
    %c1_120 = arith.constant 1 : index
    %c0_121 = arith.constant 0 : index
    %c0_122 = arith.constant 0 : index
    %259 = vector.load %arg9[%c1_120, %c0_121, %c0_122] : memref<2x1x64xf32, #tpu.memory_space<vmem>>, vector<1x1x64xf32>
    %260 = vector.shape_cast %259 : vector<1x1x64xf32> to vector<1x64xf32>
    %261 = vector.broadcast %260 : vector<1x64xf32> to vector<32x64xf32>
    %262 = arith.addf %258, %261 : vector<32x64xf32>
    %cst_123 = arith.constant 5.000000e-01 : f32
    %263 = vector.broadcast %cst_123 : f32 to vector<32x64xf32>
    %264 = arith.mulf %263, %262 : vector<32x64xf32>
    %cst_124 = arith.constant 0.707106769 : f32
    %265 = vector.broadcast %cst_124 : f32 to vector<32x64xf32>
    %266 = arith.mulf %262, %265 : vector<32x64xf32>
    %cst_125 = arith.constant 0.000000e+00 : f32
    %267 = vector.broadcast %cst_125 : f32 to vector<32x64xf32>
    %268 = arith.cmpf oge, %266, %267 : vector<32x64xf32>
    %cst_126 = arith.constant 1.000000e+00 : f32
    %cst_127 = arith.constant -1.000000e+00 : f32
    %269 = vector.broadcast %cst_126 : f32 to vector<32x64xf32>
    %270 = vector.broadcast %cst_127 : f32 to vector<32x64xf32>
    %271 = arith.select %268, %269, %270 : vector<32x64xi1>, vector<32x64xf32>
    %272 = math.absf %266 : vector<32x64xf32>
    %cst_128 = arith.constant 0.327591091 : f32
    %273 = vector.broadcast %cst_128 : f32 to vector<32x64xf32>
    %274 = arith.mulf %273, %272 : vector<32x64xf32>
    %cst_129 = arith.constant 1.000000e+00 : f32
    %275 = vector.broadcast %cst_129 : f32 to vector<32x64xf32>
    %276 = arith.addf %275, %274 : vector<32x64xf32>
    %cst_130 = arith.constant 1.000000e+00 : f32
    %277 = vector.broadcast %cst_130 : f32 to vector<32x64xf32>
    %278 = arith.divf %277, %276 : vector<32x64xf32>
    %cst_131 = arith.constant 1.06140542 : f32
    %279 = vector.broadcast %cst_131 : f32 to vector<32x64xf32>
    %280 = arith.mulf %279, %278 : vector<32x64xf32>
    %cst_132 = arith.constant -1.45315206 : f32
    %281 = vector.broadcast %cst_132 : f32 to vector<32x64xf32>
    %282 = arith.addf %280, %281 : vector<32x64xf32>
    %283 = arith.mulf %282, %278 : vector<32x64xf32>
    %cst_133 = arith.constant 1.42141378 : f32
    %284 = vector.broadcast %cst_133 : f32 to vector<32x64xf32>
    %285 = arith.addf %283, %284 : vector<32x64xf32>
    %286 = arith.mulf %285, %278 : vector<32x64xf32>
    %cst_134 = arith.constant -0.284496725 : f32
    %287 = vector.broadcast %cst_134 : f32 to vector<32x64xf32>
    %288 = arith.addf %286, %287 : vector<32x64xf32>
    %289 = arith.mulf %288, %278 : vector<32x64xf32>
    %cst_135 = arith.constant 0.254829586 : f32
    %290 = vector.broadcast %cst_135 : f32 to vector<32x64xf32>
    %291 = arith.addf %289, %290 : vector<32x64xf32>
    %292 = arith.mulf %291, %278 : vector<32x64xf32>
    %cst_136 = arith.constant 0.000000e+00 : f32
    %293 = vector.broadcast %cst_136 : f32 to vector<32x64xf32>
    %294 = arith.subf %293, %272 : vector<32x64xf32>
    %295 = arith.mulf %294, %272 : vector<32x64xf32>
    %296 = math.exp %295 : vector<32x64xf32>
    %297 = arith.mulf %292, %296 : vector<32x64xf32>
    %cst_137 = arith.constant 1.000000e+00 : f32
    %298 = vector.broadcast %cst_137 : f32 to vector<32x64xf32>
    %299 = arith.subf %298, %297 : vector<32x64xf32>
    %300 = arith.mulf %271, %299 : vector<32x64xf32>
    %cst_138 = arith.constant 1.000000e+00 : f32
    %301 = vector.broadcast %cst_138 : f32 to vector<32x64xf32>
    %302 = arith.addf %301, %300 : vector<32x64xf32>
    %303 = arith.mulf %264, %302 : vector<32x64xf32>
    %c1_139 = arith.constant 1 : index
    %c0_140 = arith.constant 0 : index
    %c0_141 = arith.constant 0 : index
    %304 = vector.load %arg10[%c1_139, %c0_140, %c0_141] : memref<2x64x32xf32, #tpu.memory_space<vmem>>, vector<1x64x32xf32>
    %305 = vector.shape_cast %304 : vector<1x64x32xf32> to vector<64x32xf32>
    %cst_142 = arith.constant dense<0.000000e+00> : vector<32x32xf32>
    %306 = tpu.matmul %303, %305, %cst_142 {dimension_numbers = #tpu.dot_dimension_numbers<[1], [0], [0], [1], [0, 0, 1, 1], [], []>} : vector<32x64xf32>, vector<64x32xf32>, vector<32x32xf32> -> vector<32x32xf32>
    %c1_143 = arith.constant 1 : index
    %c0_144 = arith.constant 0 : index
    %c0_145 = arith.constant 0 : index
    %307 = vector.load %arg11[%c1_143, %c0_144, %c0_145] : memref<2x1x32xf32, #tpu.memory_space<vmem>>, vector<1x1x32xf32>
    %308 = vector.shape_cast %307 : vector<1x1x32xf32> to vector<1x32xf32>
    %309 = vector.broadcast %308 : vector<1x32xf32> to vector<32x32xf32>
    %310 = arith.addf %306, %309 : vector<32x32xf32>
    %311 = vector.shape_cast %310 : vector<32x32xf32> to vector<2x16x32xf32>
    %312 = arith.addf %230, %311 : vector<2x16x32xf32>
    %cst_146 = arith.constant dense<0xFF800000> : vector<2x32xf32>
    %313 = vector.multi_reduction <maximumf>, %312, %cst_146 [1] : vector<2x16x32xf32> to vector<2x32xf32>
    %c0_147 = arith.constant 0 : index
    %c0_148 = arith.constant 0 : index
    %314 = vector.load %arg12[%c0_147, %c0_148] : memref<1x32xf32, #tpu.memory_space<vmem>>, vector<1x32xf32>
    %c0_149 = arith.constant 0 : index
    %c0_150 = arith.constant 0 : index
    %315 = vector.load %arg13[%c0_149, %c0_150] : memref<1x32xf32, #tpu.memory_space<vmem>>, vector<1x32xf32>
    %cst_151 = arith.constant dense<0.000000e+00> : vector<2xf32>
    %316 = vector.multi_reduction <add>, %313, %cst_151 [1] : vector<2x32xf32> to vector<2xf32>
    %317 = vector.shape_cast %316 : vector<2xf32> to vector<2x1xf32>
    %cst_152 = arith.constant 3.200000e+01 : f32
    %318 = vector.broadcast %cst_152 : f32 to vector<2x1xf32>
    %319 = arith.divf %317, %318 : vector<2x1xf32>
    %320 = vector.broadcast %319 : vector<2x1xf32> to vector<2x32xf32>
    %321 = arith.subf %313, %320 : vector<2x32xf32>
    %322 = arith.mulf %321, %321 : vector<2x32xf32>
    %cst_153 = arith.constant dense<0.000000e+00> : vector<2xf32>
    %323 = vector.multi_reduction <add>, %322, %cst_153 [1] : vector<2x32xf32> to vector<2xf32>
    %324 = vector.shape_cast %323 : vector<2xf32> to vector<2x1xf32>
    %cst_154 = arith.constant 3.200000e+01 : f32
    %325 = vector.broadcast %cst_154 : f32 to vector<2x1xf32>
    %326 = arith.divf %324, %325 : vector<2x1xf32>
    %cst_155 = arith.constant 9.99999974E-6 : f32
    %327 = vector.broadcast %cst_155 : f32 to vector<2x1xf32>
    %328 = arith.addf %326, %327 : vector<2x1xf32>
    %329 = math.rsqrt %328 : vector<2x1xf32>
    %330 = vector.broadcast %329 : vector<2x1xf32> to vector<2x32xf32>
    %331 = arith.mulf %321, %330 : vector<2x32xf32>
    %332 = vector.broadcast %314 : vector<1x32xf32> to vector<2x32xf32>
    %333 = arith.mulf %331, %332 : vector<2x32xf32>
    %334 = vector.broadcast %315 : vector<1x32xf32> to vector<2x32xf32>
    %335 = arith.addf %333, %334 : vector<2x32xf32>
    %c0_156 = arith.constant 0 : index
    %c0_157 = arith.constant 0 : index
    %336 = vector.load %arg14[%c0_156, %c0_157] : memref<32x64xf32, #tpu.memory_space<vmem>>, vector<32x64xf32>
    %cst_158 = arith.constant dense<0.000000e+00> : vector<2x64xf32>
    %337 = tpu.matmul %335, %336, %cst_158 {dimension_numbers = #tpu.dot_dimension_numbers<[1], [0], [0], [1], [0, 0, 1, 1], [], []>} : vector<2x32xf32>, vector<32x64xf32>, vector<2x64xf32> -> vector<2x64xf32>
    %c0_159 = arith.constant 0 : index
    %c0_160 = arith.constant 0 : index
    %338 = vector.load %arg15[%c0_159, %c0_160] : memref<1x64xf32, #tpu.memory_space<vmem>>, vector<1x64xf32>
    %339 = vector.broadcast %338 : vector<1x64xf32> to vector<2x64xf32>
    %340 = arith.addf %337, %339 : vector<2x64xf32>
    %cst_161 = arith.constant 0.000000e+00 : f32
    %341 = vector.broadcast %cst_161 : f32 to vector<2x64xf32>
    %342 = arith.maximumf %340, %341 : vector<2x64xf32>
    %c0_162 = arith.constant 0 : index
    %c0_163 = arith.constant 0 : index
    %343 = vector.load %arg16[%c0_162, %c0_163] : memref<64x51xf32, #tpu.memory_space<vmem>>, vector<64x51xf32>
    %cst_164 = arith.constant dense<0.000000e+00> : vector<2x51xf32>
    %344 = tpu.matmul %342, %343, %cst_164 {dimension_numbers = #tpu.dot_dimension_numbers<[1], [0], [0], [1], [0, 0, 1, 1], [], []>} : vector<2x64xf32>, vector<64x51xf32>, vector<2x51xf32> -> vector<2x51xf32>
    %c0_165 = arith.constant 0 : index
    %c0_166 = arith.constant 0 : index
    %345 = vector.load %arg17[%c0_165, %c0_166] : memref<1x51xf32, #tpu.memory_space<vmem>>, vector<1x51xf32>
    %346 = vector.broadcast %345 : vector<1x51xf32> to vector<2x51xf32>
    %347 = arith.addf %344, %346 : vector<2x51xf32>
    %c0_167 = arith.constant 0 : index
    %c0_168 = arith.constant 0 : index
    %348 = vector.load %arg18[%c0_167, %c0_168] : memref<2x51xf32, #tpu.memory_space<vmem>>, vector<2x51xf32>
    tpu.vector_store %arg18[%c0_167, %c0_168], %347 {strides = array<i32>} : memref<2x51xf32, #tpu.memory_space<vmem>>, vector<2x51xf32>,
    return
  }
}

</mosaic_0001>

<bundles_post_ra>
// kernel: custom-call.29
= control target key start
LH: loop header
LB: loop body
LE: loop exit
PB: predicated region body
PF: predicated region fallthrough
CT: control target
= control target key end

     0   :  { %s6_s0 = inlined_call_operand.vmem [shape: f32[2,32], index: 0, kind: output, shape index: {}]  }

// kernel: p4transformer_forward.2
= control target key start
LH: loop header
LB: loop body
LE: loop exit
PB: predicated region body
PF: predicated region fallthrough
CT: control target
= control target key end

     0   :  { %vm406_vm0 = vcmask 1046528   ;;  %vm117_vm1 = vcmask 56320   ;;  %vm1326_vm2 = vcmask 1043456   ;;  %vm1313_vm3 = vcmask 31744   ;;  %s2772_s2 = inlined_call_operand.vmem [shape: f32[7,32], index: 2, kind: input, shape index: {}]   ;;  %s2773_s0 = inlined_call_operand.vmem [shape: f32[32,24,7], index: 0, kind: input, shape index: {}]   ;;  %s2774_s3 = inlined_call_operand.vmem [shape: f32[4,32], index: 3, kind: input, shape index: {}]   ;;  %s2775_s1 = inlined_call_operand.vmem [shape: f32[32,4], index: 1, kind: input, shape index: {}]   ;;  %s2776_s4 = inlined_call_operand.vmem [shape: f32[1,32], index: 4, kind: input, shape index: {}]   ;;  %s2777_s5 = inlined_call_operand.vmem [shape: f32[32,32], index: 5, kind: output, shape index: {}]  }
   0x1   :  { %v116_v0 = vld [vmem:[%s2772_s2] sm:$0x7f]  ;;  %v70_v2 = vld [vmem:[%s2773_s0 + $0x190] sm:$0xff]  ;;  %v21_v3 = vld [vmem:[%s2773_s0 + $0x8] sm:$0xff]  ;;  %vm955_vm4 = vcmask 261120   ;;  %vm1583_vm5 = vcmask 1041409  }
   0x2   :  { %v20_v1 = vld [vmem:[%s2773_s0] sm:$0xff]  ;;  %1862 = vmatprep.subr.msk.mxu0 %vm406_vm0, %v116_v0  ;;  %2016 = vmatprep.subr.msk.mxu1 %vm406_vm0, %v116_v0  ;;  %v71_v4 = vld [vmem:[%s2773_s0 + $0x198] sm:$0xff]  ;;  %v22_v5 = vld [vmem:[%s2773_s0 + $0x10] sm:$0xff]  ;;  %vm1586_vm6 = vcmask 1042434   ;;  %vm1589_vm7 = vcmask 1043459   ;;  %vm1592_vm8 = vcmask 1044484  }
   0x3   :  { %1863 = vmatpush3.msk.msra.mxu0 %vm406_vm0, %v116_v0  ;;  %2017 = vmatpush3.msk.msra.mxu1 %vm406_vm0, %v116_v0  ;;  %v72_v6 = vld [vmem:[%s2773_s0 + $0x1a0] sm:$0xff]  ;;  %v23_v7 = vld [vmem:[%s2773_s0 + $0x18] sm:$0xff]  ;;  %v73_v8 = vld [vmem:[%s2773_s0 + $0x1a8] sm:$0xff]  ;;  %vm1595_vm9 = vcmask 1045509   ;;  %vm1598_vm10 = vcmask 1046534   ;;  %vm1601_vm11 = vcmask 1047559  }
   0x4   :  { %1864 = vmatprep.mubr.msk.f32.mxu0 %vm117_vm1, %v20_v1  ;;  %1939 = vmatprep.mubr.msk.f32.mxu1 %vm117_vm1, %v70_v2  ;;  %v1312_v9 = vld [vmem:[%s2774_s3] sm:$0xf]  ;;  %v74_v11 = vld [vmem:[%s2773_s0 + $0x1b0] sm:$0xff]  ;;  %v25_v12 = vld [vmem:[%s2773_s0 + $0x28] sm:$0xff] }
   0x5   :  { %1865 = vmatmul.mubr.msk.f32.vlgmr.msra.gmra.mrb[0].mxu0 %vm117_vm1, %v21_v3  ;;  %1940 = vmatmul.mubr.msk.f32.vlgmr.msra.gmra.mrb[0].mxu1 %vm117_vm1, %v71_v4  ;;  %v24_v10 = vld [vmem:[%s2773_s0 + $0x20] sm:$0xff]  ;;  %v75_v13 = vld [vmem:[%s2773_s0 + $0x1b8] sm:$0xff]  ;;  %v26_v14 = vld [vmem:[%s2773_s0 + $0x30] sm:$0xff] }
   0x6   :  { %1867 = vmatprep.mubr.msk.f32.mxu0 %vm117_vm1, %v22_v5  ;;  %1942 = vmatprep.mubr.msk.f32.mxu1 %vm117_vm1, %v72_v6  ;;  %v76_v15 = vld [vmem:[%s2773_s0 + $0x1c0] sm:$0xff]  ;;  %v27_v16 = vld [vmem:[%s2773_s0 + $0x38] sm:$0xff]  ;;  %v77_v17 = vld [vmem:[%s2773_s0 + $0x1c8] sm:$0xff] }
   0x7   :  { %2008 = vmatprep.subr.msk.mxu1 %vm1326_vm2, %v1312_v9  ;;  %v28_v18 = vld [vmem:[%s2773_s0 + $0x40] sm:$0xff]  ;;  %v78_v19 = vld [vmem:[%s2773_s0 + $0x1d0] sm:$0xff]  ;;  %v29_v20 = vld [vmem:[%s2773_s0 + $0x48] sm:$0xff] }
   0x8   :  { %2009 = vmatpush3.msk.msra.mxu1 %vm1326_vm2, %v1312_v9  ;;  %v79_v21 = vld [vmem:[%s2773_s0 + $0x1d8] sm:$0xff]  ;;  %v30_v22 = vld [vmem:[%s2773_s0 + $0x50] sm:$0xff]  ;;  %v80_v23 = vld [vmem:[%s2773_s0 + $0x1e0] sm:$0xff] }
   0x9   :  { %1868 = vmatmul.mubr.msk.f32.gmra.mrb[2].mxu0 %vm117_vm1, %v23_v7  ;;  %1943 = vmatmul.mubr.msk.f32.gmra.mrb[2].mxu1 %vm117_vm1, %v73_v8  ;;  %v31_v24 = vld [vmem:[%s2773_s0 + $0x58] sm:$0xff]  ;;  %v81_v25 = vld [vmem:[%s2773_s0 + $0x1e8] sm:$0xff]  ;;  %v32_v26 = vld [vmem:[%s2773_s0 + $0x60] sm:$0xff] }
   0xa   :  { %1870 = vmatprep.mubr.msk.f32.mxu0 %vm117_vm1, %v24_v10  ;;  %1945 = vmatprep.mubr.msk.f32.mxu1 %vm117_vm1, %v74_v11  ;;  %v82_v27 = vld [vmem:[%s2773_s0 + $0x1f0] sm:$0xff]  ;;  %v33_v28 = vld [vmem:[%s2773_s0 + $0x68] sm:$0xff]  ;;  %v83_v29 = vld [vmem:[%s2773_s0 + $0x1f8] sm:$0xff] }
   0xb   :  { %v34_v30 = vld [vmem:[%s2773_s0 + $0x70] sm:$0xff]  ;;  %v84_v31 = vld [vmem:[%s2773_s0 + $0x200] sm:$0xff]  ;;  %v35_v32 = vld [vmem:[%s2773_s0 + $0x78] sm:$0xff] }
   0xc   :  { %v85_v33 = vld [vmem:[%s2773_s0 + $0x208] sm:$0xff]  ;;  %v36_v34 = vld [vmem:[%s2773_s0 + $0x80] sm:$0xff]  ;;  %v86_v35 = vld [vmem:[%s2773_s0 + $0x210] sm:$0xff] }
   0xd   :  { %1871 = vmatmul.mubr.msk.f32.gmra.mrb[4].mxu0 %vm117_vm1, %v25_v12  ;;  %1946 = vmatmul.mubr.msk.f32.gmra.mrb[4].mxu1 %vm117_vm1, %v75_v13  ;;  %v37_v36 = vld [vmem:[%s2773_s0 + $0x88] sm:$0xff]  ;;  %v87_v37 = vld [vmem:[%s2773_s0 + $0x218] sm:$0xff]  ;;  %v38_v38 = vld [vmem:[%s2773_s0 + $0x90] sm:$0xff] }
   0xe   :  { %1873 = vmatprep.mubr.msk.f32.mxu0 %vm117_vm1, %v26_v14  ;;  %1948 = vmatprep.mubr.msk.f32.mxu1 %vm117_vm1, %v76_v15  ;;  %v88_v39 = vld [vmem:[%s2773_s0 + $0x220] sm:$0xff]  ;;  %v39_v40 = vld [vmem:[%s2773_s0 + $0x98] sm:$0xff]  ;;  %v89_v41 = vld [vmem:[%s2773_s0 + $0x228] sm:$0xff] }
   0xf   :  { %v40_v42 = vld [vmem:[%s2773_s0 + $0xa0] sm:$0xff]  ;;  %v90_v43 = vld [vmem:[%s2773_s0 + $0x230] sm:$0xff]  ;;  %v41_v44 = vld [vmem:[%s2773_s0 + $0xa8] sm:$0xff] }
  0x10   :  { %v91_v45 = vld [vmem:[%s2773_s0 + $0x238] sm:$0xff]  ;;  %v42_v46 = vld [vmem:[%s2773_s0 + $0xb0] sm:$0xff]  ;;  %v92_v47 = vld [vmem:[%s2773_s0 + $0x240] sm:$0xff] }
  0x11   :  { %1874 = vmatmul.mubr.msk.f32.gmra.mrb[6].mxu0 %vm117_vm1, %v27_v16  ;;  %1949 = vmatmul.mubr.msk.f32.gmra.mrb[6].mxu1 %vm117_vm1, %v77_v17  ;;  %v43_v48 = vld [vmem:[%s2773_s0 + $0xb8] sm:$0xff]  ;;  %v93_v49 = vld [vmem:[%s2773_s0 + $0x248] sm:$0xff]  ;;  %v44_v50 = vld [vmem:[%s2773_s0 + $0xc0] sm:$0xff] }
  0x12   :  { %1876 = vmatprep.mubr.msk.f32.mxu0 %vm117_vm1, %v28_v18  ;;  %1951 = vmatprep.mubr.msk.f32.mxu1 %vm117_vm1, %v78_v19  ;;  %v94_v51 = vld [vmem:[%s2773_s0 + $0x250] sm:$0xff]  ;;  %v45_v52 = vld [vmem:[%s2773_s0 + $0xc8] sm:$0xff]  ;;  %v95_v53 = vld [vmem:[%s2773_s0 + $0x258] sm:$0xff] }
  0x13   :  { %v46_v54 = vld [vmem:[%s2773_s0 + $0xd0] sm:$0xff]  ;;  %v96_v55 = vld [vmem:[%s2773_s0 + $0x260] sm:$0xff]  ;;  %v47_v56 = vld [vmem:[%s2773_s0 + $0xd8] sm:$0xff] }
  0x14   :  { %v97_v57 = vld [vmem:[%s2773_s0 + $0x268] sm:$0xff]  ;;  %v48_v58 = vld [vmem:[%s2773_s0 + $0xe0] sm:$0xff]  ;;  %v98_v59 = vld [vmem:[%s2773_s0 + $0x270] sm:$0xff] }
  0x15   :  { %1877 = vmatmul.mubr.msk.f32.gmra.mrb[8].mxu0 %vm117_vm1, %v29_v20  ;;  %1952 = vmatmul.mubr.msk.f32.gmra.mrb[8].mxu1 %vm117_vm1, %v79_v21  ;;  %v49_v60 = vld [vmem:[%s2773_s0 + $0xe8] sm:$0xff]  ;;  %v99_v61 = vld [vmem:[%s2773_s0 + $0x278] sm:$0xff]  ;;  %v50_v62 = vld [vmem:[%s2773_s0 + $0xf0] sm:$0xff] }
  0x16   :  { %1879 = vmatprep.mubr.msk.f32.mxu0 %vm117_vm1, %v30_v22  ;;  %1954 = vmatprep.mubr.msk.f32.mxu1 %vm117_vm1, %v80_v23  ;;  %v100_v63 = vld [vmem:[%s2773_s0 + $0x280] sm:$0xff]  ;;  %v51_v0 = vld [vmem:[%s2773_s0 + $0xf8] sm:$0xff]  ;;  %v101_v1 = vld [vmem:[%s2773_s0 + $0x288] sm:$0xff] }
  0x17   :  { %v52_v2 = vld [vmem:[%s2773_s0 + $0x100] sm:$0xff]  ;;  %v102_v3 = vld [vmem:[%s2773_s0 + $0x290] sm:$0xff]  ;;  %v53_v4 = vld [vmem:[%s2773_s0 + $0x108] sm:$0xff] }
  0x18   :  { %v103_v5 = vld [vmem:[%s2773_s0 + $0x298] sm:$0xff]  ;;  %v54_v6 = vld [vmem:[%s2773_s0 + $0x110] sm:$0xff]  ;;  %v104_v7 = vld [vmem:[%s2773_s0 + $0x2a0] sm:$0xff] }
  0x19   :  { %1880 = vmatmul.mubr.msk.f32.gmra.mrb[10].mxu0 %vm117_vm1, %v31_v24  ;;  %1955 = vmatmul.mubr.msk.f32.gmra.mrb[10].mxu1 %vm117_vm1, %v81_v25  ;;  %v55_v8 = vld [vmem:[%s2773_s0 + $0x118] sm:$0xff]  ;;  %v105_v9 = vld [vmem:[%s2773_s0 + $0x2a8] sm:$0xff]  ;;  %v56_v10 = vld [vmem:[%s2773_s0 + $0x120] sm:$0xff] }
  0x1a   :  { %1882 = vmatprep.mubr.msk.f32.mxu0 %vm117_vm1, %v32_v26  ;;  %1957 = vmatprep.mubr.msk.f32.mxu1 %vm117_vm1, %v82_v27  ;;  %v106_v11 = vld [vmem:[%s2773_s0 + $0x2b0] sm:$0xff]  ;;  %v57_v12 = vld [vmem:[%s2773_s0 + $0x128] sm:$0xff]  ;;  %v107_v13 = vld [vmem:[%s2773_s0 + $0x2b8] sm:$0xff] }
  0x1b   :  { %v58_v14 = vld [vmem:[%s2773_s0 + $0x130] sm:$0xff]  ;;  %v108_v15 = vld [vmem:[%s2773_s0 + $0x2c0] sm:$0xff]  ;;  %v59_v16 = vld [vmem:[%s2773_s0 + $0x138] sm:$0xff] }
  0x1c   :  { %v109_v17 = vld [vmem:[%s2773_s0 + $0x2c8] sm:$0xff]  ;;  %v60_v18 = vld [vmem:[%s2773_s0 + $0x140] sm:$0xff]  ;;  %v110_v19 = vld [vmem:[%s2773_s0 + $0x2d0] sm:$0xff] }
  0x1d   :  { %1883 = vmatmul.mubr.msk.f32.gmra.mrb[12].mxu0 %vm117_vm1, %v33_v28  ;;  %1958 = vmatmul.mubr.msk.f32.gmra.mrb[12].mxu1 %vm117_vm1, %v83_v29  ;;  %v61_v20 = vld [vmem:[%s2773_s0 + $0x148] sm:$0xff]  ;;  %v111_v21 = vld [vmem:[%s2773_s0 + $0x2d8] sm:$0xff]  ;;  %v62_v22 = vld [vmem:[%s2773_s0 + $0x150] sm:$0xff] }
  0x1e   :  { %1885 = vmatprep.mubr.msk.f32.mxu0 %vm117_vm1, %v34_v30  ;;  %1960 = vmatprep.mubr.msk.f32.mxu1 %vm117_vm1, %v84_v31  ;;  %v112_v23 = vld [vmem:[%s2773_s0 + $0x2e0] sm:$0xff]  ;;  %v63_v24 = vld [vmem:[%s2773_s0 + $0x158] sm:$0xff]  ;;  %v113_v25 = vld [vmem:[%s2773_s0 + $0x2e8] sm:$0xff] }
  0x1f   :  { %v64_v26 = vld [vmem:[%s2773_s0 + $0x160] sm:$0xff]  ;;  %v114_v27 = vld [vmem:[%s2773_s0 + $0x2f0] sm:$0xff]  ;;  %v65_v28 = vld [vmem:[%s2773_s0 + $0x168] sm:$0xff] }
  0x20   :  { %v115_v29 = vld [vmem:[%s2773_s0 + $0x2f8] sm:$0xff]  ;;  %v66_v30 = vld [vmem:[%s2773_s0 + $0x170] sm:$0xff]  ;;  %v1308_v31 = vld [vmem:[%s2775_s1] sm:$0xff] }
  0x21   :  { %1886 = vmatmul.mubr.msk.f32.gmra.mrb[14].mxu0 %vm117_vm1, %v35_v32  ;;  %1961 = vmatmul.mubr.msk.f32.gmra.mrb[14].mxu1 %vm117_vm1, %v85_v33  ;;  %v67_v32 = vld [vmem:[%s2773_s0 + $0x178] sm:$0xff]  ;;  %v1309_v33 = vld [vmem:[%s2775_s1 + $0x8] sm:$0xff] }
  0x22   :  { %1888 = vmatprep.mubr.msk.f32.mxu0 %vm117_vm1, %v36_v34  ;;  %1963 = vmatprep.mubr.msk.f32.mxu1 %vm117_vm1, %v86_v35  ;;  %v68_v34 = vld [vmem:[%s2773_s0 + $0x180] sm:$0xff]  ;;  %v1310_v35 = vld [vmem:[%s2775_s1 + $0x10] sm:$0xff] }
  0x25   :  { %1889 = vmatmul.mubr.msk.f32.gmra.mrb[16].mxu0 %vm117_vm1, %v37_v36  ;;  %1964 = vmatmul.mubr.msk.f32.gmra.mrb[16].mxu1 %vm117_vm1, %v87_v37  ;;  %v69_v36 = vld [vmem:[%s2773_s0 + $0x188] sm:$0xff]  ;;  %v1311_v37 = vld [vmem:[%s2775_s1 + $0x18] sm:$0xff] }
  0x26   :  { %1891 = vmatprep.mubr.msk.f32.mxu0 %vm117_vm1, %v38_v38  ;;  %1966 = vmatprep.mubr.msk.f32.mxu1 %vm117_vm1, %v88_v39 }
  0x29   :  { %1892 = vmatmul.mubr.msk.f32.gmra.mrb[18].mxu0 %vm117_vm1, %v39_v40  ;;  %1967 = vmatmul.mubr.msk.f32.gmra.mrb[18].mxu1 %vm117_vm1, %v89_v41 }
  0x2a   :  { %1894 = vmatprep.mubr.msk.f32.mxu0 %vm117_vm1, %v40_v42  ;;  %1969 = vmatprep.mubr.msk.f32.mxu1 %vm117_vm1, %v90_v43 }
  0x2d   :  { %1895 = vmatmul.mubr.msk.f32.gmra.mrb[20].mxu0 %vm117_vm1, %v41_v44  ;;  %1970 = vmatmul.mubr.msk.f32.gmra.mrb[20].mxu1 %vm117_vm1, %v91_v45 }
  0x2e   :  { %1897 = vmatprep.mubr.msk.f32.mxu0 %vm117_vm1, %v42_v46  ;;  %1972 = vmatprep.mubr.msk.f32.mxu1 %vm117_vm1, %v92_v47 }
  0x31   :  { %1898 = vmatmul.mubr.msk.f32.gmra.mrb[22].mxu0 %vm117_vm1, %v43_v48  ;;  %1973 = vmatmul.mubr.msk.f32.gmra.mrb[22].mxu1 %vm117_vm1, %v93_v49 }
  0x32   :  { %1900 = vmatprep.mubr.msk.f32.mxu0 %vm117_vm1, %v44_v50  ;;  %1975 = vmatprep.mubr.msk.f32.mxu1 %vm117_vm1, %v94_v51 }
  0x35   :  { %1901 = vmatmul.mubr.msk.f32.gmra.mrb[24].mxu0 %vm117_vm1, %v45_v52  ;;  %1976 = vmatmul.mubr.msk.f32.gmra.mrb[24].mxu1 %vm117_vm1, %v95_v53 }
  0x36   :  { %1903 = vmatprep.mubr.msk.f32.mxu0 %vm117_vm1, %v46_v54  ;;  %1978 = vmatprep.mubr.msk.f32.mxu1 %vm117_vm1, %v96_v55 }
  0x39   :  { %1904 = vmatmul.mubr.msk.f32.gmra.mrb[26].mxu0 %vm117_vm1, %v47_v56  ;;  %1979 = vmatmul.mubr.msk.f32.gmra.mrb[26].mxu1 %vm117_vm1, %v97_v57 }
  0x3a   :  { %1906 = vmatprep.mubr.msk.f32.mxu0 %vm117_vm1, %v48_v58  ;;  %1981 = vmatprep.mubr.msk.f32.mxu1 %vm117_vm1, %v98_v59 }
  0x3d   :  { %1907 = vmatmul.mubr.msk.f32.gmra.mrb[28].mxu0 %vm117_vm1, %v49_v60  ;;  %1982 = vmatmul.mubr.msk.f32.gmra.mrb[28].mxu1 %vm117_vm1, %v99_v61 }
  0x3e   :  { %1909 = vmatprep.mubr.msk.f32.mxu0 %vm117_vm1, %v50_v62  ;;  %1984 = vmatprep.mubr.msk.f32.mxu1 %vm117_vm1, %v100_v63 }
  0x41   :  { %1910 = vmatmul.mubr.msk.f32.gmra.mrb[30].mxu0 %vm117_vm1, %v51_v0  ;;  %1985 = vmatmul.mubr.msk.f32.gmra.mrb[30].mxu1 %vm117_vm1, %v101_v1 }
  0x42   :  { %1912 = vmatprep.mubr.msk.f32.mxu0 %vm117_vm1, %v52_v2  ;;  %1987 = vmatprep.mubr.msk.f32.mxu1 %vm117_vm1, %v102_v3 }
  0x45   :  { %1913 = vmatmul.mubr.msk.f32.gmra.mrb[32].mxu0 %vm117_vm1, %v53_v4  ;;  %1988 = vmatmul.mubr.msk.f32.gmra.mrb[32].mxu1 %vm117_vm1, %v103_v5 }
  0x46   :  { %1915 = vmatprep.mubr.msk.f32.mxu0 %vm117_vm1, %v54_v6  ;;  %1990 = vmatprep.mubr.msk.f32.mxu1 %vm117_vm1, %v104_v7 }
  0x49   :  { %1916 = vmatmul.mubr.msk.f32.gmra.mrb[34].mxu0 %vm117_vm1, %v55_v8  ;;  %1991 = vmatmul.mubr.msk.f32.gmra.mrb[34].mxu1 %vm117_vm1, %v105_v9 }
  0x4a   :  { %1918 = vmatprep.mubr.msk.f32.mxu0 %vm117_vm1, %v56_v10  ;;  %1993 = vmatprep.mubr.msk.f32.mxu1 %vm117_vm1, %v106_v11 }
  0x4d   :  { %1919 = vmatmul.mubr.msk.f32.gmra.mrb[36].mxu0 %vm117_vm1, %v57_v12  ;;  %1994 = vmatmul.mubr.msk.f32.gmra.mrb[36].mxu1 %vm117_vm1, %v107_v13 }
  0x4e   :  { %1921 = vmatprep.mubr.msk.f32.mxu0 %vm117_vm1, %v58_v14  ;;  %1996 = vmatprep.mubr.msk.f32.mxu1 %vm117_vm1, %v108_v15 }
  0x51   :  { %1922 = vmatmul.mubr.msk.f32.gmra.mrb[38].mxu0 %vm117_vm1, %v59_v16  ;;  %1997 = vmatmul.mubr.msk.f32.gmra.mrb[38].mxu1 %vm117_vm1, %v109_v17 }
  0x52   :  { %1924 = vmatprep.mubr.msk.f32.mxu0 %vm117_vm1, %v60_v18  ;;  %1999 = vmatprep.mubr.msk.f32.mxu1 %vm117_vm1, %v110_v19 }
  0x55   :  { %1925 = vmatmul.mubr.msk.f32.gmra.mrb[40].mxu0 %vm117_vm1, %v61_v20  ;;  %2000 = vmatmul.mubr.msk.f32.gmra.mrb[40].mxu1 %vm117_vm1, %v111_v21 }
  0x56   :  { %1927 = vmatprep.mubr.msk.f32.mxu0 %vm117_vm1, %v62_v22  ;;  %2002 = vmatprep.mubr.msk.f32.mxu1 %vm117_vm1, %v112_v23 }
  0x59   :  { %1928 = vmatmul.mubr.msk.f32.gmra.mrb[42].mxu0 %vm117_vm1, %v63_v24  ;;  %2003 = vmatmul.mubr.msk.f32.gmra.mrb[42].mxu1 %vm117_vm1, %v113_v25 }
  0x5a   :  { %1930 = vmatprep.mubr.msk.f32.mxu0 %vm117_vm1, %v64_v26  ;;  %2005 = vmatprep.mubr.msk.f32.mxu1 %vm117_vm1, %v114_v27 }
  0x5d   :  { %1931 = vmatmul.mubr.msk.f32.gmra.mrb[44].mxu0 %vm117_vm1, %v65_v28  ;;  %2006 = vmatmul.mubr.msk.f32.gmra.mrb[44].mxu1 %vm117_vm1, %v115_v29 }
  0x5e   :  { %1933 = vmatprep.mubr.msk.f32.mxu0 %vm117_vm1, %v66_v30  ;;  %2010 = vmatprep.mubr.msk.f32.mxu1 %vm1313_vm3, %v1308_v31 }
  0x61   :  { %1934 = vmatmul.mubr.msk.f32.gmra.mrb[46].mxu0 %vm117_vm1, %v67_v32  ;;  %2011 = vmatmul.mubr.msk.f32.vlgmr.msra.gmra.mrb[46].mxu1 %vm1313_vm3, %v1309_v33 }
  0x62   :  { %1936 = vmatprep.mubr.msk.f32.mxu0 %vm117_vm1, %v68_v34  ;;  %2013 = vmatprep.mubr.msk.f32.mxu1 %vm1313_vm3, %v1310_v35 }
  0x65   :  { %1937 = vmatmul.mubr.msk.f32.gmra.mrb[48].mxu0 %vm117_vm1, %v69_v36  ;;  %2014 = vmatmul.mubr.msk.f32.gmra.mrb[48].mxu1 %vm1313_vm3, %v1311_v37 }
  0xd8   :  { %v1866_v38 = vpop.f32.mrb[0].mxu0  ;;  %v1941_v39 = vpop.f32.mrb[0].mxu1 }
  0xd9   :  { %v957_v40 = vsel %vm955_vm4, %v1866_v38, -inf  ;;  %v476_v41 = vpop.f32.mrb[1].mxu0  ;;  %v2455_v42 = vpop.f32.mrb[1].mxu1  ;;  %v1143_v45 = vsel %vm955_vm4, %v1941_v39, -inf }
  0xda   :  { %v956_v43 = vsel %vm955_vm4, %v476_v41, -inf }
  0xdb   :  { %v958_v44 = vmax.f32 %v956_v43, %v957_v40 }
  0xdc   :  { %v1869_v46 = vpop.f32.mrb[2].mxu0  ;;  %v1944_v47 = vpop.f32.mrb[2].mxu1 }
  0xdd   :  { %v486_v48 = vpop.f32.mrb[3].mxu0  ;;  %v736_v49 = vpop.f32.mrb[3].mxu1  ;;  %v1146_v51 = vsel %vm955_vm4, %v1944_v47, -inf  ;;  %v967_v61 = vsel %vm955_vm4, %v1869_v46, -inf }
  0xde   :  { %v959_v50 = vsel %vm955_vm4, %v486_v48, -inf  ;;  %v1144_v52 = vsel %vm955_vm4, %v736_v49, -inf }
  0xdf   :  { %v960_v53 = vmax.f32 %v958_v44, %v959_v50  ;;  %v1145_v54 = vmax.f32 %v1143_v45, %v1144_v52 }
  0xe0   :  { %v1872_v55 = vpop.f32.mrb[4].mxu0  ;;  %v1947_v56 = vpop.f32.mrb[4].mxu1 }
  0xe1   :  { %v1147_v57 = vmax.f32 %v1145_v54, %v1146_v51  ;;  %v496_v58 = vpop.f32.mrb[5].mxu0  ;;  %v1155_v59 = vsel %vm955_vm4, %v1947_v56, -inf  ;;  %v746_v60 = vpop.f32.mrb[5].mxu1  ;;  %v970_v2 = vsel %vm955_vm4, %v1872_v55, -inf  ;;  %v961_v12 = vrot.slane %v960_v53, 4 }
  0xe2   :  { %v968_v62 = vsel %vm955_vm4, %v496_v58, -inf  ;;  %v1154_v63 = vsel %vm955_vm4, %v746_v60, -inf }
  0xe3   :  { %v969_v0 = vmax.f32 %v967_v61, %v968_v62  ;;  %v1156_v1 = vmax.f32 %v1154_v63, %v1155_v59  ;;  %v1148_v13 = vrot.slane %v1147_v57, 4  ;;  %v962_v24 = vmax.f32 %v960_v53, %v961_v12 }
  0xe4   :  { %v1875_v3 = vpop.f32.mrb[6].mxu0  ;;  %v1950_v4 = vpop.f32.mrb[6].mxu1 }
  0xe5   :  { %v971_v5 = vmax.f32 %v969_v0, %v970_v2  ;;  %v979_v6 = vsel %vm955_vm4, %v1875_v3, -inf  ;;  %v506_v7 = vpop.f32.mrb[7].mxu0  ;;  %v756_v8 = vpop.f32.mrb[7].mxu1  ;;  %v1165_v17 = vsel %vm955_vm4, %v1950_v4, -inf  ;;  %v1149_v25 = vmax.f32 %v1147_v57, %v1148_v13 }
  0xe6   :  { %v978_v9 = vsel %vm955_vm4, %v506_v7, -inf  ;;  %v1157_v10 = vsel %vm955_vm4, %v756_v8, -inf  ;;  %v963_v40 = vrot.slane %v962_v24, 2 }
  0xe7   :  { %v980_v11 = vmax.f32 %v978_v9, %v979_v6  ;;  %v1158_v15 = vmax.f32 %v1156_v1, %v1157_v10  ;;  %v972_v29 = vrot.slane %v971_v5, 4  ;;  %v1150_v41 = vrot.slane %v1149_v25, 2 }
  0xe8   :  { %v1878_v14 = vpop.f32.mrb[8].mxu0  ;;  %v1953_v16 = vpop.f32.mrb[8].mxu1  ;;  %v964_v57 = vmax.f32 %v962_v24, %v963_v40 }
  0xe9   :  { %v516_v18 = vpop.f32.mrb[9].mxu0  ;;  %v766_v19 = vpop.f32.mrb[9].mxu1  ;;  %v1168_v23 = vsel %vm955_vm4, %v1953_v16, -inf  ;;  %v989_v30 = vsel %vm955_vm4, %v1878_v14, -inf  ;;  %v1159_v31 = vrot.slane %v1158_v15, 4  ;;  %v973_v47 = vmax.f32 %v971_v5, %v972_v29 }
  0xea   :  { %v981_v20 = vsel %vm955_vm4, %v516_v18, -inf  ;;  %v1166_v21 = vsel %vm955_vm4, %v766_v19, -inf  ;;  %v1151_v63 = vmax.f32 %v1149_v25, %v1150_v41  ;;  %v965_v12 = vrot.slane %v964_v57, 1 }
  0xeb   :  { %v982_v22 = vmax.f32 %v980_v11, %v981_v20  ;;  %v1167_v26 = vmax.f32 %v1165_v17, %v1166_v21  ;;  %v1160_v48 = vmax.f32 %v1158_v15, %v1159_v31  ;;  %v974_v0 = vrot.slane %v973_v47, 2 }
  0xec   :  { %v1881_v27 = vpop.f32.mrb[10].mxu0  ;;  %v1956_v28 = vpop.f32.mrb[10].mxu1  ;;  %v2488_v11 = vsel %vm955_vm4, %v2455_v42, -inf  ;;  %v1152_v16 = vrot.slane %v1151_v63, 1 }
  0xed   :  { %v526_v32 = vpop.f32.mrb[11].mxu0  ;;  %v776_v33 = vpop.f32.mrb[11].mxu1  ;;  %v983_v34 = vrot.slane %v982_v22, 4  ;;  %v1169_v35 = vmax.f32 %v1167_v26, %v1168_v23  ;;  %v1177_v37 = vsel %vm955_vm4, %v1956_v28, -inf  ;;  %v992_v43 = vsel %vm955_vm4, %v1881_v27, -inf }
  0xee   :  { %v990_v36 = vsel %vm955_vm4, %v526_v32, -inf  ;;  %v1176_v39 = vsel %vm955_vm4, %v776_v33, -inf  ;;  %v1161_v1 = vrot.slane %v1160_v48, 2  ;;  %v975_v17 = vmax.f32 %v973_v47, %v974_v0 }
  0xef   :  { %v991_v38 = vmax.f32 %v989_v30, %v990_v36  ;;  %v1178_v45 = vmax.f32 %v1176_v39, %v1177_v37  ;;  %v984_v53 = vmax.f32 %v982_v22, %v983_v34  ;;  %v1170_v58 = vrot.slane %v1169_v35, 4 }
  0xf0   :  { %v1884_v44 = vpop.f32.mrb[12].mxu0  ;;  %v1959_v46 = vpop.f32.mrb[12].mxu1  ;;  %v1162_v22 = vmax.f32 %v1160_v48, %v1161_v1  ;;  %v976_v36 = vrot.slane %v975_v17, 1 }
  0xf1   :  { %v993_v49 = vmax.f32 %v991_v38, %v992_v43  ;;  %v1001_v50 = vsel %vm955_vm4, %v1884_v44, -inf  ;;  %v536_v51 = vpop.f32.mrb[13].mxu0  ;;  %v786_v52 = vpop.f32.mrb[13].mxu1  ;;  %v1187_v59 = vsel %vm955_vm4, %v1959_v46, -inf  ;;  %v985_v4 = vrot.slane %v984_v53, 2 }
  0xf2   :  { %v1000_v54 = vsel %vm955_vm4, %v536_v51, -inf  ;;  %v1179_v56 = vsel %vm955_vm4, %v786_v52, -inf  ;;  %v1171_v13 = vmax.f32 %v1169_v35, %v1170_v58  ;;  %v2495_v35 = vmax.f32 %v964_v57, %v965_v12 }
  0xf3   :  { %v1002_v55 = vmax.f32 %v1000_v54, %v1001_v50  ;;  %v1180_v61 = vmax.f32 %v1178_v45, %v1179_v56  ;;  %v994_v8 = vrot.slane %v993_v49, 4  ;;  %v986_v23 = vmax.f32 %v984_v53, %v985_v4 }
  0xf4   :  { %v1887_v60 = vpop.f32.mrb[14].mxu0  ;;  %v1962_v62 = vpop.f32.mrb[14].mxu1  ;;  %v1172_v29 = vrot.slane %v1171_v13, 2  ;;  %v1163_v41 = vrot.slane %v1162_v22, 1  ;;  %v2499_v46 = vmax.f32 %v1151_v63, %v1152_v16  ;;  %v2502_v56 = vmax.f32 %v975_v17, %v976_v36 }
  0xf5   :  { %v546_v2 = vpop.f32.mrb[15].mxu0  ;;  %v796_v3 = vpop.f32.mrb[15].mxu1  ;;  %v1190_v6 = vsel %vm955_vm4, %v1962_v62, -inf  ;;  %v1181_v18 = vrot.slane %v1180_v61, 4  ;;  %v1011_v24 = vsel %vm955_vm4, %v1887_v60, -inf  ;;  %v995_v26 = vmax.f32 %v993_v49, %v994_v8 }
  0xf6   :  { %v1003_v5 = vsel %vm955_vm4, %v546_v2, -inf  ;;  %v1188_v7 = vsel %vm955_vm4, %v796_v3, -inf  ;;  %v987_v50 = vrot.slane %v986_v23, 1  ;;  %v1173_v51 = vmax.f32 %v1171_v13, %v1172_v29 }
  0xf7   :  { %v1004_v9 = vmax.f32 %v1002_v55, %v1003_v5  ;;  %v1189_v10 = vmax.f32 %v1187_v59, %v1188_v7  ;;  %v1182_v37 = vmax.f32 %v1180_v61, %v1181_v18  ;;  %v996_v47 = vrot.slane %v995_v26, 2 }
  0xf8   :  { %v1890_v14 = vpop.f32.mrb[16].mxu0  ;;  %v1965_v15 = vpop.f32.mrb[16].mxu1  ;;  %v2505_v62 = vmax.f32 %v1162_v22, %v1163_v41  ;;  %v1174_v7 = vrot.slane %v1173_v51, 1 }
  0xf9   :  { %v1191_v19 = vmax.f32 %v1189_v10, %v1190_v6  ;;  %v556_v20 = vpop.f32.mrb[17].mxu0  ;;  %v806_v21 = vpop.f32.mrb[17].mxu1  ;;  %v1005_v27 = vrot.slane %v1004_v9, 4  ;;  %v1199_v28 = vsel %vm955_vm4, %v1965_v15, -inf  ;;  %v1014_v31 = vsel %vm955_vm4, %v1890_v14, -inf }
  0xfa   :  { %v1012_v25 = vsel %vm955_vm4, %v556_v20, -inf  ;;  %v1198_v33 = vsel %vm955_vm4, %v806_v21, -inf  ;;  %v1183_v57 = vrot.slane %v1182_v37, 2  ;;  %v997_v2 = vmax.f32 %v995_v26, %v996_v47 }
  0xfb   :  { %v1013_v42 = vmax.f32 %v1011_v24, %v1012_v25  ;;  %v1192_v30 = vrot.slane %v1191_v19, 4  ;;  %v1200_v45 = vmax.f32 %v1198_v33, %v1199_v28  ;;  %v1006_v48 = vmax.f32 %v1004_v9, %v1005_v27 }
  0xfc   :  { %v1893_v32 = vpop.f32.mrb[18].mxu0  ;;  %v1968_v34 = vpop.f32.mrb[18].mxu1  ;;  %v2510_v6 = vmax.f32 %v986_v23, %v987_v50  ;;  %v1184_v13 = vmax.f32 %v1182_v37, %v1183_v57  ;;  %v998_v23 = vrot.slane %v997_v2, 1 }
  0xfd   :  { %v1015_v38 = vmax.f32 %v1013_v42, %v1014_v31  ;;  %v566_v39 = vpop.f32.mrb[19].mxu0  ;;  %v816_v40 = vpop.f32.mrb[19].mxu1  ;;  %v1023_v43 = vsel %vm955_vm4, %v1893_v32, -inf  ;;  %v1193_v52 = vmax.f32 %v1191_v19, %v1192_v30  ;;  %v1209_v59 = vsel %vm955_vm4, %v1968_v34, -inf }
  0xfe   :  { %v1022_v44 = vsel %vm955_vm4, %v566_v39, -inf  ;;  %v1201_v54 = vsel %vm955_vm4, %v816_v40, -inf  ;;  %v1007_v3 = vrot.slane %v1006_v48, 2  ;;  %v1185_v39 = vrot.slane %v1184_v13, 1 }
  0xff   :  { %v1024_v49 = vmax.f32 %v1022_v44, %v1023_v43  ;;  %v1016_v58 = vrot.slane %v1015_v38, 4  ;;  %v1202_v63 = vmax.f32 %v1200_v45, %v1201_v54  ;;  %v1194_v8 = vrot.slane %v1193_v52, 2 }
 0x100   :  { %v1896_v53 = vpop.f32.mrb[20].mxu0  ;;  %v1971_v55 = vpop.f32.mrb[20].mxu1  ;;  %v1008_v24 = vmax.f32 %v1006_v48, %v1007_v3  ;;  %v2519_v44 = vmax.f32 %v1173_v51, %v1174_v7  ;;  %v2525_v51 = vmax.f32 %v1184_v13, %v1185_v39 }
 0x101   :  { %v576_v60 = vpop.f32.mrb[21].mxu0  ;;  %v826_v61 = vpop.f32.mrb[21].mxu1  ;;  %v1212_v5 = vsel %vm955_vm4, %v1971_v55, -inf  ;;  %v1017_v14 = vmax.f32 %v1015_v38, %v1016_v58  ;;  %v1033_v15 = vsel %vm955_vm4, %v1896_v53, -inf  ;;  %v1203_v16 = vrot.slane %v1202_v63, 4 }
 0x102   :  { %v1025_v0 = vsel %vm955_vm4, %v576_v60, -inf  ;;  %v1210_v1 = vsel %vm955_vm4, %v826_v61, -inf  ;;  %v1195_v27 = vmax.f32 %v1193_v52, %v1194_v8  ;;  %v1009_v50 = vrot.slane %v1008_v24, 1 }
 0x103   :  { %v1026_v4 = vmax.f32 %v1024_v49, %v1025_v0  ;;  %v1211_v9 = vmax.f32 %v1209_v59, %v1210_v1  ;;  %v1018_v32 = vrot.slane %v1017_v14, 2  ;;  %v1204_v33 = vmax.f32 %v1202_v63, %v1203_v16 }
 0x104   :  { %v1899_v10 = vpop.f32.mrb[22].mxu0  ;;  %v1974_v12 = vpop.f32.mrb[22].mxu1  ;;  %v2522_v49 = vmax.f32 %v997_v2, %v998_v23  ;;  %v1196_v52 = vrot.slane %v1195_v27, 1  ;;  %v2530_v8 = vmax.f32 %v1008_v24, %v1009_v50 }
 0x105   :  { %v586_v17 = vpop.f32.mrb[23].mxu0  ;;  %v836_v18 = vpop.f32.mrb[23].mxu1  ;;  %v1027_v19 = vrot.slane %v1026_v4, 4  ;;  %v1213_v20 = vmax.f32 %v1211_v9, %v1212_v5  ;;  %v1221_v22 = vsel %vm955_vm4, %v1974_v12, -inf  ;;  %v1036_v28 = vsel %vm955_vm4, %v1899_v10, -inf }
 0x106   :  { %v1034_v21 = vsel %vm955_vm4, %v586_v17, -inf  ;;  %v1220_v26 = vsel %vm955_vm4, %v836_v18, -inf  ;;  %v1019_v57 = vmax.f32 %v1017_v14, %v1018_v32  ;;  %v1205_v58 = vrot.slane %v1204_v33, 2 }
 0x107   :  { %v1035_v25 = vmax.f32 %v1033_v15, %v1034_v21  ;;  %v1214_v42 = vrot.slane %v1213_v20, 4  ;;  %v1222_v30 = vmax.f32 %v1220_v26, %v1221_v22  ;;  %v1028_v40 = vmax.f32 %v1026_v4, %v1027_v19 }
 0x108   :  { %v1902_v29 = vpop.f32.mrb[24].mxu0  ;;  %v1977_v31 = vpop.f32.mrb[24].mxu1  ;;  %v2532_v9 = vmax.f32 %v1195_v27, %v1196_v52  ;;  %v1020_v13 = vrot.slane %v1019_v57, 1  ;;  %v1206_v16 = vmax.f32 %v1204_v33, %v1205_v58 }
 0x109   :  { %v1037_v34 = vmax.f32 %v1035_v25, %v1036_v28  ;;  %v1045_v36 = vsel %vm955_vm4, %v1902_v29, -inf  ;;  %v596_v37 = vpop.f32.mrb[25].mxu0  ;;  %v846_v38 = vpop.f32.mrb[25].mxu1  ;;  %v1215_v41 = vmax.f32 %v1213_v20, %v1214_v42  ;;  %v1231_v60 = vsel %vm955_vm4, %v1977_v31, -inf }
 0x10a   :  { %v1044_v43 = vsel %vm955_vm4, %v596_v37, -inf  ;;  %v1223_v48 = vsel %vm955_vm4, %v846_v38, -inf  ;;  %v1029_v0 = vrot.slane %v1028_v40, 2 }
 0x10b   :  { %v1038_v45 = vrot.slane %v1037_v34, 4  ;;  %v1046_v47 = vmax.f32 %v1044_v43, %v1045_v36  ;;  %v1224_v54 = vmax.f32 %v1222_v30, %v1223_v48  ;;  %v1216_v1 = vrot.slane %v1215_v41, 2 }
 0x10c   :  { %v1905_v53 = vpop.f32.mrb[26].mxu0  ;;  %v1980_v55 = vpop.f32.mrb[26].mxu1  ;;  %v1030_v21 = vmax.f32 %v1028_v40, %v1029_v0  ;;  %v2540_v43 = vmax.f32 %v1019_v57, %v1020_v13 }
 0x10d   :  { %v1039_v59 = vmax.f32 %v1037_v34, %v1038_v45  ;;  %v606_v61 = vpop.f32.mrb[27].mxu0  ;;  %v856_v63 = vpop.f32.mrb[27].mxu1  ;;  %v1225_v2 = vrot.slane %v1224_v54, 4  ;;  %v1234_v5 = vsel %vm955_vm4, %v1980_v55, -inf  ;;  %v1055_v22 = vsel %vm955_vm4, %v1905_v53, -inf }
 0x10e   :  { %v1047_v3 = vsel %vm955_vm4, %v606_v61, -inf  ;;  %v1232_v7 = vsel %vm955_vm4, %v856_v63, -inf  ;;  %v1217_v25 = vmax.f32 %v1215_v41, %v1216_v1  ;;  %v1207_v34 = vrot.slane %v1206_v16, 1 }
 0x10f   :  { %v1048_v4 = vmax.f32 %v1046_v47, %v1047_v3  ;;  %v1040_v10 = vrot.slane %v1039_v59, 2  ;;  %v1233_v12 = vmax.f32 %v1231_v60, %v1232_v7  ;;  %v1226_v26 = vmax.f32 %v1224_v54, %v1225_v2 }
 0x110   :  { %v1908_v14 = vpop.f32.mrb[28].mxu0  ;;  %v1983_v15 = vpop.f32.mrb[28].mxu1  ;;  %v1031_v41 = vrot.slane %v1030_v21, 1  ;;  %v1218_v48 = vrot.slane %v1217_v25, 1  ;;  %v2545_v63 = vmax.f32 %v1206_v16, %v1207_v34 }
 0x111   :  { %v1049_v17 = vrot.slane %v1048_v4, 4  ;;  %v616_v18 = vpop.f32.mrb[29].mxu0  ;;  %v1243_v19 = vsel %vm955_vm4, %v1983_v15, -inf  ;;  %v866_v20 = vpop.f32.mrb[29].mxu1  ;;  %v1235_v23 = vmax.f32 %v1233_v12, %v1234_v5  ;;  %v1041_v28 = vmax.f32 %v1039_v59, %v1040_v10 }
 0x112   :  { %v1056_v24 = vsel %vm955_vm4, %v616_v18, -inf  ;;  %v1242_v42 = vsel %vm955_vm4, %v866_v20, -inf  ;;  %v1058_v30 = vsel %vm955_vm4, %v1908_v14, -inf  ;;  %v1227_v55 = vrot.slane %v1226_v26, 2 }
 0x113   :  { %v1057_v27 = vmax.f32 %v1055_v22, %v1056_v24  ;;  %v1236_v29 = vrot.slane %v1235_v23, 4  ;;  %v1244_v32 = vmax.f32 %v1242_v42, %v1243_v19  ;;  %v1050_v36 = vmax.f32 %v1048_v4, %v1049_v17 }
 0x114   :  { %v1911_v31 = vpop.f32.mrb[30].mxu0  ;;  %v1986_v33 = vpop.f32.mrb[30].mxu1  ;;  %v1042_v54 = vrot.slane %v1041_v28, 1  ;;  %v2550_v12 = vmax.f32 %v1030_v21, %v1031_v41  ;;  %v2552_v17 = vmax.f32 %v1217_v25, %v1218_v48  ;;  %v1228_v18 = vmax.f32 %v1226_v26, %v1227_v55 }
 0x115   :  { %v1059_v37 = vmax.f32 %v1057_v27, %v1058_v30  ;;  %v1067_v38 = vsel %vm955_vm4, %v1911_v31, -inf  ;;  %v626_v39 = vpop.f32.mrb[31].mxu0  ;;  %v876_v40 = vpop.f32.mrb[31].mxu1  ;;  %v1237_v45 = vmax.f32 %v1235_v23, %v1236_v29  ;;  %v1253_v58 = vsel %vm955_vm4, %v1986_v33, -inf }
 0x116   :  { %v1066_v47 = vsel %vm955_vm4, %v626_v39, -inf  ;;  %v1245_v53 = vsel %vm955_vm4, %v876_v40, -inf  ;;  %v1051_v57 = vrot.slane %v1050_v36, 2  ;;  %v2554_v16 = vmax.f32 %v1041_v28, %v1042_v54 }
 0x117   :  { %v1060_v50 = vrot.slane %v1059_v37, 4  ;;  %v1068_v52 = vmax.f32 %v1066_v47, %v1067_v38  ;;  %v1246_v60 = vmax.f32 %v1244_v32, %v1245_v53  ;;  %v1238_v0 = vrot.slane %v1237_v45, 2 }
 0x118   :  { %v1914_v59 = vpop.f32.mrb[32].mxu0  ;;  %v1989_v61 = vpop.f32.mrb[32].mxu1  ;;  %v1052_v23 = vmax.f32 %v1050_v36, %v1051_v57 }
 0x119   :  { %v1061_v1 = vmax.f32 %v1059_v37, %v1060_v50  ;;  %v636_v3 = vpop.f32.mrb[33].mxu0  ;;  %v886_v2 = vpop.f32.mrb[33].mxu1  ;;  %v1247_v4 = vrot.slane %v1246_v60, 4  ;;  %v1256_v7 = vsel %vm955_vm4, %v1989_v61, -inf  ;;  %v1077_v24 = vsel %vm955_vm4, %v1914_v59, -inf }
 0x11a   :  { %v1069_v5 = vsel %vm955_vm4, %v636_v3, -inf  ;;  %v1254_v10 = vsel %vm955_vm4, %v886_v2, -inf  ;;  %v1239_v21 = vmax.f32 %v1237_v45, %v1238_v0  ;;  %v1229_v37 = vrot.slane %v1228_v18, 1 }
 0x11b   :  { %v1062_v14 = vrot.slane %v1061_v1, 2  ;;  %v1070_v15 = vmax.f32 %v1068_v52, %v1069_v5  ;;  %v1255_v13 = vmax.f32 %v1253_v58, %v1254_v10  ;;  %v1248_v19 = vmax.f32 %v1246_v60, %v1247_v4 }
 0x11c   :  { %v1917_v20 = vpop.f32.mrb[34].mxu0  ;;  %v1992_v22 = vpop.f32.mrb[34].mxu1  ;;  %v1053_v47 = vrot.slane %v1052_v23, 1  ;;  %v1240_v54 = vrot.slane %v1239_v21, 1 }
 0x11d   :  { %v1071_v27 = vrot.slane %v1070_v15, 4  ;;  %v1257_v42 = vmax.f32 %v1255_v13, %v1256_v7  ;;  %v646_v29 = vpop.f32.mrb[35].mxu0  ;;  %v896_v30 = vpop.f32.mrb[35].mxu1  ;;  %v1063_v31 = vmax.f32 %v1061_v1, %v1062_v14  ;;  %v1249_v32 = vrot.slane %v1248_v19, 2 }
 0x11e   :  { %v1078_v33 = vsel %vm955_vm4, %v646_v29, -inf  ;;  %v1265_v26 = vsel %vm955_vm4, %v1992_v22, -inf  ;;  %v1080_v36 = vsel %vm955_vm4, %v1917_v20, -inf  ;;  %v1264_v40 = vsel %vm955_vm4, %v896_v30, -inf }
 0x11f   :  { %v1072_v25 = vmax.f32 %v1070_v15, %v1071_v27  ;;  %v1258_v34 = vrot.slane %v1257_v42, 4  ;;  %v1079_v28 = vmax.f32 %v1077_v24, %v1078_v33  ;;  %v1250_v38 = vmax.f32 %v1248_v19, %v1249_v32 }
 0x120   :  { %v1920_v39 = vpop.f32.mrb[36].mxu0  ;;  %v1995_v41 = vpop.f32.mrb[36].mxu1  ;;  %v1266_v59 = vmax.f32 %v1264_v40, %v1265_v26  ;;  %v1064_v60 = vrot.slane %v1063_v31, 1  ;;  %v2563_v1 = vmax.f32 %v1228_v18, %v1229_v37  ;;  %v2566_v10 = vmax.f32 %v1052_v23, %v1053_v47 }
 0x121   :  { %v1073_v48 = vrot.slane %v1072_v25, 2  ;;  %v1259_v45 = vmax.f32 %v1257_v42, %v1258_v34  ;;  %v1081_v50 = vmax.f32 %v1079_v28, %v1080_v36  ;;  %v656_v52 = vpop.f32.mrb[37].mxu0  ;;  %v906_v53 = vpop.f32.mrb[37].mxu1  ;;  %v1089_v55 = vsel %vm955_vm4, %v1920_v39, -inf }
 0x122   :  { %v1088_v58 = vsel %vm955_vm4, %v656_v52, -inf  ;;  %v1251_v3 = vrot.slane %v1250_v38, 1  ;;  %v1267_v5 = vsel %vm955_vm4, %v906_v53, -inf  ;;  %v1275_v13 = vsel %vm955_vm4, %v1995_v41, -inf }
 0x123   :  { %v1260_v61 = vrot.slane %v1259_v45, 2  ;;  %v1082_v57 = vrot.slane %v1081_v50, 4  ;;  %v1090_v0 = vmax.f32 %v1088_v58, %v1089_v55  ;;  %v1074_v2 = vmax.f32 %v1072_v25, %v1073_v48 }
 0x124   :  { %v1923_v4 = vpop.f32.mrb[38].mxu0  ;;  %v1998_v7 = vpop.f32.mrb[38].mxu1  ;;  %v2569_v22 = vmax.f32 %v1239_v21, %v1240_v54  ;;  %v1268_v24 = vmax.f32 %v1266_v59, %v1267_v5  ;;  %v2573_v42 = vmax.f32 %v1063_v31, %v1064_v60  ;;  %v2576_v32 = vmax.f32 %v1250_v38, %v1251_v3 }
 0x125   :  { %v1261_v14 = vmax.f32 %v1259_v45, %v1260_v61  ;;  %v1083_v15 = vmax.f32 %v1081_v50, %v1082_v57  ;;  %v666_v19 = vpop.f32.mrb[39].mxu0  ;;  %v916_v20 = vpop.f32.mrb[39].mxu1  ;;  %v1278_v23 = vsel %vm955_vm4, %v1998_v7, -inf  ;;  %v1075_v33 = vrot.slane %v1074_v2, 1 }
 0x126   :  { %v1091_v18 = vsel %vm955_vm4, %v666_v19, -inf  ;;  %v1276_v27 = vsel %vm955_vm4, %v916_v20, -inf  ;;  %v1269_v25 = vrot.slane %v1268_v24, 4  ;;  %v1099_v36 = vsel %vm955_vm4, %v1923_v4, -inf }
 0x127   :  { %v1084_v29 = vrot.slane %v1083_v15, 2  ;;  %v1092_v30 = vmax.f32 %v1090_v0, %v1091_v18  ;;  %v1277_v34 = vmax.f32 %v1275_v13, %v1276_v27  ;;  %v1262_v21 = vrot.slane %v1261_v14, 1 }
 0x128   :  { %v1926_v28 = vpop.f32.mrb[40].mxu0  ;;  %v2001_v26 = vpop.f32.mrb[40].mxu1  ;;  %v1270_v31 = vmax.f32 %v1268_v24, %v1269_v25  ;;  %v2583_v57 = vmax.f32 %v1074_v2, %v1075_v33 }
 0x129   :  { %v1085_v37 = vmax.f32 %v1083_v15, %v1084_v29  ;;  %v1093_v39 = vrot.slane %v1092_v30, 4  ;;  %v676_v40 = vpop.f32.mrb[41].mxu0  ;;  %v926_v41 = vpop.f32.mrb[41].mxu1  ;;  %v1279_v47 = vmax.f32 %v1277_v34, %v1278_v23  ;;  %v1287_v45 = vsel %vm955_vm4, %v2001_v26, -inf }
 0x12a   :  { %v1100_v48 = vsel %vm955_vm4, %v676_v40, -inf  ;;  %v1102_v50 = vsel %vm955_vm4, %v1926_v28, -inf  ;;  %v1286_v53 = vsel %vm955_vm4, %v926_v41, -inf  ;;  %v1271_v55 = vrot.slane %v1270_v31, 2 }
 0x12b   :  { %v1094_v38 = vmax.f32 %v1092_v30, %v1093_v39  ;;  %v1101_v52 = vmax.f32 %v1099_v36, %v1100_v48  ;;  %v1086_v54 = vrot.slane %v1085_v37, 1  ;;  %v1280_v58 = vrot.slane %v1279_v47, 4 }
 0x12c   :  { %v1929_v59 = vpop.f32.mrb[42].mxu0  ;;  %v1288_v60 = vmax.f32 %v1286_v53, %v1287_v45  ;;  %v2004_v61 = vpop.f32.mrb[42].mxu1  ;;  %v2586_v15 = vmax.f32 %v1261_v14, %v1262_v21  ;;  %v1272_v13 = vmax.f32 %v1270_v31, %v1271_v55 }
 0x12d   :  { %v1095_v0 = vrot.slane %v1094_v38, 2  ;;  %v1103_v3 = vmax.f32 %v1101_v52, %v1102_v50  ;;  %v1111_v4 = vsel %vm955_vm4, %v1929_v59, -inf  ;;  %v686_v5 = vpop.f32.mrb[43].mxu0  ;;  %v936_v7 = vpop.f32.mrb[43].mxu1  ;;  %v1281_v19 = vmax.f32 %v1279_v47, %v1280_v58 }
 0x12e   :  { %v1110_v20 = vsel %vm955_vm4, %v686_v5, -inf  ;;  %v1289_v29 = vsel %vm955_vm4, %v936_v7, -inf  ;;  %v1087_v30 = vmax.f32 %v1085_v37, %v1086_v54  ;;  %v1273_v2 = vrot.slane %v1272_v13, 1 }
 0x12f   :  { %v1096_v24 = vmax.f32 %v1094_v38, %v1095_v0  ;;  %v1104_v18 = vrot.slane %v1103_v3, 4  ;;  %v1112_v27 = vmax.f32 %v1110_v20, %v1111_v4  ;;  %v1282_v23 = vrot.slane %v1281_v19, 2 }
 0x130   :  { %v1290_v33 = vmax.f32 %v1288_v60, %v1289_v29  ;;  %v1932_v25 = vpop.f32.mrb[44].mxu0  ;;  %v2007_v34 = vpop.f32.mrb[44].mxu1  ;;  %v1297_v14 = vsel %vm955_vm4, %v2004_v61, -inf  ;;  %v2596_v47 = vmax.f32 %v1272_v13, %v1273_v2  ;;  %v2615_v29 = vld [vmem:[%s2776_s4] ss:$0 sm:$0xff] }
 0x131   :  { %v1097_v28 = vrot.slane %v1096_v24, 1  ;;  %v1105_v26 = vmax.f32 %v1103_v3, %v1104_v18  ;;  %v2592_v21 = vsel %vm955_vm4, %v1932_v25, -inf  ;;  %v696_v36 = vpop.f32.mrb[45].mxu0  ;;  %v946_v39 = vpop.f32.mrb[45].mxu1  ;;  %v1283_v40 = vmax.f32 %v1281_v19, %v1282_v23 }
 0x132   :  { %v1291_v41 = vrot.slane %v1290_v33, 4  ;;  %v1300_v31 = vsel %vm955_vm4, %v2007_v34, -inf  ;;  %v1113_v37 = vsel %vm955_vm4, %v696_v36, -inf  ;;  %v1298_v38 = vsel %vm955_vm4, %v946_v39, -inf }
 0x133   :  { %v1106_v48 = vrot.slane %v1105_v26, 2  ;;  %v1114_v45 = vmax.f32 %v1112_v27, %v1113_v37  ;;  %v1098_v50 = vmax.f32 %v1096_v24, %v1097_v28  ;;  %v1284_v52 = vrot.slane %v1283_v40, 1 }
 0x134   :  { %v1292_v53 = vmax.f32 %v1290_v33, %v1291_v41  ;;  %v1299_v54 = vmax.f32 %v1297_v14, %v1298_v38  ;;  %v1935_v55 = vpop.f32.mrb[46].mxu0  ;;  %v2599_v58 = vpop.f32.mrb[46].mxu1 }
 0x135   :  { %v1107_v59 = vmax.f32 %v1105_v26, %v1106_v48  ;;  %v1115_v60 = vrot.slane %v1114_v45, 4  ;;  %v2602_v61 = vsel %vm955_vm4, %v1935_v55, -inf  ;;  %v1426_v0 = vrot.slane %v2599_v58, 1  ;;  %v706_v3 = vpop.f32.mrb[47].mxu0  ;;  %v2605_v4 = vpop.f32.mrb[47].mxu1 }
 0x136   :  { %v2607_v5 = vmax.f32 %v1283_v40, %v1284_v52  ;;  %v1293_v7 = vrot.slane %v1292_v53, 2  ;;  %v1301_v13 = vmax.f32 %v1299_v54, %v1300_v31  ;;  %v1427_v19 = vrot.slane %v2599_v58, 2 }
 0x137   :  { %v1108_v20 = vrot.slane %v1107_v59, 1  ;;  %v1116_v24 = vmax.f32 %v1114_v45, %v1115_v60  ;;  %v1428_v18 = vrot.slane %v2599_v58, 3  ;;  %v1429_v27 = vrot.slane %v2599_v58, 4 }
 0x138   :  { %v1294_v2 = vmax.f32 %v1292_v53, %v1293_v7  ;;  %v1302_v23 = vrot.slane %v1301_v13, 4  ;;  %v1430_v33 = vrot.slane %v2599_v58, 5  ;;  %v1431_v25 = vrot.slane %v2599_v58, 6  ;;  %v2619_v34 = vpop.f32.mrb[48].mxu0  ;;  %v2621_v28 = vpop.f32.mrb[48].mxu1 }
 0x139   :  { %v1109_v26 = vmax.f32 %v1107_v59, %v1108_v20  ;;  %v1117_v14 = vrot.slane %v1116_v24, 2  ;;  %v1487_v36 = vadd.f32 %v2599_v58, %v2566_v10  ;;  %v1488_v39 = vadd.f32 %v1426_v0, %v2573_v42  ;;  %v2626_v40 = vpop.f32.mrb[49].mxu0  ;;  %v2628_v41 = vpop.f32.mrb[49].mxu1 }
 0x13a   :  { %v1295_v31 = vrot.slane %v1294_v2, 1  ;;  %v1303_v37 = vmax.f32 %v1301_v13, %v1302_v23  ;;  %v1489_v48 = vadd.f32 %v1427_v19, %v2583_v57  ;;  %v1490_v45 = vadd.f32 %v1428_v18, %v1087_v30 }
 0x13b   :  { %v1118_v38 = vmax.f32 %v1116_v24, %v1117_v14  ;;  %v1491_v52 = vadd.f32 %v1429_v27, %v1098_v50  ;;  %v1492_v53 = vadd.f32 %v1430_v33, %v1109_v26  ;;  %v1526_v54 = vadd.f32 %v2615_v29, %v1487_v36 }
 0x13c   :  { %v2632_v55 = vmax.f32 %v1294_v2, %v1295_v31  ;;  %v1304_v10 = vrot.slane %v1303_v37, 2  ;;  %v1527_v42 = vadd.f32 %v2615_v29, %v1488_v39  ;;  %v1528_v59 = vadd.f32 %v2615_v29, %v1489_v48 }
 0x13d   :  { %v1119_v60 = vrot.slane %v1118_v38, 1  ;;  %v1529_v0 = vadd.f32 %v2615_v29, %v1490_v45  ;;  %v1530_v7 = vadd.f32 %v2615_v29, %v1491_v52  ;;  %v1531_v57 = vadd.f32 %v2615_v29, %v1492_v53 }
 0x13e   :  { %v1305_v30 = vmax.f32 %v1303_v37, %v1304_v10  ;;  %v1603_v13 = vrot.slane %v1527_v42, 7  ;;  %v1605_v50 = vrot.slane %v1528_v59, 6  ;;  %v1122_v19 = vsel %vm955_vm4, %v706_v3, -inf }
 0x13f   :  { %v1120_v20 = vmax.f32 %v1118_v38, %v1119_v60  ;;  %v1607_v24 = vrot.slane %v1529_v0, 5  ;;  %v1609_v18 = vrot.slane %v1530_v7, 4  ;;  %v1611_v27 = vrot.slane %v1531_v57, 3 }
 0x140   :  { %v1306_v2 = vrot.slane %v1305_v30, 1  ;;  %v1604_v23 = vsel %vm1583_vm5, %v1603_v13, %v1526_v54  ;;  %v1123_v33 = vmax.f32 %v2592_v21, %v1122_v19  ;;  %v1432_v26 = vrot.slane %v2599_v58, 7 }
 0x141   :  { %v1493_v14 = vadd.f32 %v1431_v25, %v1120_v20  ;;  %v1606_v36 = vsel %vm1586_vm6, %v1605_v50, %v1604_v23  ;;  %v1419_v39 = vrot.slane %v2605_v4, 1  ;;  %v1420_v31 = vrot.slane %v2605_v4, 2 }
 0x142   :  { %v2646_v3 = vmax.f32 %v1305_v30, %v1306_v2  ;;  %v1125_v37 = vmax.f32 %v1123_v33, %v2602_v61  ;;  %v1608_v48 = vsel %vm1589_vm7, %v1607_v24, %v1606_v36  ;;  %v1421_v45 = vrot.slane %v2605_v4, 3 }
 0x143   :  { %v1532_v38 = vadd.f32 %v2615_v29, %v1493_v14  ;;  %v1610_v21 = vsel %vm1592_vm8, %v1609_v18, %v1608_v48  ;;  %v1422_v25 = vrot.slane %v2605_v4, 4  ;;  %v1423_v52 = vrot.slane %v2605_v4, 5 }
 0x144   :  { %v1126_v53 = vrot.slane %v1125_v37, 4  ;;  %v1612_v54 = vsel %vm1595_vm9, %v1611_v27, %v1610_v21  ;;  %v1424_v10 = vrot.slane %v2605_v4, 6  ;;  %v1425_v42 = vrot.slane %v2605_v4, 7 }
 0x145   :  { %v1613_v61 = vrot.slane %v1532_v38, 2  ;;  %v1479_v59 = vadd.f32 %v2605_v4, %v2495_v35  ;;  %v1480_v60 = vadd.f32 %v1419_v39, %v2502_v56  ;;  %v1481_v0 = vadd.f32 %v1420_v31, %v2510_v6 }
 0x146   :  { %v1127_v7 = vmax.f32 %v1125_v37, %v1126_v53  ;;  %v1482_v57 = vadd.f32 %v1421_v45, %v2522_v49  ;;  %v1483_v30 = vadd.f32 %v1422_v25, %v2530_v8  ;;  %v1484_v13 = vadd.f32 %v1423_v52, %v2540_v43 }
 0x147   :  { %v2666_v50 = vsel %vm1598_vm10, %v1613_v61, %v1612_v54  ;;  %v1485_v19 = vadd.f32 %v1424_v10, %v2550_v12  ;;  %v1486_v20 = vadd.f32 %v1425_v42, %v2554_v16  ;;  %v1518_v35 = vadd.f32 %v2615_v29, %v1479_v59 }
 0x148   :  { %v1128_v56 = vrot.slane %v1127_v7, 2  ;;  %v1519_v6 = vadd.f32 %v2615_v29, %v1480_v60  ;;  %v1520_v4 = vadd.f32 %v2615_v29, %v1481_v0  ;;  %v1521_v49 = vadd.f32 %v2615_v29, %v1482_v57 }
 0x149   :  { %v1522_v8 = vadd.f32 %v2615_v29, %v1483_v30  ;;  %v1523_v43 = vadd.f32 %v2615_v29, %v1484_v13  ;;  %v1524_v24 = vadd.f32 %v2615_v29, %v1485_v19  ;;  %v1525_v18 = vadd.f32 %v2615_v29, %v1486_v20 }
 0x14a   :  { %v1129_v12 = vmax.f32 %v1127_v7, %v1128_v56  ;;  %v1582_v27 = vrot.slane %v1519_v6, 7  ;;  %v1585_v16 = vrot.slane %v1520_v4, 6  ;;  %v1588_v2 = vrot.slane %v1521_v49, 5 }
 0x14b   :  { %v1591_v23 = vrot.slane %v1522_v8, 4  ;;  %v1594_v33 = vrot.slane %v1523_v43, 3  ;;  %v1597_v14 = vrot.slane %v1524_v24, 2  ;;  %v1600_v36 = vrot.slane %v1525_v18, 1 }
 0x14c   :  { %v1130_v39 = vrot.slane %v1129_v12, 1  ;;  %v1584_v31 = vsel %vm1583_vm5, %v1582_v27, %v1518_v35  ;;  %v1133_v37 = vsel %vm955_vm4, %v2619_v34, -inf  ;;  %v1440_v48 = vrot.slane %v2621_v28, 1 }
 0x14d   :  { %v1587_v45 = vsel %vm1586_vm6, %v1585_v16, %v1584_v31  ;;  %v1441_v38 = vrot.slane %v2621_v28, 2  ;;  %v1442_v21 = vrot.slane %v2621_v28, 3  ;;  %v1443_v25 = vrot.slane %v2621_v28, 4 }
 0x14e   :  { %v1131_v52 = vmax.f32 %v1129_v12, %v1130_v39  ;;  %v1590_v53 = vsel %vm1589_vm7, %v1588_v2, %v1587_v45  ;;  %v1444_v54 = vrot.slane %v2621_v28, 5  ;;  %v1445_v10 = vrot.slane %v2621_v28, 6 }
 0x14f   :  { %v1593_v42 = vsel %vm1592_vm8, %v1591_v23, %v1590_v53  ;;  %v1446_v34 = vrot.slane %v2621_v28, 7  ;;  %v1503_v61 = vadd.f32 %v2621_v28, %v2563_v1  ;;  %v1504_v59 = vadd.f32 %v1440_v48, %v2569_v22 }
 0x150   :  { %v1494_v60 = vadd.f32 %v1432_v26, %v1131_v52  ;;  %v1596_v0 = vsel %vm1595_vm9, %v1594_v33, %v1593_v42  ;;  %v1505_v7 = vadd.f32 %v1441_v38, %v2576_v32  ;;  %v1506_v57 = vadd.f32 %v1442_v21, %v2586_v15 }
 0x151   :  { %v1599_v30 = vsel %vm1598_vm10, %v1597_v14, %v1596_v0  ;;  %v1507_v13 = vadd.f32 %v1443_v25, %v2596_v47  ;;  %v1508_v19 = vadd.f32 %v1444_v54, %v2607_v5  ;;  %v1509_v20 = vadd.f32 %v1445_v10, %v2632_v55 }
 0x152   :  { %v1533_v1 = vadd.f32 %v2615_v29, %v1494_v60  ;;  %v1602_v22 = vsel %vm1601_vm11, %v1600_v36, %v1599_v30  ;;  %v1510_v58 = vadd.f32 %v1446_v34, %v2646_v3  ;;  %v1542_v28 = vadd.f32 %v2615_v29, %v1503_v61 }
 0x153   :  { %1649 = vst.msk [vmem:[%s2777_s5] sm:$0xff] %vm955_vm4, %v1602_v22  ;;  %v1543_v32 = vadd.f32 %v2615_v29, %v1504_v59  ;;  %v1544_v15 = vadd.f32 %v2615_v29, %v1505_v7  ;;  %v1545_v47 = vadd.f32 %v2615_v29, %v1506_v57  ;;  %v1546_v5 = vadd.f32 %v2615_v29, %v1507_v13 }
 0x154   :  { %v1615_v55 = vrot.slane %v1533_v1, 1  ;;  %v1547_v26 = vadd.f32 %v2615_v29, %v1508_v19  ;;  %v1548_v3 = vadd.f32 %v2615_v29, %v1509_v20  ;;  %v1549_v35 = vadd.f32 %v2615_v29, %v1510_v58 }
 0x155   :  { %v1631_v56 = vrot.slane %v1543_v32, 7  ;;  %v1633_v6 = vrot.slane %v1544_v15, 6  ;;  %v1635_v4 = vrot.slane %v1545_v47, 5  ;;  %v1637_v49 = vrot.slane %v1546_v5, 4 }
 0x156   :  { %v1616_v8 = vsel %vm1601_vm11, %v1615_v55, %v2666_v50  ;;  %v1639_v43 = vrot.slane %v1547_v26, 3  ;;  %v1641_v24 = vrot.slane %v1548_v3, 2  ;;  %v1643_v18 = vrot.slane %v1549_v35, 1 }
 0x157   :  { %1650 = vst.msk [vmem:[%s2777_s5 + $0x8] sm:$0xff] %vm955_vm4, %v1616_v8  ;;  %v1632_v12 = vsel %vm1583_vm5, %v1631_v56, %v1542_v28  ;;  %v1132_v27 = vsel %vm955_vm4, %v2626_v40, -inf  ;;  %v1433_v16 = vrot.slane %v2628_v41, 1  ;;  %v1434_v2 = vrot.slane %v2628_v41, 2 }
 0x158   :  { %v1634_v23 = vsel %vm1586_vm6, %v1633_v6, %v1632_v12  ;;  %v1134_v50 = vmax.f32 %v1132_v27, %v1133_v37  ;;  %v1435_v33 = vrot.slane %v2628_v41, 3  ;;  %v1436_v14 = vrot.slane %v2628_v41, 4 }
 0x159   :  { %v1636_v36 = vsel %vm1589_vm7, %v1635_v4, %v1634_v23  ;;  %v1437_v39 = vrot.slane %v2628_v41, 5  ;;  %v1438_v31 = vrot.slane %v2628_v41, 6  ;;  %v1439_v48 = vrot.slane %v2628_v41, 7 }
 0x15a   :  { %v1638_v40 = vsel %vm1592_vm8, %v1637_v49, %v1636_v36  ;;  %v1136_v45 = vmax.f32 %v1134_v50, %v2488_v11  ;;  %v1496_v38 = vadd.f32 %v1433_v16, %v2499_v46  ;;  %v1497_v37 = vadd.f32 %v1434_v2, %v2505_v62 }
 0x15b   :  { %v1640_v21 = vsel %vm1595_vm9, %v1639_v43, %v1638_v40  ;;  %v1498_v25 = vadd.f32 %v1435_v33, %v2519_v44  ;;  %v1499_v52 = vadd.f32 %v1436_v14, %v2525_v51  ;;  %v1500_v53 = vadd.f32 %v1437_v39, %v2532_v9 }
 0x15c   :  { %v1642_v54 = vsel %vm1598_vm10, %v1641_v24, %v1640_v21  ;;  %v1137_v10 = vrot.slane %v1136_v45, 4  ;;  %v1501_v42 = vadd.f32 %v1438_v31, %v2545_v63  ;;  %v1502_v34 = vadd.f32 %v1439_v48, %v2552_v17 }
 0x15d   :  { %v1644_v11 = vsel %vm1601_vm11, %v1643_v18, %v1642_v54  ;;  %v1535_v9 = vadd.f32 %v2615_v29, %v1496_v38  ;;  %v1536_v59 = vadd.f32 %v2615_v29, %v1497_v37  ;;  %v1537_v17 = vadd.f32 %v2615_v29, %v1498_v25 }
 0x15e   :  { %1652 = vst.msk [vmem:[%s2777_s5 + $0x18] sm:$0xff] %vm955_vm4, %v1644_v11  ;;  %v1138_v46 = vmax.f32 %v1136_v45, %v1137_v10  ;;  %v1538_v60 = vadd.f32 %v2615_v29, %v1499_v52  ;;  %v1539_v7 = vadd.f32 %v2615_v29, %v1500_v53  ;;  %v1540_v30 = vadd.f32 %v2615_v29, %v1501_v42 }
 0x15f   :  { %v1617_v57 = vrot.slane %v1535_v9, 7  ;;  %v1619_v13 = vrot.slane %v1536_v59, 6  ;;  %v1541_v19 = vadd.f32 %v2615_v29, %v1502_v34  ;;  %v1621_v1 = vrot.slane %v1537_v17, 5 }
 0x160   :  { %v1139_v62 = vrot.slane %v1138_v46, 2  ;;  %v1625_v28 = vrot.slane %v1539_v7, 3  ;;  %v1627_v15 = vrot.slane %v1540_v30, 2 }
 0x161   :  { %v1629_v5 = vrot.slane %v1541_v19, 1 }
 0x162   :  { %v1140_v44 = vmax.f32 %v1138_v46, %v1139_v62 }
 0x164   :  { %v1141_v51 = vrot.slane %v1140_v44, 1 }
 0x166   :  { %v1142_v61 = vmax.f32 %v1140_v44, %v1141_v51 }
 0x168   :  { %v1495_v63 = vadd.f32 %v2628_v41, %v1142_v61  ;;  %v1623_v41 = vrot.slane %v1538_v60, 4 }
 0x16a   :  { %v1534_v0 = vadd.f32 %v2615_v29, %v1495_v63 }
 0x16c   :  { %v1618_v20 = vsel %vm1583_vm5, %v1617_v57, %v1534_v0 }
 0x16d   :  { %v1620_v22 = vsel %vm1586_vm6, %v1619_v13, %v1618_v20 }
 0x16e   :  { %v1622_v58 = vsel %vm1589_vm7, %v1621_v1, %v1620_v22 }
 0x16f   :  { %v1624_v32 = vsel %vm1592_vm8, %v1623_v41, %v1622_v58 }
 0x170   :  { %v1626_v47 = vsel %vm1595_vm9, %v1625_v28, %v1624_v32 }
 0x171   :  { %v1628_v55 = vsel %vm1598_vm10, %v1627_v15, %v1626_v47 }
 0x172   :  { %v1630_v26 = vsel %vm1601_vm11, %v1629_v5, %v1628_v55 }
 0x173   :  { %1651 = vst.msk [vmem:[%s2777_s5 + $0x10] sm:$0xff] %vm955_vm4, %v1630_v26 }

// kernel: p4transformer_forward.3
= control target key start
LH: loop header
LB: loop body
LE: loop exit
PB: predicated region body
PF: predicated region fallthrough
CT: control target
= control target key end

     0   :  { %vm65_vm0 = vcmask 261120   ;;  %vm246_vm1 = vcmask 64512   ;;  %s4285_s21 = smov 112   ;;  %vm423_vm3 = vcmask 130048   ;;  %s4286_s22 = smov 96   ;;  %vm1481_vm8 = vcmask 523264   ;;  %s5058_s0 = inlined_call_operand.vmem [shape: f32[2,16,32], index: 0, kind: input, shape index: {}]   ;;  %s5059_s3 = inlined_call_operand.vmem [shape: f32[2,32,48], index: 3, kind: input, shape index: {}]   ;;  %s5060_s1 = inlined_call_operand.vmem [shape: f32[2,1,32], index: 1, kind: input, shape index: {}]   ;;  %s5061_s2 = inlined_call_operand.vmem [shape: f32[2,1,32], index: 2, kind: input, shape index: {}]   ;;  %s5062_s4 = inlined_call_operand.vmem [shape: f32[2,16,32], index: 4, kind: input, shape index: {}]   ;;  %s5063_s5 = inlined_call_operand.vmem [shape: f32[2,1,32], index: 5, kind: input, shape index: {}]   ;;  %s5064_s8 = inlined_call_operand.vmem [shape: f32[2,32,64], index: 8, kind: input, shape index: {}]   ;;  %s5065_s6 = inlined_call_operand.vmem [shape: f32[2,1,32], index: 6, kind: input, shape index: {}]   ;;  %s5066_s7 = inlined_call_operand.vmem [shape: f32[2,1,32], index: 7, kind: input, shape index: {}]   ;;  %s5067_s10 = inlined_call_operand.vmem [shape: f32[2,64,32], index: 10, kind: input, shape index: {}]   ;;  %s5068_s9 = inlined_call_operand.vmem [shape: f32[2,1,64], index: 9, kind: input, shape index: {}]   ;;  %s5069_s11 = inlined_call_operand.vmem [shape: f32[2,1,32], index: 11, kind: input, shape index: {}]   ;;  %s5070_s14 = inlined_call_operand.vmem [shape: f32[32,64], index: 14, kind: input, shape index: {}]   ;;  %s5071_s16 = inlined_call_operand.vmem [shape: f32[64,51], index: 16, kind: input, shape index: {}]   ;;  %s5072_s12 = inlined_call_operand.vmem [shape: f32[1,32], index: 12, kind: input, shape index: {}]   ;;  %s5073_s13 = inlined_call_operand.vmem [shape: f32[1,32], index: 13, kind: input, shape index: {}]   ;;  %s5074_s15 = inlined_call_operand.vmem [shape: f32[1,64], index: 15, kind: input, shape index: {}]   ;;  %s5075_s17 = inlined_call_operand.vmem [shape: f32[1,51], index: 17, kind: input, shape index: {}]   ;;  %s5076_s18 = inlined_call_operand.vmem [shape: f32[2,51], index: 18, kind: output, shape index: {}]  }
   0x1   :  { %5082 = sst [smem:[#allocation2_spill]] %s5058_s0  ;;  %v3363_v49 = vld [vmem:[%s5061_s2] ss:$0 sm:$0xff]  ;;  %vm4474_vm2 = vmpackc.low %vm246_vm1, %vm246_vm1  ;;  %s4288_s24 = smov 120   ;;  %vm3131_vm13 = vcmask 1041409   ;;  %vm3134_vm14 = vcmask 254976  }
   0x2   :  { %5083 = sst [smem:[#allocation3_spill]] %s5059_s3  ;;  %s5085_s29 = sld [smem:[#allocation2_spill]]  ;;  %vm4293_vm15 = vmmov 0  }
   0x3   :  { %5084 = sst [smem:[#allocation4_spill]] %s5060_s1  ;;  %s5086_s23 = sld [smem:[#allocation3_spill]] }
   0x4   :  { %s5087_s19 = sld [smem:[#allocation4_spill]]  ;;  %s4287_s1 = smov 104  }
   0x5   :  { %s4289_s25 = smov 88   ;;  %s5080_s30 = smov 8  }
   0x8   :  { %v4393_v0 = vld [vmem:[%s5085_s29] sm:$0xff]  ;;  %v4398_v1 = vld [vmem:[%s5085_s29 + $0x10] sm:$0xff]  ;;  %v4403_v2 = vld [vmem:[%s5085_s29 + $0x8] sm:$0xff] }
   0x9   :  { %v66_v3 = vsel %vm65_vm0, %v4393_v0, 0.0  ;;  %v72_v4 = vsel %vm65_vm0, %v4398_v1, 0.0  ;;  %v4412_v5 = vld [vmem:[%s5085_s29 + $0x18] sm:$0xff]  ;;  %v69_v6 = vsel %vm65_vm0, %v4403_v2, 0.0  ;;  %v139_v28 = vld [vmem:[%s5086_s23] sm:$0xff]  ;;  %v140_v29 = vld [vmem:[%s5086_s23 + $0x8] sm:$0xff] }
   0xa   :  { %67 = vadd.xlane.f32.xlu0 %v66_v3  ;;  %73 = vadd.xlane.f32.xlu1 %v72_v4  ;;  %v75_v7 = vsel %vm65_vm0, %v4412_v5, 0.0  ;;  %v141_v30 = vld [vmem:[%s5086_s23 + $0x10] sm:$0xff]  ;;  %v3895_v31 = vpack.c.bf16 %v140_v29, %v139_v28  ;;  %v142_v32 = vld [vmem:[%s5086_s23 + $0x18] sm:$0xff]  ;;  %v3362_v47 = vld [vmem:[%s5087_s19] ss:$0 sm:$0xff] }
   0xb   :  { %v3899_v33 = vpack.c.bf16 %v142_v32, %v141_v30 }
   0xc   :  { %3896 = vmatprep.subr.bf16.mxu0 %v3895_v31 }
   0xd   :  { %3898 = vmatpush3.bf16.msra.mxu0 %v3895_v31 }
   0xe   :  { %70 = vadd.xlane.f32.xlu0 %v69_v6  ;;  %76 = vadd.xlane.f32.xlu1 %v75_v7 }
   0xf   :  { %3900 = vmatprep.subr.bf16.mxu0 %v3899_v33 }
  0x11   :  { %3902 = vmatpush3.bf16.msra.mxu0 %v3899_v33 }
  0x97   :  { %v68_v8 = vpop.xlane.xlu0 %67  ;;  %v74_v9 = vpop.xlane.xlu1 %73 }
  0x98   :  { %v79_v10 = vmul.f32 0.03125, %v68_v8  ;;  %v81_v11 = vmul.f32 0.03125, %v74_v9 }
  0x9a   :  { %v83_v12 = vsub.f32 %v4393_v0, %v79_v10  ;;  %v85_v13 = vsub.f32 %v4398_v1, %v81_v11 }
  0x9b   :  { %v71_v14 = vpop.xlane.xlu0 %70  ;;  %v77_v15 = vpop.xlane.xlu1 %76 }
  0x9c   :  { %v80_v16 = vmul.f32 0.03125, %v71_v14  ;;  %v82_v17 = vmul.f32 0.03125, %v77_v15  ;;  %v87_v18 = vmul.f32 %v83_v12, %v83_v12  ;;  %v89_v19 = vmul.f32 %v85_v13, %v85_v13 }
  0x9e   :  { %v84_v20 = vsub.f32 %v4403_v2, %v80_v16  ;;  %v86_v21 = vsub.f32 %v4412_v5, %v82_v17  ;;  %v91_v22 = vsel %vm65_vm0, %v87_v18, 0.0  ;;  %v97_v23 = vsel %vm65_vm0, %v89_v19, 0.0 }
  0x9f   :  { %92 = vadd.xlane.f32.xlu0 %v91_v22 }
  0xa0   :  { %v88_v24 = vmul.f32 %v84_v20, %v84_v20  ;;  %v90_v25 = vmul.f32 %v86_v21, %v86_v21 }
  0xa2   :  { %v94_v26 = vsel %vm65_vm0, %v88_v24, 0.0  ;;  %v100_v27 = vsel %vm65_vm0, %v90_v25, 0.0 }
  0xa3   :  { %98 = vadd.xlane.f32.xlu0 %v97_v23  ;;  %95 = vadd.xlane.f32.xlu1 %v94_v26 }
  0xa7   :  { %101 = vadd.xlane.f32.xlu1 %v100_v27 }
 0x12c   :  { %v93_v34 = vpop.xlane.xlu0 %92 }
 0x12d   :  { %v103_v35 = vmul.f32 0.03125, %v93_v34 }
 0x12f   :  { %v107_v36 = vadd.f32 1e-05, %v103_v35 }
 0x130   :  { %v96_v37 = vpop.xlane.xlu1 %95  ;;  %v99_v38 = vpop.xlane.xlu0 %98 }
 0x131   :  { %4155 = vrsqrt.f32 %v107_v36  ;;  %v104_v39 = vmul.f32 0.03125, %v96_v37  ;;  %v105_v40 = vmul.f32 0.03125, %v99_v38 }
 0x133   :  { %v108_v41 = vadd.f32 1e-05, %v104_v39  ;;  %v109_v42 = vadd.f32 1e-05, %v105_v40 }
 0x134   :  { %v102_v43 = vpop.xlane.xlu1 %101 }
 0x135   :  { %4157 = vrsqrt.f32 %v108_v41  ;;  %v106_v44 = vmul.f32 0.03125, %v102_v43 }
 0x136   :  { %4159 = vrsqrt.f32 %v109_v42 }
 0x137   :  { %v110_v45 = vadd.f32 1e-05, %v106_v44 }
 0x139   :  { %4161 = vrsqrt.f32 %v110_v45 }
 0x13b   :  { %v4156_v46 = vpop.eup %4155 }
 0x13c   :  { %v115_v48 = vmul.f32 %v4156_v46, %v83_v12 }
 0x13e   :  { %v125_v50 = vmul.f32 %v3362_v47, %v115_v48 }
 0x13f   :  { %v4158_v51 = vpop.eup %4157 }
 0x140   :  { %v4160_v52 = vpop.eup %4159  ;;  %v135_v53 = vadd.f32 %v3363_v49, %v125_v50  ;;  %v116_v54 = vmul.f32 %v4158_v51, %v84_v20 }
 0x141   :  { %v117_v55 = vmul.f32 %v4160_v52, %v85_v13 }
 0x142   :  { %3641 = vmatprep.mubr.msk.f32.mxu0 %vm65_vm0, %v135_v53  ;;  %v126_v56 = vmul.f32 %v3362_v47, %v116_v54 }
 0x143   :  { %v4162_v57 = vpop.eup %4161  ;;  %v127_v58 = vmul.f32 %v3362_v47, %v117_v55 }
 0x144   :  { %v136_v59 = vadd.f32 %v3363_v49, %v126_v56  ;;  %v118_v60 = vmul.f32 %v4162_v57, %v86_v21 }
 0x145   :  { %v137_v61 = vadd.f32 %v3363_v49, %v127_v58 }
 0x146   :  { %3642 = vmatmul.mubr.msk.f32.vlgmr.msra.gmra.mrb[0].mxu0 %vm65_vm0, %v136_v59  ;;  %v128_v62 = vmul.f32 %v3362_v47, %v118_v60 }
 0x147   :  { %3644 = vmatprep.mubr.msk.f32.mxu0 %vm65_vm0, %v137_v61 }
 0x148   :  { %v138_v63 = vadd.f32 %v3363_v49, %v128_v62 }
 0x14a   :  { %3645 = vmatmul.mubr.msk.f32.gmra.mrb[2].mxu0 %vm65_vm0, %v138_v63 }
 0x219   :  { %v4448_v3 = vpop.f32.mrb[0].mxu0 }
 0x21a   :  { %v4450_v4 = vpop.f32.mrb[1].mxu0 }
 0x21b   :  { %3651 = vmatprep.mubr.msk.f32.mxu1 %vm246_vm1, %v4450_v4  ;;  %v4456_v6 = vpack.i.bf16 %v4448_v3, %v4450_v4 }
 0x21d   :  { %4076 = vrot.lane.b32.xlu0 %v4456_v6, %s4285_s21  ;;  %v4460_v7 = vpop.f32.mrb[2].mxu0 }
 0x21e   :  { %v4462_v8 = vpop.f32.mrb[3].mxu0 }
 0x21f   :  { %3658 = vmatprep.mubr.msk.f32.mxu0 %vm246_vm1, %v4462_v8  ;;  %v4468_v9 = vpack.i.bf16 %v4460_v7, %v4462_v8 }
 0x221   :  { %4081 = vrot.lane.b32.xlu1 %v4468_v9, %s4285_s21 }
 0x28f   :  { %v4077_v10 = vpop.permute.xlu0 %4076 }
 0x290   :  { %v4079_v11 = vunpack.i.h.bf16 %v4077_v10  ;;  %v4078_v12 = vunpack.i.l.bf16 %v4077_v10 }
 0x292   :  { %v3903_v14 = vpack.c.bf16 %v4079_v11, %v4078_v12 }
 0x293   :  { %v4082_v15 = vpop.permute.xlu1 %4081 }
 0x294   :  { %v4084_v16 = vunpack.i.h.bf16 %v4082_v15  ;;  %v4083_v17 = vunpack.i.l.bf16 %v4082_v15  ;;  %3905 = vmatprep.subr.msk.bf16.mxu1 %vm4474_vm2, %v3903_v14 }
 0x295   :  { %3908 = vmatpush3.bf16.xpose.msk.msra.mxu1 %vm4474_vm2, %v3903_v14 }
 0x296   :  { %v3909_v18 = vpack.c.bf16 %v4084_v16, %v4083_v17 }
 0x298   :  { %3911 = vmatprep.subr.msk.bf16.mxu0 %vm4474_vm2, %v3909_v18 }
 0x299   :  { %3914 = vmatpush3.bf16.xpose.msk.msra.mxu0 %vm4474_vm2, %v3909_v18 }
 0x29c   :  { %3652 = vmatmul.mubr.msk.f32.vlgmr.msra.gmra.mrb[0].mxu1 %vm246_vm1, %v4448_v3 }
 0x2a0   :  { %3659 = vmatmul.mubr.msk.f32.vlgmr.msra.gmra.mrb[4].mxu0 %vm246_vm1, %v4460_v7 }
 0x36f   :  { %v3653_v19 = vpop.f32.mrb[0].mxu1 }
 0x370   :  { %v420_v20 = vmul.f32 0.35355338, %v3653_v19  ;;  %v321_v21 = vpop.f32.mrb[1].mxu1 }
 0x371   :  { %v419_v22 = vmul.f32 0.35355338, %v321_v21 }
 0x372   :  { %v427_v23 = vsel %vm423_vm3, %v420_v20, -inf }
 0x373   :  { %v3660_v24 = vpop.f32.mrb[4].mxu0  ;;  %428 = vmax.xlane.f32.xlu0 %v427_v23  ;;  %v424_v25 = vsel %vm423_vm3, %v419_v22, -inf }
 0x374   :  { %v422_v26 = vmul.f32 0.35355338, %v3660_v24  ;;  %v410_v27 = vpop.f32.mrb[5].mxu0  ;;  %425 = vmax.xlane.f32.xlu1 %v424_v25 }
 0x375   :  { %v421_v28 = vmul.f32 0.35355338, %v410_v27 }
 0x376   :  { %v433_v29 = vsel %vm423_vm3, %v422_v26, -inf }
 0x377   :  { %v430_v30 = vsel %vm423_vm3, %v421_v28, -inf }
 0x378   :  { %431 = vmax.xlane.f32.xlu0 %v430_v30  ;;  %434 = vmax.xlane.f32.xlu1 %v433_v29 }
 0x400   :  { %v429_v31 = vpop.xlane.xlu0 %428 }
 0x401   :  { %v437_v32 = vsub.f32 %v420_v20, %v429_v31  ;;  %v426_v33 = vpop.xlane.xlu1 %425 }
 0x402   :  { %v436_v34 = vsub.f32 %v419_v22, %v426_v33 }
 0x403   :  { %v442_v35 = vmul.f32 1.442695, %v437_v32 }
 0x404   :  { %v440_v36 = vmul.f32 1.442695, %v436_v34 }
 0x405   :  { %4163 = vpow2.f32 %v442_v35  ;;  %v432_v41 = vpop.xlane.xlu0 %431  ;;  %v435_v44 = vpop.xlane.xlu1 %434 }
 0x406   :  { %4165 = vpow2.f32 %v440_v36  ;;  %v438_v42 = vsub.f32 %v421_v28, %v432_v41  ;;  %v439_v45 = vsub.f32 %v422_v26, %v435_v44 }
 0x408   :  { %v444_v43 = vmul.f32 1.442695, %v438_v42  ;;  %v446_v46 = vmul.f32 1.442695, %v439_v45 }
 0x40a   :  { %4167 = vpow2.f32 %v444_v43 }
 0x40b   :  { %4169 = vpow2.f32 %v446_v46 }
 0x40f   :  { %v4164_v37 = vpop.eup %4163 }
 0x410   :  { %v4166_v38 = vpop.eup %4165  ;;  %v451_v39 = vsel %vm423_vm3, %v4164_v37, 0.0 }
 0x411   :  { %452 = vadd.xlane.f32.xlu1 %v451_v39  ;;  %v448_v40 = vsel %vm423_vm3, %v4166_v38, 0.0 }
 0x412   :  { %449 = vadd.xlane.f32.xlu0 %v448_v40 }
 0x414   :  { %v4168_v47 = vpop.eup %4167 }
 0x415   :  { %v454_v48 = vsel %vm423_vm3, %v4168_v47, 0.0  ;;  %v4170_v49 = vpop.eup %4169 }
 0x416   :  { %v457_v50 = vsel %vm423_vm3, %v4170_v49, 0.0 }
 0x422   :  { %4091 = vrot.lane.b32.xlu1 %v4468_v9, %s4286_s22 }
 0x426   :  { %4096 = vrot.lane.b32.xlu1 %v4456_v6, %s4287_s1 }
 0x428   :  { %4086 = vrot.lane.b32.xlu0 %v4456_v6, %s4286_s22 }
 0x42a   :  { %4101 = vrot.lane.b32.xlu1 %v4468_v9, %s4287_s1 }
 0x447   :  { %455 = vadd.xlane.f32.xlu0 %v454_v48 }
 0x44e   :  { %458 = vadd.xlane.f32.xlu1 %v457_v50 }
 0x45d   :  { %642 = vrot.lane.b32.xlu0 %v4450_v4, %s4288_s24 }
 0x45f   :  { %644 = vrot.lane.b32.xlu1 %v4448_v3, %s4288_s24 }
 0x461   :  { %733 = vrot.lane.b32.xlu0 %v4462_v8, %s4288_s24 }
 0x463   :  { %735 = vrot.lane.b32.xlu1 %v4460_v7, %s4288_s24 }
 0x49e   :  { %v453_v51 = vpop.xlane.xlu1 %452 }
 0x49f   :  { %4171 = vrcp.f32 %v453_v51  ;;  %v450_v52 = vpop.xlane.xlu0 %449 }
 0x4a0   :  { %4173 = vrcp.f32 %v450_v52 }
 0x4a2   :  { %v4092_v53 = vpop.permute.xlu1 %4091 }
 0x4a3   :  { %v4087_v54 = vpop.permute.xlu0 %4086  ;;  %v4094_v55 = vunpack.i.h.bf16 %v4092_v53  ;;  %v4093_v56 = vunpack.i.l.bf16 %v4092_v53 }
 0x4a4   :  { %v4089_v57 = vunpack.i.h.bf16 %v4087_v54  ;;  %v4088_v58 = vunpack.i.l.bf16 %v4087_v54 }
 0x4a5   :  { %v3919_v63 = vpack.c.bf16 %v4094_v55, %v4093_v56 }
 0x4a6   :  { %v3915_v59 = vpack.c.bf16 %v4089_v57, %v4088_v58  ;;  %v4097_v60 = vpop.permute.xlu1 %4096 }
 0x4a7   :  { %v4099_v61 = vunpack.i.h.bf16 %v4097_v60  ;;  %v4098_v62 = vunpack.i.l.bf16 %v4097_v60 }
 0x4a8   :  { %3916 = vmatprep.subr.bf16.mxu1 %v3915_v59 }
 0x4a9   :  { %v4172_v3 = vpop.eup %4171  ;;  %v3923_v4 = vpack.c.bf16 %v4099_v61, %v4098_v62  ;;  %3918 = vmatpush3.bf16.msra.mxu1 %v3915_v59 }
 0x4aa   :  { %v4174_v7 = vpop.eup %4173  ;;  %v4102_v8 = vpop.permute.xlu1 %4101  ;;  %3920 = vmatprep.subr.bf16.mxu1 %v3919_v63  ;;  %v465_v14 = vmul.f32 %v4172_v3, %v4164_v37 }
 0x4ab   :  { %v4104_v10 = vunpack.i.h.bf16 %v4102_v8  ;;  %v4103_v11 = vunpack.i.l.bf16 %v4102_v8  ;;  %3925 = vmatprep.subr.msk.bf16.mxu0 %vm4474_vm2, %v3923_v4  ;;  %v464_v12 = vmul.f32 %v4174_v7, %v4166_v38 }
 0x4ac   :  { %3928 = vmatpush3.bf16.xpose.msk.msra.mxu0 %vm4474_vm2, %v3923_v4 }
 0x4ad   :  { %v3929_v15 = vpack.c.bf16 %v4104_v10, %v4103_v11  ;;  %3665 = vmatprep.mubr.msk.f32.mxu1 %vm423_vm3, %v464_v12 }
 0x4ae   :  { %3666 = vmatmul.mubr.msk.f32.vlgmr.msra.gmra.mrb[2].mxu1 %vm423_vm3, %v465_v14 }
 0x4af   :  { %3922 = vmatpush3.bf16.msra.mxu1 %v3919_v63 }
 0x4b0   :  { %3931 = vmatprep.subr.msk.bf16.mxu1 %vm4474_vm2, %v3929_v15 }
 0x4d4   :  { %v456_v16 = vpop.xlane.xlu0 %455 }
 0x4d5   :  { %4175 = vrcp.f32 %v456_v16 }
 0x4d8   :  { %v643_v17 = vpop.permute.xlu0 %642 }
 0x4d9   :  { %3679 = vmatprep.mubr.msk.f32.mxu0 %vm246_vm1, %v643_v17 }
 0x4db   :  { %v459_v18 = vpop.xlane.xlu1 %458 }
 0x4dc   :  { %4177 = vrcp.f32 %v459_v18  ;;  %v734_v24 = vpop.permute.xlu0 %733 }
 0x4df   :  { %v4176_v19 = vpop.eup %4175  ;;  %v645_v20 = vpop.permute.xlu1 %644 }
 0x4e0   :  { %3680 = vmatmul.mubr.msk.f32.vlgmr.msra.gmra.mrb[6].mxu0 %vm246_vm1, %v645_v20  ;;  %v466_v21 = vmul.f32 %v4176_v19, %v4168_v47 }
 0x4e2   :  { %3672 = vmatprep.mubr.msk.f32.mxu1 %vm423_vm3, %v466_v21 }
 0x4e3   :  { %v736_v25 = vpop.permute.xlu1 %735 }
 0x4e6   :  { %v4178_v22 = vpop.eup %4177 }
 0x4e7   :  { %v467_v23 = vmul.f32 %v4178_v22, %v4170_v49 }
 0x4e9   :  { %3673 = vmatmul.mubr.msk.f32.vlgmr.msra.gmra.mrb[4].mxu1 %vm423_vm3, %v467_v23  ;;  %v1066_v23 = vld [vmem:[%s5062_s4] sm:$0xff] }
 0x4ea   :  { %3934 = vmatpush3.bf16.xpose.msk.msra.mxu1 %vm4474_vm2, %v3929_v15  ;;  %3686 = vmatprep.mubr.msk.f32.mxu1 %vm246_vm1, %v734_v24  ;;  %v1067_v24 = vld [vmem:[%s5062_s4 + $0x8] sm:$0xff] }
 0x4f1   :  { %3687 = vmatmul.mubr.msk.f32.vlgmr.msra.gmra.mrb[6].mxu1 %vm246_vm1, %v736_v25  ;;  %v3943_v25 = vpack.c.bf16 %v1067_v24, %v1066_v23 }
 0x581   :  { %v4530_v26 = vpop.f32.mrb[2].mxu1 }
 0x582   :  { %v4532_v27 = vpop.f32.mrb[3].mxu1 }
 0x5b3   :  { %v3681_v28 = vpop.f32.mrb[6].mxu0 }
 0x5b4   :  { %v825_v29 = vmul.f32 0.35355338, %v3681_v28  ;;  %v724_v30 = vpop.f32.mrb[7].mxu0 }
 0x5b5   :  { %v824_v31 = vmul.f32 0.35355338, %v724_v30 }
 0x5b6   :  { %v831_v32 = vsel %vm423_vm3, %v825_v29, -inf }
 0x5b7   :  { %832 = vmax.xlane.f32.xlu1 %v831_v32  ;;  %v828_v33 = vsel %vm423_vm3, %v824_v31, -inf }
 0x5b8   :  { %829 = vmax.xlane.f32.xlu0 %v828_v33 }
 0x5bc   :  { %v4536_v34 = vpop.f32.mrb[4].mxu1 }
 0x5bd   :  { %v4538_v35 = vpop.f32.mrb[5].mxu1 }
 0x5c4   :  { %v3688_v36 = vpop.f32.mrb[6].mxu1 }
 0x5c5   :  { %v815_v37 = vpop.f32.mrb[7].mxu1  ;;  %v827_v39 = vmul.f32 0.35355338, %v3688_v36 }
 0x5c6   :  { %v826_v38 = vmul.f32 0.35355338, %v815_v37 }
 0x5c7   :  { %v837_v41 = vsel %vm423_vm3, %v827_v39, -inf }
 0x5c8   :  { %v834_v40 = vsel %vm423_vm3, %v826_v38, -inf }
 0x5c9   :  { %835 = vmax.xlane.f32.xlu0 %v834_v40 }
 0x5cd   :  { %838 = vmax.xlane.f32.xlu0 %v837_v41 }
 0x644   :  { %v833_v42 = vpop.xlane.xlu1 %832 }
 0x645   :  { %v841_v43 = vsub.f32 %v825_v29, %v833_v42  ;;  %v830_v44 = vpop.xlane.xlu0 %829 }
 0x646   :  { %v840_v45 = vsub.f32 %v824_v31, %v830_v44 }
 0x647   :  { %v846_v46 = vmul.f32 1.442695, %v841_v43 }
 0x648   :  { %v844_v47 = vmul.f32 1.442695, %v840_v45 }
 0x649   :  { %4179 = vpow2.f32 %v846_v46 }
 0x64a   :  { %4181 = vpow2.f32 %v844_v47 }
 0x653   :  { %v4180_v48 = vpop.eup %4179 }
 0x654   :  { %v4182_v49 = vpop.eup %4181  ;;  %v855_v50 = vsel %vm423_vm3, %v4180_v48, 0.0 }
 0x655   :  { %856 = vadd.xlane.f32.xlu1 %v855_v50  ;;  %v852_v51 = vsel %vm423_vm3, %v4182_v49, 0.0 }
 0x656   :  { %v836_v52 = vpop.xlane.xlu0 %835  ;;  %853 = vadd.xlane.f32.xlu0 %v852_v51 }
 0x657   :  { %v842_v53 = vsub.f32 %v826_v38, %v836_v52 }
 0x659   :  { %v848_v54 = vmul.f32 1.442695, %v842_v53 }
 0x65a   :  { %v839_v55 = vpop.xlane.xlu0 %838 }
 0x65b   :  { %4183 = vpow2.f32 %v848_v54  ;;  %v843_v56 = vsub.f32 %v827_v39, %v839_v55 }
 0x65d   :  { %v850_v57 = vmul.f32 1.442695, %v843_v56 }
 0x65f   :  { %4185 = vpow2.f32 %v850_v57 }
 0x665   :  { %v4184_v58 = vpop.eup %4183 }
 0x666   :  { %v858_v59 = vsel %vm423_vm3, %v4184_v58, 0.0 }
 0x667   :  { %859 = vadd.xlane.f32.xlu0 %v858_v59 }
 0x669   :  { %v4186_v60 = vpop.eup %4185 }
 0x66a   :  { %v861_v61 = vsel %vm423_vm3, %v4186_v60, 0.0 }
 0x66b   :  { %862 = vadd.xlane.f32.xlu1 %v861_v61 }
 0x67c   :  { %4111 = vrot.lane.b32.xlu1 %v4468_v9, %s4289_s25 }
 0x67d   :  { %4106 = vrot.lane.b32.xlu0 %v4456_v6, %s4289_s25 }
 0x6e2   :  { %v857_v3 = vpop.xlane.xlu1 %856 }
 0x6e3   :  { %v854_v62 = vpop.xlane.xlu0 %853 }
 0x6e4   :  { %4187 = vrcp.f32 %v854_v62 }
 0x6e5   :  { %4189 = vrcp.f32 %v857_v3 }
 0x6ee   :  { %v4188_v63 = vpop.eup %4187 }
 0x6ef   :  { %v868_v4 = vmul.f32 %v4188_v63, %v4182_v49  ;;  %v4190_v9 = vpop.eup %4189 }
 0x6f0   :  { %v869_v18 = vmul.f32 %v4190_v9, %v4180_v48  ;;  %v1251_v9 = vld [vmem:[%s5064_s8 + $0x8] sm:$0xff] }
 0x6f1   :  { %3693 = vmatprep.mubr.msk.f32.mxu0 %vm423_vm3, %v868_v4 }
 0x6f4   :  { %v860_v7 = vpop.xlane.xlu0 %859 }
 0x6f5   :  { %4191 = vrcp.f32 %v860_v7 }
 0x6f8   :  { %v863_v8 = vpop.xlane.xlu1 %862  ;;  %v4107_v10 = vpop.permute.xlu0 %4106 }
 0x6f9   :  { %4193 = vrcp.f32 %v863_v8  ;;  %v4109_v11 = vunpack.i.h.bf16 %v4107_v10  ;;  %v4108_v12 = vunpack.i.l.bf16 %v4107_v10 }
 0x6fb   :  { %v3935_v14 = vpack.c.bf16 %v4109_v11, %v4108_v12 }
 0x6fc   :  { %v4112_v15 = vpop.permute.xlu1 %4111 }
 0x6fd   :  { %v4114_v16 = vunpack.i.h.bf16 %v4112_v15  ;;  %v4113_v6 = vunpack.i.l.bf16 %v4112_v15  ;;  %3936 = vmatprep.subr.bf16.mxu0 %v3935_v14 }
 0x6fe   :  { %3938 = vmatpush3.bf16.msra.mxu0 %v3935_v14  ;;  %v1250_v14 = vld [vmem:[%s5064_s8] sm:$0xff] }
 0x6ff   :  { %v4192_v17 = vpop.eup %4191  ;;  %v3939_v19 = vpack.c.bf16 %v4114_v16, %v4113_v6  ;;  %3944 = vmatprep.subr.bf16.mxu0 %v3943_v25  ;;  %v3947_v15 = vpack.c.bf16 %v1251_v9, %v1250_v14  ;;  %v1252_v16 = vld [vmem:[%s5064_s8 + $0x10] sm:$0xff]  ;;  %v1253_v6 = vld [vmem:[%s5064_s8 + $0x18] sm:$0xff] }
 0x700   :  { %v870_v20 = vmul.f32 %v4192_v17, %v4184_v58  ;;  %v3951_v17 = vpack.c.bf16 %v1253_v6, %v1252_v16 }
 0x701   :  { %3694 = vmatmul.mubr.msk.f32.vlgmr.msra.gmra.mrb[8].mxu0 %vm423_vm3, %v869_v18  ;;  %3940 = vmatprep.subr.bf16.mxu1 %v3939_v19 }
 0x702   :  { %3942 = vmatpush3.bf16.msra.mxu1 %v3939_v19  ;;  %3700 = vmatprep.mubr.msk.f32.mxu1 %vm423_vm3, %v870_v20 }
 0x703   :  { %v4194_v21 = vpop.eup %4193  ;;  %3946 = vmatpush3.bf16.msra.mxu0 %v3943_v25  ;;  %3948 = vmatprep.subr.bf16.mxu1 %v3947_v15 }
 0x704   :  { %v871_v22 = vmul.f32 %v4194_v21, %v4186_v60 }
 0x706   :  { %3701 = vmatmul.mubr.msk.f32.vlgmr.msra.gmra.mrb[8].mxu1 %vm423_vm3, %v871_v22 }
 0x707   :  { %3950 = vmatpush3.bf16.msra.mxu1 %v3947_v15 }
 0x708   :  { %3952 = vmatprep.subr.bf16.mxu1 %v3951_v17 }
 0x70b   :  { %3954 = vmatpush3.bf16.msra.mxu1 %v3951_v17 }
 0x7d4   :  { %v3695_v28 = vpop.f32.mrb[8].mxu0 }
 0x7d5   :  { %v950_v29 = vpop.f32.mrb[9].mxu0 }
 0x7d6   :  { %1050 = vrot.lane.b32.xlu1 %v950_v29, %s5080_s30 }
 0x7d9   :  { %v3702_v30 = vpop.f32.mrb[8].mxu1 }
 0x7da   :  { %v1037_v31 = vpop.f32.mrb[9].mxu1  ;;  %1052 = vrot.lane.b32.xlu1 %v3695_v28, %s5080_s30 }
 0x7db   :  { %1054 = vrot.lane.b32.xlu0 %v1037_v31, %s5080_s30 }
 0x7de   :  { %1056 = vrot.lane.b32.xlu1 %v3702_v30, %s5080_s30 }
 0x848   :  { %v1051_v32 = vpop.permute.xlu1 %1050 }
 0x849   :  { %v1062_v33 = vsel %vm246_vm1, %v4532_v27, %v1051_v32  ;;  %v3392_v27 = vld [vmem:[%s5063_s5] ss:$0 sm:$0xff] }
 0x84a   :  { %3707 = vmatprep.mubr.msk.f32.mxu0 %vm423_vm3, %v1062_v33  ;;  %v3397_v33 = vld [vmem:[%s5065_s6] ss:$0 sm:$0xff] }
 0x84c   :  { %v1053_v36 = vpop.permute.xlu1 %1052 }
 0x84d   :  { %v1063_v37 = vsel %vm246_vm1, %v4530_v26, %v1053_v36  ;;  %v1055_v38 = vpop.permute.xlu0 %1054 }
 0x84e   :  { %v1064_v39 = vsel %vm246_vm1, %v4538_v35, %v1055_v38  ;;  %3708 = vmatmul.mubr.msk.f32.vlgmr.msra.gmra.mrb[10].mxu0 %vm423_vm3, %v1063_v37 }
 0x84f   :  { %3710 = vmatprep.mubr.msk.f32.mxu0 %vm423_vm3, %v1064_v39  ;;  %v3398_v39 = vld [vmem:[%s5066_s7] ss:$0 sm:$0xff] }
 0x850   :  { %v1057_v40 = vpop.permute.xlu1 %1056 }
 0x851   :  { %v1065_v41 = vsel %vm246_vm1, %v4536_v34, %v1057_v40 }
 0x852   :  { %3711 = vmatmul.mubr.msk.f32.gmra.mrb[12].mxu0 %vm423_vm3, %v1065_v41 }
 0x921   :  { %v3709_v42 = vpop.f32.mrb[10].mxu0 }
 0x922   :  { %v1159_v26 = vadd.f32 %v3709_v42, %v3392_v27  ;;  %v1153_v43 = vpop.f32.mrb[11].mxu0 }
 0x923   :  { %v1154_v44 = vadd.f32 %v3392_v27, %v1153_v43 }
 0x924   :  { %v4580_v35 = vadd.f32 %v1159_v26, %v4403_v2 }
 0x925   :  { %v4583_v45 = vadd.f32 %v1154_v44, %v4393_v0  ;;  %v3712_v46 = vpop.f32.mrb[12].mxu0 }
 0x926   :  { %v1163_v47 = vpop.f32.mrb[13].mxu0  ;;  %v1181_v34 = vsel %vm65_vm0, %v4580_v35, 0.0  ;;  %v1169_v48 = vadd.f32 %v3712_v46, %v3392_v27 }
 0x927   :  { %v1164_v49 = vadd.f32 %v3392_v27, %v1163_v47  ;;  %1182 = vadd.xlane.f32.xlu1 %v1181_v34  ;;  %v1178_v50 = vsel %vm65_vm0, %v4583_v45, 0.0 }
 0x928   :  { %1179 = vadd.xlane.f32.xlu0 %v1178_v50  ;;  %v4593_v2 = vadd.f32 %v1169_v48, %v4412_v5  ;;  %v1466_v50 = vld [vmem:[%s5067_s10] sm:$0xff] }
 0x929   :  { %v4590_v51 = vadd.f32 %v1164_v49, %v4398_v1 }
 0x92a   :  { %v1187_v52 = vsel %vm65_vm0, %v4593_v2, 0.0 }
 0x92b   :  { %v1184_v0 = vsel %vm65_vm0, %v4590_v51, 0.0 }
 0x92c   :  { %1185 = vadd.xlane.f32.xlu0 %v1184_v0  ;;  %v1467_v0 = vld [vmem:[%s5067_s10 + $0x8] sm:$0xff] }
 0x930   :  { %1188 = vadd.xlane.f32.xlu0 %v1187_v52  ;;  %v3955_v52 = vpack.c.bf16 %v1467_v0, %v1466_v50 }
 0x932   :  { %3956 = vmatprep.subr.bf16.mxu0 %v3955_v52 }
 0x933   :  { %3958 = vmatpush3.bf16.msra.mxu0 %v3955_v52 }
 0x9b4   :  { %v1183_v53 = vpop.xlane.xlu1 %1182 }
 0x9b5   :  { %v1191_v54 = vmul.f32 0.03125, %v1183_v53  ;;  %v1180_v55 = vpop.xlane.xlu0 %1179  ;;  %v1468_v53 = vld [vmem:[%s5067_s10 + $0x10] sm:$0xff] }
 0x9b6   :  { %v1190_v56 = vmul.f32 0.03125, %v1180_v55 }
 0x9b7   :  { %v1195_v57 = vsub.f32 %v4580_v35, %v1191_v54  ;;  %v1469_v54 = vld [vmem:[%s5067_s10 + $0x18] sm:$0xff] }
 0x9b8   :  { %v1194_v1 = vsub.f32 %v4583_v45, %v1190_v56  ;;  %v3959_v55 = vpack.c.bf16 %v1469_v54, %v1468_v53  ;;  %v1470_v56 = vld [vmem:[%s5067_s10 + $0x20] sm:$0xff] }
 0x9b9   :  { %v1186_v58 = vpop.xlane.xlu0 %1185  ;;  %v1199_v59 = vmul.f32 %v1195_v57, %v1195_v57 }
 0x9ba   :  { %v1192_v5 = vmul.f32 0.03125, %v1186_v58  ;;  %v1198_v60 = vmul.f32 %v1194_v1, %v1194_v1  ;;  %3960 = vmatprep.subr.bf16.mxu0 %v3959_v55  ;;  %v1472_v58 = vld [vmem:[%s5067_s10 + $0x30] sm:$0xff] }
 0x9bb   :  { %v1205_v61 = vsel %vm65_vm0, %v1199_v59, 0.0  ;;  %3962 = vmatpush3.bf16.msra.mxu0 %v3959_v55  ;;  %v1473_v59 = vld [vmem:[%s5067_s10 + $0x38] sm:$0xff] }
 0x9bc   :  { %v1196_v62 = vsub.f32 %v4590_v51, %v1192_v5  ;;  %1206 = vadd.xlane.f32.xlu1 %v1205_v61  ;;  %v1202_v63 = vsel %vm65_vm0, %v1198_v60, 0.0  ;;  %v3967_v5 = vpack.c.bf16 %v1473_v59, %v1472_v58  ;;  %v3399_v60 = vld [vmem:[%s5068_s9] ss:$0 sm:$0xff] }
 0x9bd   :  { %1203 = vadd.xlane.f32.xlu0 %v1202_v63  ;;  %v1189_v3 = vpop.xlane.xlu0 %1188 }
 0x9be   :  { %v1193_v4 = vmul.f32 0.03125, %v1189_v3  ;;  %v1200_v7 = vmul.f32 %v1196_v62, %v1196_v62 }
 0x9c0   :  { %v1197_v8 = vsub.f32 %v4593_v2, %v1193_v4  ;;  %v1208_v10 = vsel %vm65_vm0, %v1200_v7, 0.0 }
 0x9c1   :  { %1209 = vadd.xlane.f32.xlu0 %v1208_v10 }
 0x9c2   :  { %v1201_v11 = vmul.f32 %v1197_v8, %v1197_v8 }
 0x9c4   :  { %v1211_v12 = vsel %vm65_vm0, %v1201_v11, 0.0 }
 0x9c5   :  { %1212 = vadd.xlane.f32.xlu1 %v1211_v12 }
 0xa49   :  { %v1207_v18 = vpop.xlane.xlu1 %1206 }
 0xa4a   :  { %v1215_v19 = vmul.f32 0.03125, %v1207_v18  ;;  %v1204_v20 = vpop.xlane.xlu0 %1203 }
 0xa4b   :  { %v1214_v21 = vmul.f32 0.03125, %v1204_v20 }
 0xa4c   :  { %v1219_v22 = vadd.f32 1e-05, %v1215_v19 }
 0xa4d   :  { %v1218_v23 = vadd.f32 1e-05, %v1214_v21 }
 0xa4e   :  { %4195 = vrsqrt.f32 %v1219_v22  ;;  %v1210_v24 = vpop.xlane.xlu0 %1209 }
 0xa4f   :  { %4197 = vrsqrt.f32 %v1218_v23  ;;  %v1216_v25 = vmul.f32 0.03125, %v1210_v24 }
 0xa51   :  { %v1220_v28 = vadd.f32 1e-05, %v1216_v25 }
 0xa52   :  { %v1213_v29 = vpop.xlane.xlu1 %1212 }
 0xa53   :  { %4199 = vrsqrt.f32 %v1220_v28  ;;  %v1217_v30 = vmul.f32 0.03125, %v1213_v29 }
 0xa55   :  { %v1221_v31 = vadd.f32 1e-05, %v1217_v30 }
 0xa57   :  { %4201 = vrsqrt.f32 %v1221_v31 }
 0xa58   :  { %v4196_v32 = vpop.eup %4195 }
 0xa59   :  { %v4198_v36 = vpop.eup %4197  ;;  %v1227_v37 = vmul.f32 %v4196_v32, %v1195_v57  ;;  %v1471_v57 = vld [vmem:[%s5067_s10 + $0x28] sm:$0xff] }
 0xa5a   :  { %v1226_v38 = vmul.f32 %v4198_v36, %v1194_v1  ;;  %v3963_v1 = vpack.c.bf16 %v1471_v57, %v1470_v56 }
 0xa5b   :  { %v1237_v40 = vmul.f32 %v3397_v33, %v1227_v37 }
 0xa5c   :  { %v1236_v41 = vmul.f32 %v3397_v33, %v1226_v38  ;;  %3964 = vmatprep.subr.bf16.mxu0 %v3963_v1 }
 0xa5d   :  { %v4200_v27 = vpop.eup %4199  ;;  %v1247_v43 = vadd.f32 %v3398_v39, %v1237_v40  ;;  %3966 = vmatpush3.bf16.msra.mxu0 %v3963_v1 }
 0xa5e   :  { %v1246_v42 = vadd.f32 %v3398_v39, %v1236_v41  ;;  %v1228_v26 = vmul.f32 %v4200_v27, %v1196_v62  ;;  %3968 = vmatprep.subr.bf16.mxu0 %v3967_v5 }
 0xa60   :  { %3721 = vmatprep.mubr.msk.f32.mxu1 %vm65_vm0, %v1246_v42  ;;  %v1238_v44 = vmul.f32 %v3397_v33, %v1228_v26 }
 0xa61   :  { %v4202_v46 = vpop.eup %4201  ;;  %3722 = vmatmul.mubr.msk.f32.vlgmr.msra.gmra.mrb[10].mxu1 %vm65_vm0, %v1247_v43  ;;  %3970 = vmatpush3.bf16.msra.mxu0 %v3967_v5 }
 0xa62   :  { %v1248_v47 = vadd.f32 %v3398_v39, %v1238_v44  ;;  %v1229_v34 = vmul.f32 %v4202_v46, %v1197_v8 }
 0xa64   :  { %3724 = vmatprep.mubr.msk.f32.mxu1 %vm65_vm0, %v1248_v47  ;;  %v1239_v48 = vmul.f32 %v3397_v33, %v1229_v34 }
 0xa66   :  { %v1249_v49 = vadd.f32 %v3398_v39, %v1239_v48 }
 0xa68   :  { %3725 = vmatmul.mubr.msk.f32.gmra.mrb[12].mxu1 %vm65_vm0, %v1249_v49 }
 0xb34   :  { %v3723_v61 = vpop.f32.mrb[10].mxu1 }
 0xb35   :  { %v4656_v62 = vadd.f32 %v3723_v61, %v3399_v60  ;;  %v1339_v63 = vpop.f32.mrb[11].mxu1 }
 0xb36   :  { %v4658_v3 = vadd.f32 %v3399_v60, %v1339_v63 }
 0xb37   :  { %v4661_v4 = vmul.f32 0.70710677, %v4656_v62 }
 0xb38   :  { %v4664_v7 = vmul.f32 0.70710677, %v4658_v3 }
 0xb39   :  { %v1375_v8 = vand.u32 2147483647, %v4661_v4  ;;  %vm1367_vm4 = vcmp.ge.f32.partialorder %v4661_v4, 0.0 }
 0xb3a   :  { %v1374_v10 = vand.u32 2147483647, %v4664_v7  ;;  %vm1366_vm5 = vcmp.ge.f32.partialorder %v4664_v7, 0.0  ;;  %v1358_v7 = vmul.f32 0.5, %v4658_v3 }
 0xb3b   :  { %v1379_v11 = vmul.f32 0.3275911, %v1375_v8  ;;  %v3726_v12 = vpop.f32.mrb[12].mxu1  ;;  %v1431_v25 = vsub.f32 0.0, %v1375_v8 }
 0xb3c   :  { %v1378_v14 = vmul.f32 0.3275911, %v1374_v10  ;;  %v4668_v9 = vadd.f32 %v3726_v12, %v3399_v60  ;;  %v1349_v15 = vpop.f32.mrb[13].mxu1  ;;  %v1430_v29 = vsub.f32 0.0, %v1374_v10 }
 0xb3d   :  { %v1383_v16 = vadd.f32 1.0, %v1379_v11  ;;  %v4670_v6 = vadd.f32 %v3399_v60, %v1349_v15  ;;  %v1435_v31 = vmul.f32 %v1431_v25, %v1375_v8 }
 0xb3e   :  { %v1382_v17 = vadd.f32 1.0, %v1378_v14  ;;  %v4673_v18 = vmul.f32 0.70710677, %v4668_v9  ;;  %v1434_v36 = vmul.f32 %v1430_v29, %v1374_v10 }
 0xb3f   :  { %4203 = vrcp.f32 %v1383_v16  ;;  %v4676_v19 = vmul.f32 0.70710677, %v4670_v6  ;;  %v1440_v40 = vmul.f32 1.442695, %v1435_v31  ;;  %v4291_v31 = vmov -1.0  }
 0xb40   :  { %4205 = vrcp.f32 %v1382_v17  ;;  %v1377_v20 = vand.u32 2147483647, %v4673_v18  ;;  %v1438_v26 = vmul.f32 1.442695, %v1434_v36  ;;  %vm1369_vm6 = vcmp.ge.f32.partialorder %v4673_v18, 0.0 }
 0xb41   :  { %v1376_v21 = vand.u32 2147483647, %v4676_v19  ;;  %vm1368_vm7 = vcmp.ge.f32.partialorder %v4676_v19, 0.0 }
 0xb42   :  { %v1381_v22 = vmul.f32 0.3275911, %v1377_v20  ;;  %v1433_v39 = vsub.f32 0.0, %v1377_v20 }
 0xb43   :  { %v1380_v23 = vmul.f32 0.3275911, %v1376_v21  ;;  %v1432_v27 = vsub.f32 0.0, %v1376_v21 }
 0xb44   :  { %v1385_v24 = vadd.f32 1.0, %v1381_v22  ;;  %v1437_v47 = vmul.f32 %v1433_v39, %v1377_v20 }
 0xb45   :  { %v1384_v28 = vadd.f32 1.0, %v1380_v23  ;;  %v1436_v50 = vmul.f32 %v1432_v27, %v1376_v21 }
 0xb46   :  { %4207 = vrcp.f32 %v1385_v24  ;;  %v1444_v56 = vmul.f32 1.442695, %v1437_v47 }
 0xb47   :  { %4209 = vrcp.f32 %v1384_v28  ;;  %v1442_v59 = vmul.f32 1.442695, %v1436_v50 }
 0xb48   :  { %4211 = vpow2.f32 %v1440_v40 }
 0xb49   :  { %v4204_v30 = vpop.eup %4203  ;;  %4213 = vpow2.f32 %v1438_v26 }
 0xb4a   :  { %v4206_v32 = vpop.eup %4205  ;;  %v1395_v33 = vmul.f32 1.0614054, %v4204_v30  ;;  %4215 = vpow2.f32 %v1444_v56  ;;  %v3404_v56 = vld [vmem:[%s5069_s11] ss:$0 sm:$0xff] }
 0xb4b   :  { %v1394_v37 = vmul.f32 1.0614054, %v4206_v32  ;;  %4217 = vpow2.f32 %v1442_v59 }
 0xb4c   :  { %v1399_v38 = vadd.f32 -1.4531521, %v1395_v33  ;;  %v1371_v33 = vsel %vm1367_vm4, 1.0, %v4291_v31 }
 0xb4d   :  { %v1398_v41 = vadd.f32 -1.4531521, %v1394_v37 }
 0xb4e   :  { %v1403_v42 = vmul.f32 %v4204_v30, %v1399_v38 }
 0xb4f   :  { %v1402_v43 = vmul.f32 %v4206_v32, %v1398_v41 }
 0xb50   :  { %v4208_v44 = vpop.eup %4207  ;;  %v1407_v46 = vadd.f32 1.4214138, %v1403_v42 }
 0xb51   :  { %v4210_v34 = vpop.eup %4209  ;;  %v1406_v48 = vadd.f32 1.4214138, %v1402_v43  ;;  %v1397_v49 = vmul.f32 1.0614054, %v4208_v44 }
 0xb52   :  { %v1411_v0 = vmul.f32 %v4204_v30, %v1407_v46  ;;  %v1396_v52 = vmul.f32 1.0614054, %v4210_v34  ;;  %v4212_v16 = vpop.eup %4211  ;;  %v1359_v46 = vmul.f32 0.5, %v4656_v62  ;;  %v1360_v62 = vmul.f32 0.5, %v4670_v6 }
 0xb53   :  { %v1410_v53 = vmul.f32 %v4206_v32, %v1406_v48  ;;  %v1401_v54 = vadd.f32 -1.4531521, %v1397_v49  ;;  %v4214_v21 = vpop.eup %4213 }
 0xb54   :  { %v1415_v55 = vadd.f32 -0.28449672, %v1411_v0  ;;  %v1400_v57 = vadd.f32 -1.4531521, %v1396_v52  ;;  %v4216_v4 = vpop.eup %4215  ;;  %v1372_v52 = vsel %vm1368_vm7, 1.0, %v4291_v31 }
 0xb55   :  { %v1414_v1 = vadd.f32 -0.28449672, %v1410_v53  ;;  %v1405_v58 = vmul.f32 %v4208_v44, %v1401_v54  ;;  %v4218_v42 = vpop.eup %4217  ;;  %v1361_v53 = vmul.f32 0.5, %v4668_v9 }
 0xb56   :  { %v1419_v5 = vmul.f32 %v4204_v30, %v1415_v55  ;;  %v1404_v60 = vmul.f32 %v4210_v34, %v1400_v57 }
 0xb57   :  { %v1418_v61 = vmul.f32 %v4206_v32, %v1414_v1  ;;  %v1409_v63 = vadd.f32 1.4214138, %v1405_v58 }
 0xb58   :  { %v1423_v8 = vadd.f32 0.2548296, %v1419_v5  ;;  %v1408_v10 = vadd.f32 1.4214138, %v1404_v60 }
 0xb59   :  { %v1422_v11 = vadd.f32 0.2548296, %v1418_v61  ;;  %v1413_v12 = vmul.f32 %v4208_v44, %v1409_v63 }
 0xb5a   :  { %v1427_v14 = vmul.f32 %v4204_v30, %v1423_v8  ;;  %v1412_v15 = vmul.f32 %v4210_v34, %v1408_v10 }
 0xb5b   :  { %v1426_v17 = vmul.f32 %v4206_v32, %v1422_v11  ;;  %v1417_v20 = vadd.f32 -0.28449672, %v1413_v12  ;;  %v1370_v32 = vsel %vm1366_vm5, 1.0, %v4291_v31 }
 0xb5c   :  { %v1447_v22 = vmul.f32 %v4212_v16, %v1427_v14  ;;  %v1416_v23 = vadd.f32 -0.28449672, %v1412_v15 }
 0xb5d   :  { %v1446_v24 = vmul.f32 %v4214_v21, %v1426_v17  ;;  %v1421_v25 = vmul.f32 %v4208_v44, %v1417_v20 }
 0xb5e   :  { %v1451_v28 = vsub.f32 1.0, %v1447_v22  ;;  %v1420_v29 = vmul.f32 %v4210_v34, %v1416_v23 }
 0xb5f   :  { %v1450_v36 = vsub.f32 1.0, %v1446_v24  ;;  %v1425_v30 = vadd.f32 0.2548296, %v1421_v25 }
 0xb60   :  { %v1455_v37 = vmul.f32 %v1451_v28, %v1371_v33  ;;  %v1424_v38 = vadd.f32 0.2548296, %v1420_v29 }
 0xb61   :  { %v1454_v39 = vmul.f32 %v1450_v36, %v1370_v32  ;;  %v1429_v40 = vmul.f32 %v4208_v44, %v1425_v30  ;;  %v1373_v44 = vsel %vm1369_vm6, 1.0, %v4291_v31 }
 0xb62   :  { %v1459_v41 = vadd.f32 1.0, %v1455_v37  ;;  %v1428_v27 = vmul.f32 %v4210_v34, %v1424_v38 }
 0xb63   :  { %v1458_v26 = vadd.f32 1.0, %v1454_v39  ;;  %v1449_v43 = vmul.f32 %v4216_v4, %v1429_v40  ;;  %v3413_v39 = vld [vmem:[%s5086_s23 + $0x20] sm:$0xff]  ;;  %v3414_v40 = vld [vmem:[%s5086_s23 + $0x28] sm:$0xff] }
 0xb64   :  { %v1448_v47 = vmul.f32 %v4218_v42, %v1428_v27  ;;  %v1463_v50 = vmul.f32 %v1459_v41, %v1359_v46  ;;  %v3971_v4 = vpack.c.bf16 %v3414_v40, %v3413_v39  ;;  %v3415_v41 = vld [vmem:[%s5086_s23 + $0x30] sm:$0xff]  ;;  %v3416_v27 = vld [vmem:[%s5086_s23 + $0x38] sm:$0xff] }
 0xb65   :  { %v1462_v48 = vmul.f32 %v1458_v26, %v1358_v7  ;;  %v1453_v49 = vsub.f32 1.0, %v1449_v43  ;;  %v3975_v42 = vpack.c.bf16 %v3416_v27, %v3415_v41 }
 0xb66   :  { %v1452_v0 = vsub.f32 1.0, %v1448_v47  ;;  %3972 = vmatprep.subr.bf16.mxu1 %v3971_v4 }
 0xb67   :  { %v1457_v34 = vmul.f32 %v1453_v49, %v1373_v44  ;;  %3743 = vmatprep.mubr.msk.f32.mxu0 %vm1481_vm8, %v1462_v48  ;;  %3974 = vmatpush3.bf16.msra.mxu1 %v3971_v4 }
 0xb68   :  { %v1456_v3 = vmul.f32 %v1452_v0, %v1372_v52  ;;  %3744 = vmatmul.mubr.msk.f32.vlgmr.msra.gmra.mrb[14].mxu0 %vm1481_vm8, %v1463_v50  ;;  %3976 = vmatprep.subr.bf16.mxu1 %v3975_v42 }
 0xb69   :  { %v1461_v18 = vadd.f32 1.0, %v1457_v34 }
 0xb6a   :  { %v1460_v19 = vadd.f32 1.0, %v1456_v3 }
 0xb6b   :  { %v1465_v55 = vmul.f32 %v1461_v18, %v1361_v53  ;;  %3978 = vmatpush3.bf16.msra.mxu1 %v3975_v42  ;;  %v3411_v18 = vld [vmem:[%s5087_s19 + $0x1] ss:$0 sm:$0xff] }
 0xb6c   :  { %v1464_v54 = vmul.f32 %v1460_v19, %v1360_v62  ;;  %v3412_v53 = vld [vmem:[%s5061_s2 + $0x1] ss:$0 sm:$0xff] }
 0xb6e   :  { %3746 = vmatprep.mubr.msk.f32.mxu0 %vm1481_vm8, %v1464_v54 }
 0xb6f   :  { %3747 = vmatmul.mubr.msk.f32.gmra.mrb[16].mxu0 %vm1481_vm8, %v1465_v55 }
 0xc3b   :  { %v3745_v57 = vpop.f32.mrb[14].mxu0 }
 0xc3c   :  { %v1566_v1 = vadd.f32 %v3745_v57, %v3404_v56  ;;  %v1560_v58 = vpop.f32.mrb[15].mxu0 }
 0xc3d   :  { %v1561_v59 = vadd.f32 %v3404_v56, %v1560_v58 }
 0xc3e   :  { %v4700_v5 = vadd.f32 %v1566_v1, %v4580_v35 }
 0xc3f   :  { %v4703_v6 = vadd.f32 %v1561_v59, %v4583_v45 }
 0xc40   :  { %v1590_v9 = vsel %vm65_vm0, %v4700_v5, 0.0 }
 0xc41   :  { %1591 = vadd.xlane.f32.xlu1 %v1590_v9  ;;  %v1587_v60 = vsel %vm65_vm0, %v4703_v6, 0.0 }
 0xc42   :  { %1588 = vadd.xlane.f32.xlu0 %v1587_v60  ;;  %v3748_v61 = vpop.f32.mrb[16].mxu0 }
 0xc43   :  { %v1576_v63 = vadd.f32 %v3748_v61, %v3404_v56  ;;  %v1570_v8 = vpop.f32.mrb[17].mxu0 }
 0xc44   :  { %v1571_v10 = vadd.f32 %v3404_v56, %v1570_v8 }
 0xc45   :  { %v4710_v11 = vadd.f32 %v1576_v63, %v4593_v2 }
 0xc46   :  { %v4713_v35 = vadd.f32 %v1571_v10, %v4590_v51 }
 0xc47   :  { %v1596_v45 = vsel %vm65_vm0, %v4710_v11, 0.0 }
 0xc48   :  { %1597 = vadd.xlane.f32.xlu1 %v1596_v45  ;;  %v1593_v12 = vsel %vm65_vm0, %v4713_v35, 0.0 }
 0xc49   :  { %1594 = vadd.xlane.f32.xlu0 %v1593_v12 }
 0xcce   :  { %v1592_v14 = vpop.xlane.xlu1 %1591 }
 0xccf   :  { %v1600_v15 = vmul.f32 0.03125, %v1592_v14  ;;  %v1589_v16 = vpop.xlane.xlu0 %1588 }
 0xcd0   :  { %v1599_v17 = vmul.f32 0.03125, %v1589_v16 }
 0xcd1   :  { %v1604_v20 = vsub.f32 %v4700_v5, %v1600_v15 }
 0xcd2   :  { %v1603_v2 = vsub.f32 %v4703_v6, %v1599_v17 }
 0xcd3   :  { %v1608_v21 = vmul.f32 %v1604_v20, %v1604_v20 }
 0xcd4   :  { %v1607_v22 = vmul.f32 %v1603_v2, %v1603_v2 }
 0xcd5   :  { %v1598_v51 = vpop.xlane.xlu1 %1597  ;;  %v1614_v23 = vsel %vm65_vm0, %v1608_v21, 0.0 }
 0xcd6   :  { %v1602_v24 = vmul.f32 0.03125, %v1598_v51  ;;  %v1595_v25 = vpop.xlane.xlu0 %1594  ;;  %1615 = vadd.xlane.f32.xlu1 %v1614_v23  ;;  %v1611_v28 = vsel %vm65_vm0, %v1607_v22, 0.0 }
 0xcd7   :  { %v1601_v29 = vmul.f32 0.03125, %v1595_v25  ;;  %1612 = vadd.xlane.f32.xlu0 %v1611_v28 }
 0xcd8   :  { %v1606_v33 = vsub.f32 %v4710_v11, %v1602_v24 }
 0xcd9   :  { %v1605_v36 = vsub.f32 %v4713_v35, %v1601_v29 }
 0xcda   :  { %v1610_v30 = vmul.f32 %v1606_v33, %v1606_v33 }
 0xcdb   :  { %v1609_v37 = vmul.f32 %v1605_v36, %v1605_v36 }
 0xcdc   :  { %v1620_v32 = vsel %vm65_vm0, %v1610_v30, 0.0 }
 0xcdd   :  { %1621 = vadd.xlane.f32.xlu1 %v1620_v32  ;;  %v1617_v38 = vsel %vm65_vm0, %v1609_v37, 0.0 }
 0xcde   :  { %1618 = vadd.xlane.f32.xlu0 %v1617_v38 }
 0xd63   :  { %v1616_v7 = vpop.xlane.xlu1 %1615 }
 0xd64   :  { %v1624_v26 = vmul.f32 0.03125, %v1616_v7  ;;  %v1613_v43 = vpop.xlane.xlu0 %1612 }
 0xd65   :  { %v1623_v46 = vmul.f32 0.03125, %v1613_v43 }
 0xd66   :  { %v1628_v47 = vadd.f32 1e-05, %v1624_v26 }
 0xd67   :  { %v1627_v48 = vadd.f32 1e-05, %v1623_v46 }
 0xd68   :  { %4219 = vrsqrt.f32 %v1628_v47 }
 0xd69   :  { %4221 = vrsqrt.f32 %v1627_v48 }
 0xd6a   :  { %v1622_v49 = vpop.xlane.xlu1 %1621 }
 0xd6b   :  { %v1626_v50 = vmul.f32 0.03125, %v1622_v49  ;;  %v1619_v44 = vpop.xlane.xlu0 %1618 }
 0xd6c   :  { %v1625_v0 = vmul.f32 0.03125, %v1619_v44 }
 0xd6d   :  { %v1630_v34 = vadd.f32 1e-05, %v1626_v50 }
 0xd6e   :  { %v1629_v52 = vadd.f32 1e-05, %v1625_v0 }
 0xd6f   :  { %4223 = vrsqrt.f32 %v1630_v34 }
 0xd70   :  { %4225 = vrsqrt.f32 %v1629_v52 }
 0xd72   :  { %v4220_v3 = vpop.eup %4219 }
 0xd73   :  { %v4222_v62 = vpop.eup %4221  ;;  %v1636_v19 = vmul.f32 %v4220_v3, %v1604_v20 }
 0xd74   :  { %v1635_v54 = vmul.f32 %v4222_v62, %v1603_v2 }
 0xd75   :  { %v1646_v55 = vmul.f32 %v3411_v18, %v1636_v19 }
 0xd76   :  { %v1645_v56 = vmul.f32 %v3411_v18, %v1635_v54 }
 0xd77   :  { %v1656_v57 = vadd.f32 %v3412_v53, %v1646_v55 }
 0xd78   :  { %v1655_v1 = vadd.f32 %v3412_v53, %v1645_v56 }
 0xd79   :  { %v4224_v58 = vpop.eup %4223 }
 0xd7a   :  { %v4226_v59 = vpop.eup %4225  ;;  %3757 = vmatprep.mubr.msk.f32.mxu1 %vm65_vm0, %v1655_v1  ;;  %v1638_v9 = vmul.f32 %v4224_v58, %v1606_v33 }
 0xd7b   :  { %3758 = vmatmul.mubr.msk.f32.vlgmr.msra.gmra.mrb[14].mxu1 %vm65_vm0, %v1656_v57  ;;  %v1637_v60 = vmul.f32 %v4226_v59, %v1605_v36 }
 0xd7c   :  { %v1648_v61 = vmul.f32 %v3411_v18, %v1638_v9 }
 0xd7d   :  { %v1647_v63 = vmul.f32 %v3411_v18, %v1637_v60 }
 0xd7e   :  { %v1658_v8 = vadd.f32 %v3412_v53, %v1648_v61 }
 0xd7f   :  { %v1657_v10 = vadd.f32 %v3412_v53, %v1647_v63 }
 0xd81   :  { %3760 = vmatprep.mubr.msk.f32.mxu1 %vm65_vm0, %v1657_v10 }
 0xd82   :  { %3761 = vmatmul.mubr.msk.f32.gmra.mrb[16].mxu1 %vm65_vm0, %v1658_v8 }
 0xe4e   :  { %v4749_v45 = vpop.f32.mrb[14].mxu1 }
 0xe4f   :  { %v4751_v12 = vpop.f32.mrb[15].mxu1 }
 0xe50   :  { %3767 = vmatprep.mubr.msk.f32.mxu1 %vm246_vm1, %v4751_v12  ;;  %v4757_v14 = vpack.i.bf16 %v4749_v45, %v4751_v12 }
 0xe52   :  { %4116 = vrot.lane.b32.xlu0 %v4757_v14, %s4285_s21 }
 0xe55   :  { %v4761_v15 = vpop.f32.mrb[16].mxu1 }
 0xe56   :  { %v4763_v16 = vpop.f32.mrb[17].mxu1 }
 0xe57   :  { %3774 = vmatprep.mubr.msk.f32.mxu0 %vm246_vm1, %v4763_v16  ;;  %v4769_v17 = vpack.i.bf16 %v4761_v15, %v4763_v16 }
 0xe59   :  { %4121 = vrot.lane.b32.xlu1 %v4769_v17, %s4285_s21 }
 0xec4   :  { %v4117_v20 = vpop.permute.xlu0 %4116 }
 0xec5   :  { %v4119_v2 = vunpack.i.h.bf16 %v4117_v20  ;;  %v4118_v21 = vunpack.i.l.bf16 %v4117_v20 }
 0xec7   :  { %v3979_v22 = vpack.c.bf16 %v4119_v2, %v4118_v21 }
 0xec9   :  { %3981 = vmatprep.subr.msk.bf16.mxu1 %vm4474_vm2, %v3979_v22 }
 0xeca   :  { %3984 = vmatpush3.bf16.xpose.msk.msra.mxu1 %vm4474_vm2, %v3979_v22 }
 0xecb   :  { %v4122_v51 = vpop.permute.xlu1 %4121 }
 0xecc   :  { %v4124_v23 = vunpack.i.h.bf16 %v4122_v51  ;;  %v4123_v24 = vunpack.i.l.bf16 %v4122_v51 }
 0xece   :  { %v3985_v25 = vpack.c.bf16 %v4124_v23, %v4123_v24 }
 0xed0   :  { %3987 = vmatprep.subr.msk.bf16.mxu0 %vm4474_vm2, %v3985_v25 }
 0xed1   :  { %3768 = vmatmul.mubr.msk.f32.vlgmr.msra.gmra.mrb[18].mxu1 %vm246_vm1, %v4749_v45  ;;  %3990 = vmatpush3.bf16.xpose.msk.msra.mxu0 %vm4474_vm2, %v3985_v25 }
 0xed8   :  { %3775 = vmatmul.mubr.msk.f32.vlgmr.msra.gmra.mrb[18].mxu0 %vm246_vm1, %v4761_v15 }
 0xfa4   :  { %v3769_v28 = vpop.f32.mrb[18].mxu1 }
 0xfa5   :  { %v1940_v29 = vmul.f32 0.35355338, %v3769_v28  ;;  %v1841_v33 = vpop.f32.mrb[19].mxu1 }
 0xfa6   :  { %v1939_v36 = vmul.f32 0.35355338, %v1841_v33 }
 0xfa7   :  { %v1946_v30 = vsel %vm423_vm3, %v1940_v29, -inf }
 0xfa8   :  { %1947 = vmax.xlane.f32.xlu0 %v1946_v30  ;;  %v1943_v37 = vsel %vm423_vm3, %v1939_v36, -inf }
 0xfa9   :  { %1944 = vmax.xlane.f32.xlu1 %v1943_v37 }
 0xfab   :  { %v3776_v32 = vpop.f32.mrb[18].mxu0 }
 0xfac   :  { %v1942_v38 = vmul.f32 0.35355338, %v3776_v32  ;;  %v1930_v39 = vpop.f32.mrb[19].mxu0 }
 0xfad   :  { %v1941_v40 = vmul.f32 0.35355338, %v1930_v39 }
 0xfae   :  { %v1952_v4 = vsel %vm423_vm3, %v1942_v38, -inf }
 0xfaf   :  { %1953 = vmax.xlane.f32.xlu1 %v1952_v4  ;;  %v1949_v41 = vsel %vm423_vm3, %v1941_v40, -inf }
 0xfb0   :  { %1950 = vmax.xlane.f32.xlu0 %v1949_v41 }
0x1035   :  { %v1948_v27 = vpop.xlane.xlu0 %1947 }
0x1036   :  { %v1956_v42 = vsub.f32 %v1940_v29, %v1948_v27  ;;  %v1945_v7 = vpop.xlane.xlu1 %1944 }
0x1037   :  { %v1955_v26 = vsub.f32 %v1939_v36, %v1945_v7 }
0x1038   :  { %v1961_v43 = vmul.f32 1.442695, %v1956_v42 }
0x1039   :  { %v1959_v46 = vmul.f32 1.442695, %v1955_v26 }
0x103a   :  { %4227 = vpow2.f32 %v1961_v43 }
0x103b   :  { %4229 = vpow2.f32 %v1959_v46 }
0x103c   :  { %v1954_v34 = vpop.xlane.xlu1 %1953 }
0x103d   :  { %v1951_v44 = vpop.xlane.xlu0 %1950  ;;  %v1958_v3 = vsub.f32 %v1942_v38, %v1954_v34 }
0x103e   :  { %v1957_v0 = vsub.f32 %v1941_v40, %v1951_v44 }
0x103f   :  { %v1965_v18 = vmul.f32 1.442695, %v1958_v3 }
0x1040   :  { %v1963_v52 = vmul.f32 1.442695, %v1957_v0 }
0x1042   :  { %4231 = vpow2.f32 %v1963_v52 }
0x1043   :  { %4233 = vpow2.f32 %v1965_v18 }
0x1044   :  { %v4228_v47 = vpop.eup %4227 }
0x1045   :  { %v4230_v48 = vpop.eup %4229  ;;  %v1970_v49 = vsel %vm423_vm3, %v4228_v47, 0.0 }
0x1046   :  { %1971 = vadd.xlane.f32.xlu1 %v1970_v49  ;;  %v1967_v50 = vsel %vm423_vm3, %v4230_v48, 0.0 }
0x1047   :  { %1968 = vadd.xlane.f32.xlu0 %v1967_v50 }
0x104c   :  { %v4232_v62 = vpop.eup %4231 }
0x104d   :  { %v1973_v19 = vsel %vm423_vm3, %v4232_v62, 0.0  ;;  %v4234_v53 = vpop.eup %4233 }
0x104e   :  { %v1976_v54 = vsel %vm423_vm3, %v4234_v53, 0.0 }
0x1057   :  { %4131 = vrot.lane.b32.xlu1 %v4769_v17, %s4286_s22 }
0x105b   :  { %4136 = vrot.lane.b32.xlu1 %v4757_v14, %s4287_s1 }
0x105d   :  { %4126 = vrot.lane.b32.xlu0 %v4757_v14, %s4286_s22 }
0x105f   :  { %4141 = vrot.lane.b32.xlu1 %v4769_v17, %s4287_s1  ;;  %s5090_s1 = smov 8  }
0x107c   :  { %1974 = vadd.xlane.f32.xlu0 %v1973_v19 }
0x1083   :  { %1977 = vadd.xlane.f32.xlu1 %v1976_v54 }
0x1092   :  { %2161 = vrot.lane.b32.xlu0 %v4751_v12, %s4288_s24 }
0x1094   :  { %2163 = vrot.lane.b32.xlu1 %v4749_v45, %s4288_s24 }
0x1096   :  { %2252 = vrot.lane.b32.xlu0 %v4763_v16, %s4288_s24 }
0x1098   :  { %2254 = vrot.lane.b32.xlu1 %v4761_v15, %s4288_s24 }
0x10d3   :  { %v1972_v55 = vpop.xlane.xlu1 %1971 }
0x10d4   :  { %4235 = vrcp.f32 %v1972_v55  ;;  %v1969_v56 = vpop.xlane.xlu0 %1968 }
0x10d5   :  { %4237 = vrcp.f32 %v1969_v56 }
0x10d7   :  { %v4132_v57 = vpop.permute.xlu1 %4131 }
0x10d8   :  { %v4134_v1 = vunpack.i.h.bf16 %v4132_v57  ;;  %v4133_v58 = vunpack.i.l.bf16 %v4132_v57  ;;  %v4127_v59 = vpop.permute.xlu0 %4126 }
0x10d9   :  { %v4129_v9 = vunpack.i.h.bf16 %v4127_v59  ;;  %v4128_v60 = vunpack.i.l.bf16 %v4127_v59 }
0x10da   :  { %v3995_v61 = vpack.c.bf16 %v4134_v1, %v4133_v58 }
0x10db   :  { %v3991_v63 = vpack.c.bf16 %v4129_v9, %v4128_v60  ;;  %v4137_v8 = vpop.permute.xlu1 %4136 }
0x10dc   :  { %v4139_v10 = vunpack.i.h.bf16 %v4137_v8  ;;  %v4138_v45 = vunpack.i.l.bf16 %v4137_v8  ;;  %3996 = vmatprep.subr.bf16.mxu0 %v3995_v61 }
0x10dd   :  { %3992 = vmatprep.subr.bf16.mxu1 %v3991_v63  ;;  %3998 = vmatpush3.bf16.msra.mxu0 %v3995_v61 }
0x10de   :  { %v4236_v12 = vpop.eup %4235  ;;  %v3999_v15 = vpack.c.bf16 %v4139_v10, %v4138_v45  ;;  %3994 = vmatpush3.bf16.msra.mxu1 %v3991_v63 }
0x10df   :  { %v4238_v16 = vpop.eup %4237  ;;  %v4142_v20 = vpop.permute.xlu1 %4141  ;;  %v1984_v51 = vmul.f32 %v4236_v12, %v4228_v47 }
0x10e0   :  { %v4144_v2 = vunpack.i.h.bf16 %v4142_v20  ;;  %v4143_v21 = vunpack.i.l.bf16 %v4142_v20  ;;  %4001 = vmatprep.subr.msk.bf16.mxu1 %vm4474_vm2, %v3999_v15  ;;  %v1983_v22 = vmul.f32 %v4238_v16, %v4230_v48 }
0x10e2   :  { %v4005_v23 = vpack.c.bf16 %v4144_v2, %v4143_v21  ;;  %3781 = vmatprep.mubr.msk.f32.mxu1 %vm423_vm3, %v1983_v22 }
0x10e3   :  { %3782 = vmatmul.mubr.msk.f32.vlgmr.msra.gmra.mrb[20].mxu1 %vm423_vm3, %v1984_v51 }
0x10e4   :  { %4007 = vmatprep.subr.msk.bf16.mxu0 %vm4474_vm2, %v4005_v23 }
0x10e7   :  { %4004 = vmatpush3.bf16.xpose.msk.msra.mxu1 %vm4474_vm2, %v3999_v15 }
0x1109   :  { %v1975_v24 = vpop.xlane.xlu0 %1974 }
0x110a   :  { %4239 = vrcp.f32 %v1975_v24 }
0x110d   :  { %v2162_v25 = vpop.permute.xlu0 %2161 }
0x110e   :  { %3795 = vmatprep.mubr.msk.f32.mxu1 %vm246_vm1, %v2162_v25 }
0x1110   :  { %v1978_v28 = vpop.xlane.xlu1 %1977 }
0x1111   :  { %4241 = vrcp.f32 %v1978_v28  ;;  %v2253_v32 = vpop.permute.xlu0 %2252 }
0x1114   :  { %v4240_v29 = vpop.eup %4239  ;;  %v2164_v33 = vpop.permute.xlu1 %2163 }
0x1115   :  { %3796 = vmatmul.mubr.msk.f32.vlgmr.msra.gmra.mrb[22].mxu1 %vm246_vm1, %v2164_v33  ;;  %v1985_v36 = vmul.f32 %v4240_v29, %v4232_v62 }
0x1117   :  { %3788 = vmatprep.mubr.msk.f32.mxu0 %vm423_vm3, %v1985_v36 }
0x1118   :  { %v2255_v38 = vpop.permute.xlu1 %2254 }
0x111b   :  { %v4242_v30 = vpop.eup %4241 }
0x111c   :  { %v1986_v37 = vmul.f32 %v4242_v30, %v4234_v53 }
0x111e   :  { %3789 = vmatmul.mubr.msk.f32.vlgmr.msra.gmra.mrb[20].mxu0 %vm423_vm3, %v1986_v37  ;;  %v3445_v37 = vld [vmem:[%s5062_s4 + $0x10] sm:$0xff] }
0x111f   :  { %4010 = vmatpush3.bf16.xpose.msk.msra.mxu0 %vm4474_vm2, %v4005_v23  ;;  %3802 = vmatprep.mubr.msk.f32.mxu0 %vm246_vm1, %v2253_v32  ;;  %v3446_v32 = vld [vmem:[%s5062_s4 + $0x18] sm:$0xff] }
0x1126   :  { %3803 = vmatmul.mubr.msk.f32.vlgmr.msra.gmra.mrb[22].mxu0 %vm246_vm1, %v2255_v38  ;;  %v4019_v38 = vpack.c.bf16 %v3446_v32, %v3445_v37 }
0x11b6   :  { %v4825_v39 = vpop.f32.mrb[20].mxu1 }
0x11b7   :  { %v4827_v40 = vpop.f32.mrb[21].mxu1 }
0x11e8   :  { %v3797_v4 = vpop.f32.mrb[22].mxu1 }
0x11e9   :  { %v2344_v41 = vmul.f32 0.35355338, %v3797_v4  ;;  %v2243_v27 = vpop.f32.mrb[23].mxu1 }
0x11ea   :  { %v2343_v42 = vmul.f32 0.35355338, %v2243_v27 }
0x11eb   :  { %v2350_v7 = vsel %vm423_vm3, %v2344_v41, -inf }
0x11ec   :  { %2351 = vmax.xlane.f32.xlu1 %v2350_v7  ;;  %v2347_v26 = vsel %vm423_vm3, %v2343_v42, -inf }
0x11ed   :  { %2348 = vmax.xlane.f32.xlu0 %v2347_v26 }
0x11f1   :  { %v4831_v13 = vpop.f32.mrb[20].mxu0 }
0x11f2   :  { %v4833_v43 = vpop.f32.mrb[21].mxu0 }
0x11f9   :  { %v3804_v46 = vpop.f32.mrb[22].mxu0 }
0x11fa   :  { %v2334_v47 = vpop.f32.mrb[23].mxu0  ;;  %v2346_v49 = vmul.f32 0.35355338, %v3804_v46 }
0x11fb   :  { %v2345_v48 = vmul.f32 0.35355338, %v2334_v47 }
0x11fc   :  { %v2356_v44 = vsel %vm423_vm3, %v2346_v49, -inf }
0x11fd   :  { %v2353_v50 = vsel %vm423_vm3, %v2345_v48, -inf }
0x11fe   :  { %2354 = vmax.xlane.f32.xlu0 %v2353_v50 }
0x1202   :  { %2357 = vmax.xlane.f32.xlu0 %v2356_v44 }
0x1279   :  { %v2352_v0 = vpop.xlane.xlu1 %2351 }
0x127a   :  { %v2360_v34 = vsub.f32 %v2344_v41, %v2352_v0  ;;  %v2349_v52 = vpop.xlane.xlu0 %2348 }
0x127b   :  { %v2359_v3 = vsub.f32 %v2343_v42, %v2349_v52 }
0x127c   :  { %v2365_v18 = vmul.f32 1.442695, %v2360_v34 }
0x127d   :  { %v2363_v62 = vmul.f32 1.442695, %v2359_v3 }
0x127e   :  { %4243 = vpow2.f32 %v2365_v18 }
0x127f   :  { %4245 = vpow2.f32 %v2363_v62 }
0x1288   :  { %v4244_v19 = vpop.eup %4243 }
0x1289   :  { %v4246_v53 = vpop.eup %4245  ;;  %v2374_v54 = vsel %vm423_vm3, %v4244_v19, 0.0 }
0x128a   :  { %2375 = vadd.xlane.f32.xlu1 %v2374_v54  ;;  %v2371_v55 = vsel %vm423_vm3, %v4246_v53, 0.0 }
0x128b   :  { %v2355_v56 = vpop.xlane.xlu0 %2354  ;;  %2372 = vadd.xlane.f32.xlu0 %v2371_v55 }
0x128c   :  { %v2361_v57 = vsub.f32 %v2345_v48, %v2355_v56 }
0x128e   :  { %v2367_v1 = vmul.f32 1.442695, %v2361_v57 }
0x128f   :  { %v2358_v58 = vpop.xlane.xlu0 %2357 }
0x1290   :  { %4247 = vpow2.f32 %v2367_v1  ;;  %v2362_v59 = vsub.f32 %v2346_v49, %v2358_v58 }
0x1292   :  { %v2369_v9 = vmul.f32 1.442695, %v2362_v59 }
0x1294   :  { %4249 = vpow2.f32 %v2369_v9 }
0x129a   :  { %v4248_v60 = vpop.eup %4247 }
0x129b   :  { %v2377_v61 = vsel %vm423_vm3, %v4248_v60, 0.0 }
0x129c   :  { %2378 = vadd.xlane.f32.xlu0 %v2377_v61 }
0x129e   :  { %v4250_v63 = vpop.eup %4249 }
0x129f   :  { %v2380_v8 = vsel %vm423_vm3, %v4250_v63, 0.0 }
0x12a0   :  { %2381 = vadd.xlane.f32.xlu1 %v2380_v8 }
0x12b1   :  { %4151 = vrot.lane.b32.xlu1 %v4769_v17, %s4289_s25 }
0x12b2   :  { %4146 = vrot.lane.b32.xlu0 %v4757_v14, %s4289_s25 }
0x1317   :  { %v2376_v12 = vpop.xlane.xlu1 %2375 }
0x1318   :  { %v2373_v10 = vpop.xlane.xlu0 %2372 }
0x1319   :  { %4251 = vrcp.f32 %v2373_v10 }
0x131a   :  { %4253 = vrcp.f32 %v2376_v12 }
0x1323   :  { %v4252_v45 = vpop.eup %4251 }
0x1324   :  { %v2387_v15 = vmul.f32 %v4252_v45, %v4246_v53  ;;  %v4254_v17 = vpop.eup %4253 }
0x1325   :  { %v2388_v28 = vmul.f32 %v4254_v17, %v4244_v19  ;;  %v3458_v17 = vld [vmem:[%s5064_s8 + $0x28] sm:$0xff] }
0x1326   :  { %3809 = vmatprep.mubr.msk.f32.mxu1 %vm423_vm3, %v2387_v15 }
0x1329   :  { %v2379_v16 = vpop.xlane.xlu0 %2378 }
0x132a   :  { %4255 = vrcp.f32 %v2379_v16 }
0x132d   :  { %v2382_v20 = vpop.xlane.xlu1 %2381  ;;  %v4147_v2 = vpop.permute.xlu0 %4146 }
0x132e   :  { %4257 = vrcp.f32 %v2382_v20  ;;  %v4149_v21 = vunpack.i.h.bf16 %v4147_v2  ;;  %v4148_v22 = vunpack.i.l.bf16 %v4147_v2 }
0x1330   :  { %v4011_v51 = vpack.c.bf16 %v4149_v21, %v4148_v22 }
0x1331   :  { %v4152_v23 = vpop.permute.xlu1 %4151 }
0x1332   :  { %v4154_v24 = vunpack.i.h.bf16 %v4152_v23  ;;  %v4153_v14 = vunpack.i.l.bf16 %v4152_v23  ;;  %4012 = vmatprep.subr.bf16.mxu1 %v4011_v51 }
0x1333   :  { %4014 = vmatpush3.bf16.msra.mxu1 %v4011_v51  ;;  %v3457_v51 = vld [vmem:[%s5064_s8 + $0x20] sm:$0xff] }
0x1334   :  { %v4256_v25 = vpop.eup %4255  ;;  %v4015_v29 = vpack.c.bf16 %v4154_v24, %v4153_v14  ;;  %4020 = vmatprep.subr.bf16.mxu1 %v4019_v38  ;;  %v4023_v23 = vpack.c.bf16 %v3458_v17, %v3457_v51  ;;  %v3459_v24 = vld [vmem:[%s5064_s8 + $0x30] sm:$0xff]  ;;  %v3460_v14 = vld [vmem:[%s5064_s8 + $0x38] sm:$0xff] }
0x1335   :  { %v2389_v33 = vmul.f32 %v4256_v25, %v4248_v60  ;;  %v4027_v25 = vpack.c.bf16 %v3460_v14, %v3459_v24 }
0x1336   :  { %3810 = vmatmul.mubr.msk.f32.vlgmr.msra.gmra.mrb[24].mxu1 %vm423_vm3, %v2388_v28  ;;  %4016 = vmatprep.subr.bf16.mxu0 %v4015_v29 }
0x1337   :  { %4018 = vmatpush3.bf16.msra.mxu0 %v4015_v29  ;;  %3816 = vmatprep.mubr.msk.f32.mxu0 %vm423_vm3, %v2389_v33 }
0x1338   :  { %v4258_v36 = vpop.eup %4257  ;;  %4022 = vmatpush3.bf16.msra.mxu1 %v4019_v38  ;;  %4024 = vmatprep.subr.bf16.mxu0 %v4023_v23 }
0x1339   :  { %v2390_v30 = vmul.f32 %v4258_v36, %v4250_v63 }
0x133b   :  { %3817 = vmatmul.mubr.msk.f32.vlgmr.msra.gmra.mrb[24].mxu0 %vm423_vm3, %v2390_v30 }
0x133c   :  { %4026 = vmatpush3.bf16.msra.mxu0 %v4023_v23 }
0x133d   :  { %4028 = vmatprep.subr.bf16.mxu0 %v4027_v25 }
0x1340   :  { %4030 = vmatpush3.bf16.msra.mxu0 %v4027_v25 }
0x1409   :  { %v3811_v4 = vpop.f32.mrb[24].mxu1 }
0x140a   :  { %v2469_v41 = vpop.f32.mrb[25].mxu1 }
0x140b   :  { %2569 = vrot.lane.b32.xlu1 %v2469_v41, %s5090_s1 }
0x140e   :  { %v3818_v27 = vpop.f32.mrb[24].mxu0 }
0x140f   :  { %v2556_v42 = vpop.f32.mrb[25].mxu0  ;;  %2571 = vrot.lane.b32.xlu1 %v3811_v4, %s5090_s1 }
0x1410   :  { %2573 = vrot.lane.b32.xlu0 %v2556_v42, %s5090_s1 }
0x1413   :  { %2575 = vrot.lane.b32.xlu1 %v3818_v27, %s5090_s1 }
0x147d   :  { %v2570_v7 = vpop.permute.xlu1 %2569 }
0x147e   :  { %v2581_v26 = vsel %vm246_vm1, %v4827_v40, %v2570_v7  ;;  %v3448_v40 = vld [vmem:[%s5063_s5 + $0x1] ss:$0 sm:$0xff] }
0x147f   :  { %3823 = vmatprep.mubr.msk.f32.mxu1 %vm423_vm3, %v2581_v26  ;;  %v3455_v26 = vld [vmem:[%s5065_s6 + $0x1] ss:$0 sm:$0xff] }
0x1481   :  { %v2572_v46 = vpop.permute.xlu1 %2571 }
0x1482   :  { %v2582_v47 = vsel %vm246_vm1, %v4825_v39, %v2572_v46  ;;  %v2574_v48 = vpop.permute.xlu0 %2573 }
0x1483   :  { %v2583_v49 = vsel %vm246_vm1, %v4833_v43, %v2574_v48  ;;  %3824 = vmatmul.mubr.msk.f32.vlgmr.msra.gmra.mrb[26].mxu1 %vm423_vm3, %v2582_v47 }
0x1484   :  { %3826 = vmatprep.mubr.msk.f32.mxu1 %vm423_vm3, %v2583_v49  ;;  %v3456_v49 = vld [vmem:[%s5066_s7 + $0x1] ss:$0 sm:$0xff] }
0x1485   :  { %v2576_v50 = vpop.permute.xlu1 %2575 }
0x1486   :  { %v2584_v44 = vsel %vm246_vm1, %v4831_v13, %v2576_v50 }
0x1487   :  { %3827 = vmatmul.mubr.msk.f32.gmra.mrb[28].mxu1 %vm423_vm3, %v2584_v44 }
0x1556   :  { %v3825_v0 = vpop.f32.mrb[26].mxu1 }
0x1557   :  { %v2680_v39 = vadd.f32 %v3825_v0, %v3448_v40  ;;  %v2674_v34 = vpop.f32.mrb[27].mxu1 }
0x1558   :  { %v2675_v52 = vadd.f32 %v3448_v40, %v2674_v34 }
0x1559   :  { %v4875_v43 = vadd.f32 %v2680_v39, %v4700_v5 }
0x155a   :  { %v4878_v3 = vadd.f32 %v2675_v52, %v4703_v6  ;;  %v3828_v18 = vpop.f32.mrb[28].mxu1 }
0x155b   :  { %v2684_v62 = vpop.f32.mrb[29].mxu1  ;;  %v2704_v13 = vsel %vm65_vm0, %v4875_v43, 0.0  ;;  %v2690_v19 = vadd.f32 %v3828_v18, %v3448_v40 }
0x155c   :  { %v2685_v53 = vadd.f32 %v3448_v40, %v2684_v62  ;;  %2705 = vadd.xlane.f32.xlu1 %v2704_v13  ;;  %v2701_v54 = vsel %vm65_vm0, %v4878_v3, 0.0 }
0x155d   :  { %2702 = vadd.xlane.f32.xlu0 %v2701_v54  ;;  %v4888_v5 = vadd.f32 %v2690_v19, %v4710_v11  ;;  %v3467_v54 = vld [vmem:[%s5067_s10 + $0x40] sm:$0xff] }
0x155e   :  { %v4885_v55 = vadd.f32 %v2685_v53, %v4713_v35 }
0x155f   :  { %v2710_v56 = vsel %vm65_vm0, %v4888_v5, 0.0 }
0x1560   :  { %v2707_v6 = vsel %vm65_vm0, %v4885_v55, 0.0 }
0x1561   :  { %2708 = vadd.xlane.f32.xlu0 %v2707_v6  ;;  %v3468_v6 = vld [vmem:[%s5067_s10 + $0x48] sm:$0xff] }
0x1565   :  { %2711 = vadd.xlane.f32.xlu0 %v2710_v56  ;;  %v4031_v56 = vpack.c.bf16 %v3468_v6, %v3467_v54 }
0x1567   :  { %4032 = vmatprep.subr.bf16.mxu1 %v4031_v56 }
0x1568   :  { %4034 = vmatpush3.bf16.msra.mxu1 %v4031_v56 }
0x15e9   :  { %v2706_v57 = vpop.xlane.xlu1 %2705 }
0x15ea   :  { %v2714_v1 = vmul.f32 0.03125, %v2706_v57  ;;  %v2703_v58 = vpop.xlane.xlu0 %2702  ;;  %v3469_v57 = vld [vmem:[%s5067_s10 + $0x50] sm:$0xff] }
0x15eb   :  { %v2713_v59 = vmul.f32 0.03125, %v2703_v58 }
0x15ec   :  { %v2718_v9 = vsub.f32 %v4875_v43, %v2714_v1  ;;  %v3470_v1 = vld [vmem:[%s5067_s10 + $0x58] sm:$0xff] }
0x15ed   :  { %v2717_v35 = vsub.f32 %v4878_v3, %v2713_v59  ;;  %v4035_v58 = vpack.c.bf16 %v3470_v1, %v3469_v57  ;;  %v3471_v59 = vld [vmem:[%s5067_s10 + $0x60] sm:$0xff] }
0x15ee   :  { %v2709_v60 = vpop.xlane.xlu0 %2708  ;;  %v2722_v61 = vmul.f32 %v2718_v9, %v2718_v9 }
0x15ef   :  { %v2715_v11 = vmul.f32 0.03125, %v2709_v60  ;;  %v2721_v63 = vmul.f32 %v2717_v35, %v2717_v35  ;;  %4036 = vmatprep.subr.bf16.mxu1 %v4035_v58  ;;  %v3473_v60 = vld [vmem:[%s5067_s10 + $0x70] sm:$0xff] }
0x15f0   :  { %v2728_v8 = vsel %vm65_vm0, %v2722_v61, 0.0  ;;  %4038 = vmatpush3.bf16.msra.mxu1 %v4035_v58  ;;  %v3474_v61 = vld [vmem:[%s5067_s10 + $0x78] sm:$0xff] }
0x15f1   :  { %v2719_v10 = vsub.f32 %v4885_v55, %v2715_v11  ;;  %2729 = vadd.xlane.f32.xlu1 %v2728_v8  ;;  %v2725_v45 = vsel %vm65_vm0, %v2721_v63, 0.0  ;;  %v4043_v11 = vpack.c.bf16 %v3474_v61, %v3473_v60  ;;  %v3462_v63 = vld [vmem:[%s5068_s9 + $0x1] ss:$0 sm:$0xff] }
0x15f2   :  { %2726 = vadd.xlane.f32.xlu0 %v2725_v45  ;;  %v2712_v12 = vpop.xlane.xlu0 %2711 }
0x15f3   :  { %v2716_v15 = vmul.f32 0.03125, %v2712_v12  ;;  %v2723_v16 = vmul.f32 %v2719_v10, %v2719_v10 }
0x15f5   :  { %v2720_v20 = vsub.f32 %v4888_v5, %v2716_v15  ;;  %v2731_v2 = vsel %vm65_vm0, %v2723_v16, 0.0 }
0x15f6   :  { %2732 = vadd.xlane.f32.xlu0 %v2731_v2 }
0x15f7   :  { %v2724_v21 = vmul.f32 %v2720_v20, %v2720_v20 }
0x15f9   :  { %v2734_v22 = vsel %vm65_vm0, %v2724_v21, 0.0 }
0x15fa   :  { %2735 = vadd.xlane.f32.xlu1 %v2734_v22 }
0x167e   :  { %v2730_v28 = vpop.xlane.xlu1 %2729 }
0x167f   :  { %v2738_v29 = vmul.f32 0.03125, %v2730_v28  ;;  %v2727_v33 = vpop.xlane.xlu0 %2726 }
0x1680   :  { %v2737_v36 = vmul.f32 0.03125, %v2727_v33 }
0x1681   :  { %v2742_v30 = vadd.f32 1e-05, %v2738_v29 }
0x1682   :  { %v2741_v37 = vadd.f32 1e-05, %v2737_v36 }
0x1683   :  { %4259 = vrsqrt.f32 %v2742_v30  ;;  %v2733_v32 = vpop.xlane.xlu0 %2732 }
0x1684   :  { %4261 = vrsqrt.f32 %v2741_v37  ;;  %v2739_v38 = vmul.f32 0.03125, %v2733_v32 }
0x1686   :  { %v2743_v4 = vadd.f32 1e-05, %v2739_v38 }
0x1687   :  { %v2736_v41 = vpop.xlane.xlu1 %2735 }
0x1688   :  { %4263 = vrsqrt.f32 %v2743_v4  ;;  %v2740_v27 = vmul.f32 0.03125, %v2736_v41 }
0x168a   :  { %v2744_v42 = vadd.f32 1e-05, %v2740_v27 }
0x168c   :  { %4265 = vrsqrt.f32 %v2744_v42 }
0x168d   :  { %v4260_v7 = vpop.eup %4259 }
0x168e   :  { %v4262_v46 = vpop.eup %4261  ;;  %v2750_v47 = vmul.f32 %v4260_v7, %v2718_v9  ;;  %v3472_v9 = vld [vmem:[%s5067_s10 + $0x68] sm:$0xff] }
0x168f   :  { %v2749_v48 = vmul.f32 %v4262_v46, %v2717_v35  ;;  %v4039_v35 = vpack.c.bf16 %v3472_v9, %v3471_v59 }
0x1690   :  { %v2760_v50 = vmul.f32 %v3455_v26, %v2750_v47 }
0x1691   :  { %v2759_v44 = vmul.f32 %v3455_v26, %v2749_v48  ;;  %4040 = vmatprep.subr.bf16.mxu1 %v4039_v35 }
0x1692   :  { %v4264_v40 = vpop.eup %4263  ;;  %v2770_v34 = vadd.f32 %v3456_v49, %v2760_v50  ;;  %4042 = vmatpush3.bf16.msra.mxu1 %v4039_v35 }
0x1693   :  { %v2769_v0 = vadd.f32 %v3456_v49, %v2759_v44  ;;  %v2751_v39 = vmul.f32 %v4264_v40, %v2719_v10  ;;  %4044 = vmatprep.subr.bf16.mxu1 %v4043_v11 }
0x1695   :  { %3837 = vmatprep.mubr.msk.f32.mxu0 %vm65_vm0, %v2769_v0  ;;  %v2761_v52 = vmul.f32 %v3455_v26, %v2751_v39 }
0x1696   :  { %v4266_v18 = vpop.eup %4265  ;;  %3838 = vmatmul.mubr.msk.f32.vlgmr.msra.gmra.mrb[26].mxu0 %vm65_vm0, %v2770_v34  ;;  %4046 = vmatpush3.bf16.msra.mxu1 %v4043_v11 }
0x1697   :  { %v2771_v62 = vadd.f32 %v3456_v49, %v2761_v52  ;;  %v2752_v13 = vmul.f32 %v4266_v18, %v2720_v20 }
0x1699   :  { %3840 = vmatprep.mubr.msk.f32.mxu0 %vm65_vm0, %v2771_v62  ;;  %v2762_v19 = vmul.f32 %v3455_v26, %v2752_v13 }
0x169b   :  { %v2772_v53 = vadd.f32 %v3456_v49, %v2762_v19 }
0x169d   :  { %3841 = vmatmul.mubr.msk.f32.gmra.mrb[28].mxu0 %vm65_vm0, %v2772_v53 }
0x1769   :  { %v3839_v8 = vpop.f32.mrb[26].mxu0 }
0x176a   :  { %v4951_v10 = vadd.f32 %v3839_v8, %v3462_v63  ;;  %v2864_v45 = vpop.f32.mrb[27].mxu0 }
0x176b   :  { %v4953_v12 = vadd.f32 %v3462_v63, %v2864_v45 }
0x176c   :  { %v4956_v15 = vmul.f32 0.70710677, %v4951_v10 }
0x176d   :  { %v4959_v16 = vmul.f32 0.70710677, %v4953_v12 }
0x176e   :  { %v2900_v20 = vand.u32 2147483647, %v4956_v15  ;;  %vm2892_vm9 = vcmp.ge.f32.partialorder %v4956_v15, 0.0 }
0x176f   :  { %v2899_v2 = vand.u32 2147483647, %v4959_v16  ;;  %vm2891_vm10 = vcmp.ge.f32.partialorder %v4959_v16, 0.0  ;;  %v2883_v16 = vmul.f32 0.5, %v4953_v12 }
0x1770   :  { %v2904_v21 = vmul.f32 0.3275911, %v2900_v20  ;;  %v3842_v22 = vpop.f32.mrb[28].mxu0  ;;  %v2956_v38 = vsub.f32 0.0, %v2900_v20 }
0x1771   :  { %v2903_v51 = vmul.f32 0.3275911, %v2899_v2  ;;  %v4963_v17 = vadd.f32 %v3842_v22, %v3462_v63  ;;  %v2874_v23 = vpop.f32.mrb[29].mxu0  ;;  %v2955_v41 = vsub.f32 0.0, %v2899_v2 }
0x1772   :  { %v2908_v24 = vadd.f32 1.0, %v2904_v21  ;;  %v4965_v14 = vadd.f32 %v3462_v63, %v2874_v23  ;;  %v2960_v42 = vmul.f32 %v2956_v38, %v2900_v20 }
0x1773   :  { %v2907_v25 = vadd.f32 1.0, %v2903_v51  ;;  %v4968_v28 = vmul.f32 0.70710677, %v4963_v17  ;;  %v2959_v46 = vmul.f32 %v2955_v41, %v2899_v2 }
0x1774   :  { %4267 = vrcp.f32 %v2908_v24  ;;  %v4971_v29 = vmul.f32 0.70710677, %v4965_v14  ;;  %v2965_v50 = vmul.f32 1.442695, %v2960_v42  ;;  %v2896_v42 = vsel %vm2892_vm9, 1.0, %v4291_v31 }
0x1775   :  { %4269 = vrcp.f32 %v2907_v25  ;;  %v2902_v33 = vand.u32 2147483647, %v4968_v28  ;;  %v2963_v39 = vmul.f32 1.442695, %v2959_v46  ;;  %vm2894_vm11 = vcmp.ge.f32.partialorder %v4968_v28, 0.0 }
0x1776   :  { %v2901_v36 = vand.u32 2147483647, %v4971_v29  ;;  %vm2893_vm12 = vcmp.ge.f32.partialorder %v4971_v29, 0.0  ;;  %v2886_v29 = vmul.f32 0.5, %v4963_v17 }
0x1777   :  { %v2906_v30 = vmul.f32 0.3275911, %v2902_v33  ;;  %v2958_v49 = vsub.f32 0.0, %v2902_v33 }
0x1778   :  { %v2905_v37 = vmul.f32 0.3275911, %v2901_v36  ;;  %v2957_v40 = vsub.f32 0.0, %v2901_v36 }
0x1779   :  { %v2910_v32 = vadd.f32 1.0, %v2906_v30  ;;  %v2962_v62 = vmul.f32 %v2958_v49, %v2902_v33 }
0x177a   :  { %v2909_v4 = vadd.f32 1.0, %v2905_v37  ;;  %v2961_v54 = vmul.f32 %v2957_v40, %v2901_v36 }
0x177b   :  { %4271 = vrcp.f32 %v2910_v32  ;;  %v2969_v59 = vmul.f32 1.442695, %v2962_v62 }
0x177c   :  { %4273 = vrcp.f32 %v2909_v4  ;;  %v2967_v61 = vmul.f32 1.442695, %v2961_v54 }
0x177d   :  { %4275 = vpow2.f32 %v2965_v50 }
0x177e   :  { %v4268_v27 = vpop.eup %4267  ;;  %4277 = vpow2.f32 %v2963_v39 }
0x177f   :  { %v4270_v7 = vpop.eup %4269  ;;  %v2920_v26 = vmul.f32 1.0614054, %v4268_v27  ;;  %4279 = vpow2.f32 %v2969_v59 }
0x1780   :  { %v2919_v47 = vmul.f32 1.0614054, %v4270_v7  ;;  %4281 = vpow2.f32 %v2967_v61 }
0x1781   :  { %v2924_v48 = vadd.f32 -1.4531521, %v2920_v26 }
0x1782   :  { %v2923_v44 = vadd.f32 -1.4531521, %v2919_v47  ;;  %v2895_v47 = vsel %vm2891_vm10, 1.0, %v4291_v31 }
0x1783   :  { %v2928_v0 = vmul.f32 %v4268_v27, %v2924_v48 }
0x1784   :  { %v2927_v34 = vmul.f32 %v4270_v7, %v2923_v44 }
0x1785   :  { %v4272_v52 = vpop.eup %4271  ;;  %v2932_v18 = vadd.f32 1.4214138, %v2928_v0 }
0x1786   :  { %v4274_v13 = vpop.eup %4273  ;;  %v2931_v19 = vadd.f32 1.4214138, %v2927_v34  ;;  %v2922_v53 = vmul.f32 1.0614054, %v4272_v52  ;;  %v2884_v34 = vmul.f32 0.5, %v4951_v10  ;;  %v2885_v10 = vmul.f32 0.5, %v4965_v14 }
0x1787   :  { %v2936_v6 = vmul.f32 %v4268_v27, %v2932_v18  ;;  %v2921_v56 = vmul.f32 1.0614054, %v4274_v13  ;;  %v4276_v24 = vpop.eup %4275 }
0x1788   :  { %v2935_v57 = vmul.f32 %v4270_v7, %v2931_v19  ;;  %v2926_v1 = vadd.f32 -1.4531521, %v2922_v53  ;;  %v4278_v36 = vpop.eup %4277 }
0x1789   :  { %v2940_v58 = vadd.f32 -0.28449672, %v2936_v6  ;;  %v2925_v9 = vadd.f32 -1.4531521, %v2921_v56  ;;  %v4280_v50 = vpop.eup %4279 }
0x178a   :  { %v2939_v35 = vadd.f32 -0.28449672, %v2935_v57  ;;  %v2930_v60 = vmul.f32 %v4272_v52, %v2926_v1  ;;  %v4282_v40 = vpop.eup %4281 }
0x178b   :  { %v2944_v11 = vmul.f32 %v4268_v27, %v2940_v58  ;;  %v2929_v63 = vmul.f32 %v4274_v13, %v2925_v9 }
0x178c   :  { %v2943_v8 = vmul.f32 %v4270_v7, %v2939_v35  ;;  %v2934_v45 = vadd.f32 1.4214138, %v2930_v60 }
0x178d   :  { %v2948_v20 = vadd.f32 0.2548296, %v2944_v11  ;;  %v2933_v2 = vadd.f32 1.4214138, %v2929_v63 }
0x178e   :  { %v2947_v21 = vadd.f32 0.2548296, %v2943_v8  ;;  %v2938_v22 = vmul.f32 %v4272_v52, %v2934_v45 }
0x178f   :  { %v2952_v51 = vmul.f32 %v4268_v27, %v2948_v20  ;;  %v2937_v23 = vmul.f32 %v4274_v13, %v2933_v2 }
0x1790   :  { %v2951_v25 = vmul.f32 %v4270_v7, %v2947_v21  ;;  %v2942_v33 = vadd.f32 -0.28449672, %v2938_v22 }
0x1791   :  { %v2972_v30 = vmul.f32 %v4276_v24, %v2952_v51  ;;  %v2941_v37 = vadd.f32 -0.28449672, %v2937_v23 }
0x1792   :  { %v2971_v32 = vmul.f32 %v4278_v36, %v2951_v25  ;;  %v2946_v38 = vmul.f32 %v4272_v52, %v2942_v33 }
0x1793   :  { %v2976_v4 = vsub.f32 1.0, %v2972_v30  ;;  %v2945_v41 = vmul.f32 %v4274_v13, %v2941_v37 }
0x1794   :  { %v2975_v26 = vsub.f32 1.0, %v2971_v32  ;;  %v2950_v46 = vadd.f32 0.2548296, %v2946_v38 }
0x1795   :  { %v2980_v27 = vmul.f32 %v2976_v4, %v2896_v42  ;;  %v2949_v7 = vadd.f32 0.2548296, %v2945_v41 }
0x1796   :  { %v2979_v48 = vmul.f32 %v2975_v26, %v2895_v47  ;;  %v2954_v49 = vmul.f32 %v4272_v52, %v2950_v46  ;;  %v2898_v52 = vsel %vm2894_vm11, 1.0, %v4291_v31 }
0x1797   :  { %v2984_v15 = vadd.f32 1.0, %v2980_v27  ;;  %v2953_v44 = vmul.f32 %v4274_v13, %v2949_v7  ;;  %v2897_v13 = vsel %vm2893_vm12, 1.0, %v4291_v31  ;;  %v3476_v31 = vld [vmem:[%s5069_s11 + $0x1] ss:$0 sm:$0xff] }
0x1798   :  { %v2983_v0 = vadd.f32 1.0, %v2979_v48  ;;  %v2974_v39 = vmul.f32 %v4280_v50, %v2954_v49 }
0x1799   :  { %v2973_v18 = vmul.f32 %v4282_v40, %v2953_v44  ;;  %v2988_v53 = vmul.f32 %v2984_v15, %v2884_v34  ;;  %v3180_v44 = vld [vmem:[%s5070_s14] sm:$0xff]  ;;  %v3181_v40 = vld [vmem:[%s5070_s14 + $0x8] sm:$0xff]  ;;  %v4292_v34 = vmov 0.0|0.0  }
0x179a   :  { %v2987_v62 = vmul.f32 %v2983_v0, %v2883_v16  ;;  %v2978_v19 = vsub.f32 1.0, %v2974_v39  ;;  %v4048_v16 = vpack.c.bf16 %v3181_v40, %v3180_v44  ;;  %v3182_v0 = vld [vmem:[%s5070_s14 + $0x10] sm:$0xff]  ;;  %v3183_v39 = vld [vmem:[%s5070_s14 + $0x18] sm:$0xff]  ;;  %4047 = vmatprep.subr.bf16.mxu1 %v4292_v34  ;;  %4053 = vmatprep.subr.bf16.mxu0 %v4292_v34 }
0x179b   :  { %v2977_v54 = vsub.f32 1.0, %v2973_v18  ;;  %v4294_v18 = vmov 0.0  }
0x179c   :  { %v2982_v6 = vmul.f32 %v2978_v19, %v2898_v52  ;;  %3859 = vmatprep.mubr.msk.f32.mxu1 %vm1481_vm8, %v2987_v62  ;;  %v4051_v62 = vpack.c.bf16 %v3183_v39, %v3182_v0  ;;  %3892 = vmatprep.mubr.msk.f32.mxu0 %vm4293_vm15, %v4294_v18  ;;  %v3268_v19 = vld [vmem:[%s5071_s16] sm:$0xff]  ;;  %v3270_v52 = vld [vmem:[%s5071_s16 + $0x10] sm:$0xff] }
0x179d   :  { %v2981_v12 = vmul.f32 %v2977_v54, %v2897_v13  ;;  %3860 = vmatmul.mubr.msk.f32.vlgmr.msra.gmra.mrb[30].mxu1 %vm1481_vm8, %v2988_v53  ;;  %v3269_v53 = vld [vmem:[%s5071_s16 + $0x8] sm:$0xff] }
0x179e   :  { %v2986_v28 = vadd.f32 1.0, %v2982_v6  ;;  %4049 = vmatpush3.bf16.msra.mxu1 %v4048_v16  ;;  %v4054_v54 = vpack.c.bf16 %v3269_v53, %v3268_v19  ;;  %v3271_v6 = vld [vmem:[%s5071_s16 + $0x18] sm:$0xff] }
0x179f   :  { %v2985_v56 = vadd.f32 1.0, %v2981_v12  ;;  %4050 = vmatprep.subr.bf16.mxu1 %v4292_v34  ;;  %v4057_v13 = vpack.c.bf16 %v3271_v6, %v3270_v52  ;;  %v3272_v12 = vld [vmem:[%s5071_s16 + $0x20] sm:$0xff] }
0x17a0   :  { %v2990_v1 = vmul.f32 %v2986_v28, %v2886_v29  ;;  %4055 = vmatpush3.bf16.msra.mxu0 %v4054_v54  ;;  %v3273_v28 = vld [vmem:[%s5071_s16 + $0x28] sm:$0xff] }
0x17a1   :  { %v2989_v57 = vmul.f32 %v2985_v56, %v2885_v10  ;;  %4056 = vmatprep.subr.bf16.mxu0 %v4292_v34  ;;  %v4060_v10 = vpack.c.bf16 %v3273_v28, %v3272_v12 }
0x17a2   :  { %4052 = vmatpush3.bf16.msra.mxu1 %v4051_v62 }
0x17a3   :  { %3862 = vmatprep.mubr.msk.f32.mxu1 %vm1481_vm8, %v2989_v57 }
0x17a4   :  { %3863 = vmatmul.mubr.msk.f32.gmra.mrb[32].mxu1 %vm1481_vm8, %v2990_v1  ;;  %4058 = vmatpush3.bf16.msra.mxu0 %v4057_v13 }
0x17a5   :  { %3873 = vmatprep.mubr.msk.f32.mxu1 %vm4293_vm15, %v4294_v18  ;;  %4059 = vmatprep.subr.bf16.mxu0 %v4292_v34 }
0x17a8   :  { %4061 = vmatpush3.bf16.msra.mxu0 %v4060_v10 }
0x17a9   :  { %4062 = vmatprep.subr.bf16.mxu0 %v4292_v34 }
0x1870   :  { %v3861_v58 = vpop.f32.mrb[30].mxu1 }
0x1871   :  { %v3092_v59 = vadd.f32 %v3861_v58, %v3476_v31  ;;  %v3086_v9 = vpop.f32.mrb[31].mxu1 }
0x1872   :  { %v3087_v35 = vadd.f32 %v3476_v31, %v3086_v9 }
0x1873   :  { %v3106_v60 = vadd.f32 %v3092_v59, %v4875_v43  ;;  %v3481_v59 = vld [vmem:[%s5072_s12] ss:$0 sm:$0xff] }
0x1874   :  { %v3105_v14 = vadd.f32 %v3087_v35, %v4878_v3 }
0x1875   :  { %v3110_v17 = vsel %vm65_vm0, %v3106_v60, -inf }
0x1876   :  { %v3109_v61 = vsel %vm65_vm0, %v3105_v14, -inf  ;;  %v3482_v14 = vld [vmem:[%s5073_s13] ss:$0 sm:$0xff] }
0x1877   :  { %v3111_v11 = vmax.f32 %v3109_v61, %v3110_v17  ;;  %v3864_v63 = vpop.f32.mrb[32].mxu1 }
0x1878   :  { %v3102_v8 = vadd.f32 %v3864_v63, %v3476_v31  ;;  %v3096_v45 = vpop.f32.mrb[33].mxu1 }
0x1879   :  { %v3112_v20 = vrot.slane %v3111_v11, 4  ;;  %v3097_v2 = vadd.f32 %v3476_v31, %v3096_v45  ;;  %v3275_v45 = vld [vmem:[%s5071_s16 + $0x38] sm:$0xff] }
0x187a   :  { %v3108_v21 = vadd.f32 %v3102_v8, %v4888_v5  ;;  %v3274_v8 = vld [vmem:[%s5071_s16 + $0x30] sm:$0xff] }
0x187b   :  { %v3113_v22 = vmax.f32 %v3111_v11, %v3112_v20  ;;  %v3107_v51 = vadd.f32 %v3097_v2, %v4885_v55  ;;  %v4063_v20 = vpack.c.bf16 %v3275_v45, %v3274_v8  ;;  %v3483_v2 = vld [vmem:[%s5074_s15] ss:$0 sm:$0xff] }
0x187c   :  { %v3119_v23 = vsel %vm65_vm0, %v3108_v21, -inf }
0x187d   :  { %v3118_v43 = vsel %vm65_vm0, %v3107_v51, -inf  ;;  %v3114_v3 = vrot.slane %v3113_v22, 2  ;;  %4064 = vmatpush3.bf16.msra.mxu0 %v4063_v20 }
0x187e   :  { %v3120_v24 = vmax.f32 %v3118_v43, %v3119_v23  ;;  %v3485_v43 = vld [vmem:[%s5075_s17] ss:$0 sm:$0xff] }
0x187f   :  { %v3115_v36 = vmax.f32 %v3113_v22, %v3114_v3 }
0x1880   :  { %v3121_v25 = vrot.slane %v3120_v24, 4 }
0x1881   :  { %v3116_v37 = vrot.slane %v3115_v36, 1 }
0x1882   :  { %v3122_v33 = vmax.f32 %v3120_v24, %v3121_v25 }
0x1883   :  { %v3117_v4 = vmax.f32 %v3115_v36, %v3116_v37 }
0x1884   :  { %v3123_v30 = vrot.slane %v3122_v33, 2 }
0x1886   :  { %v3124_v32 = vmax.f32 %v3122_v33, %v3123_v30 }
0x1888   :  { %v3125_v38 = vrot.slane %v3124_v32, 1 }
0x188a   :  { %v3126_v41 = vmax.f32 %v3124_v32, %v3125_v38 }
0x188c   :  { %v3132_v5 = vsel %vm3131_vm13, %v3126_v41, %v3117_v4 }
0x188d   :  { %v3135_v55 = vsel %vm3134_vm14, %v3132_v5, 0.0 }
0x188e   :  { %3136 = vadd.xlane.f32.xlu0 %v3135_v55 }
0x191b   :  { %v3137_v42 = vpop.xlane.xlu0 %3136 }
0x191c   :  { %v3138_v26 = vmul.f32 0.03125, %v3137_v42 }
0x191e   :  { %v3140_v46 = vrot.slane %v3138_v26, 1  ;;  %v3143_v27 = vsub.f32 %v3117_v4, %v3138_v26 }
0x1920   :  { %v3144_v47 = vsub.f32 %v3126_v41, %v3140_v46  ;;  %v3145_v48 = vmul.f32 %v3143_v27, %v3143_v27 }
0x1922   :  { %v3146_v7 = vmul.f32 %v3144_v47, %v3144_v47 }
0x1924   :  { %v3149_v49 = vrot.slane %v3146_v7, 7 }
0x1926   :  { %v3150_v50 = vsel %vm3131_vm13, %v3149_v49, %v3145_v48 }
0x1927   :  { %v3152_v15 = vsel %vm3134_vm14, %v3150_v50, 0.0 }
0x1928   :  { %3153 = vadd.xlane.f32.xlu1 %v3152_v15 }
0x19b5   :  { %v3154_v56 = vpop.xlane.xlu1 %3153 }
0x19b6   :  { %v3155_v29 = vmul.f32 0.03125, %v3154_v56 }
0x19b8   :  { %v3156_v57 = vadd.f32 1e-05, %v3155_v29 }
0x19ba   :  { %4283 = vrsqrt.f32 %v3156_v57 }
0x19c4   :  { %v4284_v1 = vpop.eup %4283 }
0x19c5   :  { %v3159_v31 = vrot.slane %v4284_v1, 1  ;;  %v3162_v58 = vmul.f32 %v4284_v1, %v3143_v27 }
0x19c7   :  { %v3163_v9 = vmul.f32 %v3159_v31, %v3144_v47  ;;  %v3170_v35 = vmul.f32 %v3481_v59, %v3162_v58 }
0x19c9   :  { %v3171_v60 = vmul.f32 %v3481_v59, %v3163_v9  ;;  %v3178_v61 = vadd.f32 %v3482_v14, %v3170_v35 }
0x19cb   :  { %v3179_v17 = vadd.f32 %v3482_v14, %v3171_v60 }
0x19cd   :  { %v3193_v11 = vrot.slane %v3179_v17, 7 }
0x19cf   :  { %v3194_v63 = vsel %vm3131_vm13, %v3193_v11, %v3178_v61 }
0x19d0   :  { %3874 = vmatmul.mubr.msk.f32.vlgmr.msra.gmra.mrb[34].mxu1 %vm65_vm0, %v3194_v63  ;;  %vm3356_vm0 = vcmask 410624  }
0x1aa3   :  { %v3263_v21 = vpop.f32.mrb[34].mxu1 }
0x1aa4   :  { %v3264_v22 = vadd.f32 %v3483_v2, %v3263_v21  ;;  %v3875_v51 = vpop.f32.mrb[35].mxu1 }
0x1aa6   :  { %v3267_v23 = vmax.f32 %v3264_v22, 0.0 }
0x1aa8   :  { %3893 = vmatmul.mubr.msk.f32.vlgmr.msra.gmra.mrb[30].mxu0 %vm1481_vm8, %v3267_v23 }
0x1b7b   :  { %v3352_v3 = vpop.f32.mrb[30].mxu0 }
0x1b7c   :  { %v3353_v24 = vadd.f32 %v3485_v43, %v3352_v3  ;;  %v3894_v25 = vpop.f32.mrb[31].mxu0 }
0x1b7e   :  { %3357 = vst.msk [vmem:[%s5076_s18] sm:$0x3] %vm3356_vm0, %v3353_v24 }

</bundles_post_ra>
